<compile_context>
chip_gen: v7x
topology: tpu7x:2x2x1
jax: 0.10.0
libtpu: 0.0.40
codegen_flags: <defaults>
</compile_context>

<pallas_src>
import jax
import jax.numpy as jnp
from jax import lax
from jax.experimental import pallas as pl
from jax.experimental.pallas import tpu as pltpu


def greedy_decode_kernel(
    input_ref,    # (L, 1) int32 token ids                        (VMEM)
    len_ref,      # (1, 1) int32 valid input length               (SMEM)
    emb_ref,      # (V, H)  bf16 shared embedding table
    enc_wx_ref,   # (H, 4H) bf16 encoder LSTM input->gates (i|f|g|o)
    enc_wh_ref,   # (H, 4H) bf16 encoder LSTM hidden->gates
    enc_b_ref,    # (1, 4H) f32  encoder fused bias (b_ih + b_hh)
    dec_wx_ref,   # (H, 4H) bf16 decoder LSTM input->gates
    dec_wh_ref,   # (H, 4H) bf16 decoder LSTM hidden->gates
    dec_b_ref,    # (1, 4H) f32
    wcat_h_ref,   # (H, H)  bf16 concat linear, rnn_output half
    wcat_c_ref,   # (H, H)  bf16 concat linear, context half
    bcat_ref,     # (1, H)  f32
    wout_ref,     # (H, V)  bf16
    bout_ref,     # (1, V)  f32
    tokens_ref,   # out: (1, T) int32
    scores_ref,   # out: (1, T) float32
):
    L = input_ref.shape[0]
    V, H = emb_ref.shape
    T = tokens_ref.shape[1]
    f32, bf16 = jnp.float32, jnp.bfloat16

    seq_len = len_ref[0, 0]                                    # scalar int32

    vocab_iota = lax.broadcasted_iota(jnp.int32, (1, V), 1)    # lanes over vocab
    row_iota = lax.broadcasted_iota(jnp.int32, (L, 1), 0)      # sublanes over seq
    pos_iota = lax.broadcasted_iota(jnp.int32, (1, L), 1)      # lanes over enc pos
    out_iota = lax.broadcasted_iota(jnp.int32, (1, T), 1)      # lanes over dec steps

    # ---- hoist all loop-invariant weight/bias loads (loops are fully unrolled) ----
    emb = emb_ref[...]
    enc_wh = enc_wh_ref[...]
    enc_b = enc_b_ref[...]
    dec_wh = dec_wh_ref[...]
    dec_b = dec_b_ref[...]
    wcat_h = wcat_h_ref[...]
    wcat_c = wcat_c_ref[...]
    bcat = bcat_ref[...]
    wout = wout_ref[...]
    bout = bout_ref[...]

    # Fold embedding into the gate matmul:  x @ Wx == onehot @ (emb @ Wx).
    embwx_enc = jnp.dot(emb, enc_wx_ref[...],
                        preferred_element_type=f32).astype(bf16)        # (V, 4H)
    embwx_dec = jnp.dot(emb, dec_wx_ref[...],
                        preferred_element_type=f32).astype(bf16)        # (V, 4H)

    def lstm_gates_to_state(gates, c):
        # Full-width nonlinearities (one sigmoid + one tanh over (1,4H)), then slice.
        sig = jax.nn.sigmoid(gates)
        th = jnp.tanh(gates)
        i = sig[:, 0:H]
        f = sig[:, H:2 * H]
        o = sig[:, 3 * H:4 * H]
        g = th[:, 2 * H:3 * H]
        c_new = f * c + i * g
        h_new = o * jnp.tanh(c_new)
        return h_new, c_new

    # ---------------- encoder: LSTM over input_seq ----------------
    # All input-side gate contributions in one MXU push: (L,V) one-hot @ (V,4H).
    onehot_all = jnp.where(vocab_iota == input_ref[...], 1.0, 0.0).astype(bf16)  # (L,V)
    enc_xg_all = jnp.dot(onehot_all, embwx_enc, preferred_element_type=f32)      # (L,4H)

    h = jnp.zeros((1, H), f32)
    c = jnp.zeros((1, H), f32)
    enc_out = jnp.zeros((L, H), f32)
    for t in range(L):
        xg = enc_xg_all[t:t + 1, :]                                      # (1, 4H)
        hg = jnp.dot(h.astype(bf16), enc_wh, preferred_element_type=f32)
        h_new, c_new = lstm_gates_to_state(xg + hg + enc_b, c)
        # pack_padded_sequence semantics: steps >= input_length do not update the
        # recurrent state and leave zero rows in encoder_outputs.
        keep = (seq_len > t).astype(f32)                                 # scalar 0/1
        h = keep * h_new + (1.0 - keep) * h
        c = keep * c_new + (1.0 - keep) * c
        enc_out = jnp.where(row_iota == t, keep * h_new, enc_out)

    # Decode-loop-invariant attention operands (transpose + padding mask hoisted).
    enc_out_t = enc_out.T                                                # (H, L)
    att_bias = jnp.where(pos_iota < seq_len, 0.0, -1e30).astype(f32)     # (1, L)

    # --------------- greedy decode loop (max_length steps) ---------------
    tok = jnp.ones((1, 1), jnp.int32)                                    # SOS token = 1
    tokens = jnp.zeros((1, T), jnp.int32)
    scores = jnp.zeros((1, T), f32)
    for t in range(T):
        onehot = jnp.where(vocab_iota == tok, 1.0, 0.0).astype(bf16)     # (1, V)
        xg = jnp.dot(onehot, embwx_dec, preferred_element_type=f32)      # (1, 4H)
        hg = jnp.dot(h.astype(bf16), dec_wh, preferred_element_type=f32) # (1, 4H)
        h, c = lstm_gates_to_state(xg + hg + dec_b, c)

        # Luong "dot" attention on the MXU; softmax over encoder positions (lanes).
        e = jnp.dot(h, enc_out_t, preferred_element_type=f32) + att_bias # (1, L)
        e = e - jnp.max(e, axis=-1, keepdims=True)
        w = jnp.exp(e)
        w = w / jnp.sum(w, axis=-1, keepdims=True)                       # exact softmax
        context = jnp.dot(w, enc_out, preferred_element_type=f32)        # (1, H)

        # tanh(concat([h, context]) @ Wcat + b) as two independent matmuls.
        cat = jnp.tanh(
            jnp.dot(h.astype(bf16), wcat_h, preferred_element_type=f32)
            + jnp.dot(context.astype(bf16), wcat_c, preferred_element_type=f32)
            + bcat)
        logits = (jnp.dot(cat.astype(bf16), wout, preferred_element_type=f32)
                  + bout)                                                # (1, V)

        # torch.max(softmax(logits), dim=1): argmax on logits (first-index tie-break);
        # max probability = 1 / sum(exp(logits - max)) with an EXACT reciprocal.
        mxl = jnp.max(logits, axis=-1, keepdims=True)                    # (1, 1)
        p = jnp.exp(logits - mxl)                                        # reused for denom
        denom = jnp.sum(p, axis=-1, keepdims=True)
        idx = jnp.min(jnp.where(logits == mxl, vocab_iota, V),
                      axis=-1, keepdims=True)                            # (1, 1) int32
        p_max = 1.0 / denom                                              # (1, 1) f32

        tokens = jnp.where(out_iota == t, idx, tokens)
        scores = jnp.where(out_iota == t, p_max, scores)
        tok = idx

    # Single lane-dense writeback of all decode-step results.
    tokens_ref[...] = tokens
    scores_ref[...] = scores


def greedy_search_decode(params, input_seq, input_length, max_length):
    """JAX wrapper mirroring GreedySearchDecoder.forward (batch = 1)."""
    T = int(max_length)
    length_arr = jnp.asarray(input_length, jnp.int32).reshape(1, 1)

    vmem = pl.BlockSpec(memory_space=pltpu.MemorySpace.VMEM)
    smem = pl.BlockSpec(memory_space=pltpu.MemorySpace.SMEM)
    arg_order = ("emb", "enc_wx", "enc_wh", "enc_b",
                 "dec_wx", "dec_wh", "dec_b",
                 "wcat_h", "wcat_c", "bcat", "wout", "bout")

    tokens, scores = pl.pallas_call(
        greedy_decode_kernel,
        out_shape=(jax.ShapeDtypeStruct((1, T), jnp.int32),
                   jax.ShapeDtypeStruct((1, T), jnp.float32)),
        in_specs=[vmem, smem] + [vmem] * len(arg_order),
        out_specs=(vmem, vmem),
    )(input_seq, length_arr, *[params[k] for k in arg_order])

    all_tokens = tokens[0, :]   # (max_length,) int32
    all_scores = scores[0, :]   # (max_length,) float32
    return all_tokens, all_scores


def init_params(key, vocab_size, hidden_size):
    V, H = vocab_size, hidden_size
    ks = jax.random.split(key, 12)
    s = 0.1
    f32, bf16 = jnp.float32, jnp.bfloat16

    def w(k, shape):   # bf16 weights (MXU operands)
        return (jax.random.normal(k, shape, f32) * s).astype(bf16)

    def b(k, shape):   # f32 biases (post-accumulation adds)
        return jax.random.normal(k, shape, f32) * s

    return {
        "emb":    w(ks[0], (V, H)),
        "enc_wx": w(ks[1], (H, 4 * H)),
        "enc_wh": w(ks[2], (H, 4 * H)),
        "enc_b":  b(ks[3], (1, 4 * H)),
        "dec_wx": w(ks[4], (H, 4 * H)),
        "dec_wh": w(ks[5], (H, 4 * H)),
        "dec_b":  b(ks[6], (1, 4 * H)),
        "wcat_h": w(ks[7], (H, H)),
        "wcat_c": w(ks[8], (H, H)),
        "bcat":   b(ks[9], (1, H)),
        "wout":   w(ks[10], (H, V)),
        "bout":   b(ks[11], (1, V)),
    }


if __name__ == "__main__":
    V, H = 128, 32          # vocab size, hidden size
    L, T = 8, 8             # input seq length, max decode length

    key = jax.random.PRNGKey(0)
    pkey, dkey = jax.random.split(key)
    params = init_params(pkey, V, H)
    input_seq = jax.random.randint(dkey, (L, 1), 3, V, dtype=jnp.int32)
    input_length = L
    max_length = T

    all_tokens, all_scores = greedy_search_decode(
        params, input_seq, input_length, max_length)
    jax.block_until_ready((all_tokens, all_scores))

    assert all_tokens.shape == (T,) and all_tokens.dtype == jnp.int32
    assert all_scores.shape == (T,) and all_scores.dtype == jnp.float32
    assert bool(jnp.all((all_tokens >= 0) & (all_tokens < V)))
    assert bool(jnp.all(jnp.isfinite(all_scores)))
    assert bool(jnp.all((all_scores > 0.0) & (all_scores <= 1.0)))
    print("KERNEL_OK")
</pallas_src>

<mosaic_0001>
module attributes {stable_mosaic.version = 11 : i64} {
  func.func @greedy_decode_kernel(%arg0: memref<8x1xi32, #tpu.memory_space<vmem>>, %arg1: memref<1x1xi32, #tpu.memory_space<smem>>, %arg2: memref<128x32xbf16, #tpu.memory_space<vmem>>, %arg3: memref<32x128xbf16, #tpu.memory_space<vmem>>, %arg4: memref<32x128xbf16, #tpu.memory_space<vmem>>, %arg5: memref<1x128xf32, #tpu.memory_space<vmem>>, %arg6: memref<32x128xbf16, #tpu.memory_space<vmem>>, %arg7: memref<32x128xbf16, #tpu.memory_space<vmem>>, %arg8: memref<1x128xf32, #tpu.memory_space<vmem>>, %arg9: memref<32x32xbf16, #tpu.memory_space<vmem>>, %arg10: memref<32x32xbf16, #tpu.memory_space<vmem>>, %arg11: memref<1x32xf32, #tpu.memory_space<vmem>>, %arg12: memref<32x128xbf16, #tpu.memory_space<vmem>>, %arg13: memref<1x128xf32, #tpu.memory_space<vmem>>, %arg14: memref<1x8xi32, #tpu.memory_space<vmem>>, %arg15: memref<1x8xf32, #tpu.memory_space<vmem>>) attributes {dimension_semantics = [], scalar_prefetch = 0 : i64, scratch_operands = 0 : i64, tpu.core_type = #tpu.core_type<tc>} {
    %c0 = arith.constant 0 : index
    %c0_0 = arith.constant 0 : index
    %0 = memref.load %arg1[%c0, %c0_0] : memref<1x1xi32, #tpu.memory_space<smem>>
    %1 = tpu.iota {dimensions = array<i32: 1>} : vector<1x128xi32>
    %2 = tpu.iota {dimensions = array<i32: 0>} : vector<8x1xi32>
    %3 = tpu.iota {dimensions = array<i32: 1>} : vector<1x8xi32>
    %4 = tpu.iota {dimensions = array<i32: 1>} : vector<1x8xi32>
    %c0_1 = arith.constant 0 : index
    %c0_2 = arith.constant 0 : index
    %5 = vector.load %arg2[%c0_1, %c0_2] : memref<128x32xbf16, #tpu.memory_space<vmem>>, vector<128x32xbf16>
    %c0_3 = arith.constant 0 : index
    %c0_4 = arith.constant 0 : index
    %6 = vector.load %arg4[%c0_3, %c0_4] : memref<32x128xbf16, #tpu.memory_space<vmem>>, vector<32x128xbf16>
    %c0_5 = arith.constant 0 : index
    %c0_6 = arith.constant 0 : index
    %7 = vector.load %arg5[%c0_5, %c0_6] : memref<1x128xf32, #tpu.memory_space<vmem>>, vector<1x128xf32>
    %c0_7 = arith.constant 0 : index
    %c0_8 = arith.constant 0 : index
    %8 = vector.load %arg7[%c0_7, %c0_8] : memref<32x128xbf16, #tpu.memory_space<vmem>>, vector<32x128xbf16>
    %c0_9 = arith.constant 0 : index
    %c0_10 = arith.constant 0 : index
    %9 = vector.load %arg8[%c0_9, %c0_10] : memref<1x128xf32, #tpu.memory_space<vmem>>, vector<1x128xf32>
    %c0_11 = arith.constant 0 : index
    %c0_12 = arith.constant 0 : index
    %10 = vector.load %arg9[%c0_11, %c0_12] : memref<32x32xbf16, #tpu.memory_space<vmem>>, vector<32x32xbf16>
    %c0_13 = arith.constant 0 : index
    %c0_14 = arith.constant 0 : index
    %11 = vector.load %arg10[%c0_13, %c0_14] : memref<32x32xbf16, #tpu.memory_space<vmem>>, vector<32x32xbf16>
    %c0_15 = arith.constant 0 : index
    %c0_16 = arith.constant 0 : index
    %12 = vector.load %arg11[%c0_15, %c0_16] : memref<1x32xf32, #tpu.memory_space<vmem>>, vector<1x32xf32>
    %c0_17 = arith.constant 0 : index
    %c0_18 = arith.constant 0 : index
    %13 = vector.load %arg12[%c0_17, %c0_18] : memref<32x128xbf16, #tpu.memory_space<vmem>>, vector<32x128xbf16>
    %c0_19 = arith.constant 0 : index
    %c0_20 = arith.constant 0 : index
    %14 = vector.load %arg13[%c0_19, %c0_20] : memref<1x128xf32, #tpu.memory_space<vmem>>, vector<1x128xf32>
    %c0_21 = arith.constant 0 : index
    %c0_22 = arith.constant 0 : index
    %15 = vector.load %arg3[%c0_21, %c0_22] : memref<32x128xbf16, #tpu.memory_space<vmem>>, vector<32x128xbf16>
    %cst = arith.constant dense<0.000000e+00> : vector<128x128xf32>
    %16 = tpu.matmul %5, %15, %cst {dimension_numbers = #tpu.dot_dimension_numbers<[1], [0], [0], [1], [0, 0, 1, 1], [], []>} : vector<128x32xbf16>, vector<32x128xbf16>, vector<128x128xf32> -> vector<128x128xf32>
    %17 = arith.truncf %16 : vector<128x128xf32> to vector<128x128xbf16>
    %c0_23 = arith.constant 0 : index
    %c0_24 = arith.constant 0 : index
    %18 = vector.load %arg6[%c0_23, %c0_24] : memref<32x128xbf16, #tpu.memory_space<vmem>>, vector<32x128xbf16>
    %cst_25 = arith.constant dense<0.000000e+00> : vector<128x128xf32>
    %19 = tpu.matmul %5, %18, %cst_25 {dimension_numbers = #tpu.dot_dimension_numbers<[1], [0], [0], [1], [0, 0, 1, 1], [], []>} : vector<128x32xbf16>, vector<32x128xbf16>, vector<128x128xf32> -> vector<128x128xf32>
    %20 = arith.truncf %19 : vector<128x128xf32> to vector<128x128xbf16>
    %c0_26 = arith.constant 0 : index
    %c0_27 = arith.constant 0 : index
    %21 = vector.load %arg0[%c0_26, %c0_27] : memref<8x1xi32, #tpu.memory_space<vmem>>, vector<8x1xi32>
    %22 = vector.broadcast %1 : vector<1x128xi32> to vector<8x128xi32>
    %23 = vector.broadcast %21 : vector<8x1xi32> to vector<8x128xi32>
    %24 = arith.cmpi eq, %22, %23 : vector<8x128xi32>
    %cst_28 = arith.constant 1.000000e+00 : f32
    %cst_29 = arith.constant 0.000000e+00 : f32
    %25 = vector.broadcast %cst_28 : f32 to vector<8x128xf32>
    %26 = vector.broadcast %cst_29 : f32 to vector<8x128xf32>
    %27 = arith.select %24, %25, %26 : vector<8x128xi1>, vector<8x128xf32>
    %28 = arith.truncf %27 : vector<8x128xf32> to vector<8x128xbf16>
    %cst_30 = arith.constant dense<0.000000e+00> : vector<8x128xf32>
    %29 = tpu.matmul %28, %17, %cst_30 {dimension_numbers = #tpu.dot_dimension_numbers<[1], [0], [0], [1], [0, 0, 1, 1], [], []>} : vector<8x128xbf16>, vector<128x128xbf16>, vector<8x128xf32> -> vector<8x128xf32>
    %cst_31 = arith.constant 0.000000e+00 : f32
    %30 = vector.broadcast %cst_31 : f32 to vector<1x32xf32>
    %cst_32 = arith.constant 0.000000e+00 : f32
    %31 = vector.broadcast %cst_32 : f32 to vector<1x32xf32>
    %cst_33 = arith.constant 0.000000e+00 : f32
    %32 = vector.broadcast %cst_33 : f32 to vector<8x32xf32>
    %33 = vector.extract_strided_slice %29 {offsets = [0, 0], sizes = [1, 128], strides = [1, 1]} : vector<8x128xf32> to vector<1x128xf32>
    %34 = arith.truncf %30 : vector<1x32xf32> to vector<1x32xbf16>
    %cst_34 = arith.constant dense<0.000000e+00> : vector<1x128xf32>
    %35 = tpu.matmul %34, %6, %cst_34 {dimension_numbers = #tpu.dot_dimension_numbers<[1], [0], [0], [1], [0, 0, 1, 1], [], []>} : vector<1x32xbf16>, vector<32x128xbf16>, vector<1x128xf32> -> vector<1x128xf32>
    %36 = arith.addf %33, %35 : vector<1x128xf32>
    %37 = arith.addf %36, %7 : vector<1x128xf32>
    %38 = arith.negf %37 : vector<1x128xf32>
    %39 = math.exp %38 : vector<1x128xf32>
    %cst_35 = arith.constant 1.000000e+00 : f32
    %40 = vector.broadcast %cst_35 : f32 to vector<1x128xf32>
    %41 = arith.addf %40, %39 : vector<1x128xf32>
    %42 = arith.divf %40, %41 : vector<1x128xf32>
    %43 = math.tanh %37 : vector<1x128xf32>
    %44 = vector.extract_strided_slice %42 {offsets = [0, 0], sizes = [1, 32], strides = [1, 1]} : vector<1x128xf32> to vector<1x32xf32>
    %45 = vector.extract_strided_slice %42 {offsets = [0, 32], sizes = [1, 32], strides = [1, 1]} : vector<1x128xf32> to vector<1x32xf32>
    %46 = vector.extract_strided_slice %42 {offsets = [0, 96], sizes = [1, 32], strides = [1, 1]} : vector<1x128xf32> to vector<1x32xf32>
    %47 = vector.extract_strided_slice %43 {offsets = [0, 64], sizes = [1, 32], strides = [1, 1]} : vector<1x128xf32> to vector<1x32xf32>
    %48 = arith.mulf %45, %31 : vector<1x32xf32>
    %49 = arith.mulf %44, %47 : vector<1x32xf32>
    %50 = arith.addf %48, %49 : vector<1x32xf32>
    %51 = math.tanh %50 : vector<1x32xf32>
    %52 = arith.mulf %46, %51 : vector<1x32xf32>
    %c0_i32 = arith.constant 0 : i32
    %53 = arith.cmpi sgt, %0, %c0_i32 : i32
    %54 = arith.extui %53 : i1 to i32
    %55 = arith.sitofp %54 : i32 to f32
    %56 = vector.broadcast %55 : f32 to vector<1x32xf32>
    %57 = arith.mulf %56, %52 : vector<1x32xf32>
    %cst_36 = arith.constant 1.000000e+00 : f32
    %58 = arith.subf %cst_36, %55 : f32
    %59 = vector.broadcast %58 : f32 to vector<1x32xf32>
    %60 = arith.mulf %59, %30 : vector<1x32xf32>
    %61 = arith.addf %57, %60 : vector<1x32xf32>
    %62 = vector.broadcast %55 : f32 to vector<1x32xf32>
    %63 = arith.mulf %62, %50 : vector<1x32xf32>
    %cst_37 = arith.constant 1.000000e+00 : f32
    %64 = arith.subf %cst_37, %55 : f32
    %65 = vector.broadcast %64 : f32 to vector<1x32xf32>
    %66 = arith.mulf %65, %31 : vector<1x32xf32>
    %67 = arith.addf %63, %66 : vector<1x32xf32>
    %c0_i32_38 = arith.constant 0 : i32
    %68 = vector.broadcast %c0_i32_38 : i32 to vector<8x1xi32>
    %69 = arith.cmpi eq, %2, %68 : vector<8x1xi32>
    %70 = vector.broadcast %55 : f32 to vector<1x32xf32>
    %71 = arith.mulf %70, %52 : vector<1x32xf32>
    %72 = vector.shape_cast %69 : vector<8x1xi1> to vector<8x1xi1>
    %73 = vector.broadcast %72 : vector<8x1xi1> to vector<8x32xi1>
    %74 = vector.shape_cast %71 : vector<1x32xf32> to vector<1x32xf32>
    %75 = vector.broadcast %74 : vector<1x32xf32> to vector<8x32xf32>
    %76 = arith.select %73, %75, %32 : vector<8x32xi1>, vector<8x32xf32>
    %77 = vector.extract_strided_slice %29 {offsets = [1, 0], sizes = [1, 128], strides = [1, 1]} : vector<8x128xf32> to vector<1x128xf32>
    %78 = arith.truncf %61 : vector<1x32xf32> to vector<1x32xbf16>
    %cst_39 = arith.constant dense<0.000000e+00> : vector<1x128xf32>
    %79 = tpu.matmul %78, %6, %cst_39 {dimension_numbers = #tpu.dot_dimension_numbers<[1], [0], [0], [1], [0, 0, 1, 1], [], []>} : vector<1x32xbf16>, vector<32x128xbf16>, vector<1x128xf32> -> vector<1x128xf32>
    %80 = arith.addf %77, %79 : vector<1x128xf32>
    %81 = arith.addf %80, %7 : vector<1x128xf32>
    %82 = arith.negf %81 : vector<1x128xf32>
    %83 = math.exp %82 : vector<1x128xf32>
    %cst_40 = arith.constant 1.000000e+00 : f32
    %84 = vector.broadcast %cst_40 : f32 to vector<1x128xf32>
    %85 = arith.addf %84, %83 : vector<1x128xf32>
    %86 = arith.divf %84, %85 : vector<1x128xf32>
    %87 = math.tanh %81 : vector<1x128xf32>
    %88 = vector.extract_strided_slice %86 {offsets = [0, 0], sizes = [1, 32], strides = [1, 1]} : vector<1x128xf32> to vector<1x32xf32>
    %89 = vector.extract_strided_slice %86 {offsets = [0, 32], sizes = [1, 32], strides = [1, 1]} : vector<1x128xf32> to vector<1x32xf32>
    %90 = vector.extract_strided_slice %86 {offsets = [0, 96], sizes = [1, 32], strides = [1, 1]} : vector<1x128xf32> to vector<1x32xf32>
    %91 = vector.extract_strided_slice %87 {offsets = [0, 64], sizes = [1, 32], strides = [1, 1]} : vector<1x128xf32> to vector<1x32xf32>
    %92 = arith.mulf %89, %67 : vector<1x32xf32>
    %93 = arith.mulf %88, %91 : vector<1x32xf32>
    %94 = arith.addf %92, %93 : vector<1x32xf32>
    %95 = math.tanh %94 : vector<1x32xf32>
    %96 = arith.mulf %90, %95 : vector<1x32xf32>
    %c1_i32 = arith.constant 1 : i32
    %97 = arith.cmpi sgt, %0, %c1_i32 : i32
    %98 = arith.extui %97 : i1 to i32
    %99 = arith.sitofp %98 : i32 to f32
    %100 = vector.broadcast %99 : f32 to vector<1x32xf32>
    %101 = arith.mulf %100, %96 : vector<1x32xf32>
    %cst_41 = arith.constant 1.000000e+00 : f32
    %102 = arith.subf %cst_41, %99 : f32
    %103 = vector.broadcast %102 : f32 to vector<1x32xf32>
    %104 = arith.mulf %103, %61 : vector<1x32xf32>
    %105 = arith.addf %101, %104 : vector<1x32xf32>
    %106 = vector.broadcast %99 : f32 to vector<1x32xf32>
    %107 = arith.mulf %106, %94 : vector<1x32xf32>
    %cst_42 = arith.constant 1.000000e+00 : f32
    %108 = arith.subf %cst_42, %99 : f32
    %109 = vector.broadcast %108 : f32 to vector<1x32xf32>
    %110 = arith.mulf %109, %67 : vector<1x32xf32>
    %111 = arith.addf %107, %110 : vector<1x32xf32>
    %c1_i32_43 = arith.constant 1 : i32
    %112 = vector.broadcast %c1_i32_43 : i32 to vector<8x1xi32>
    %113 = arith.cmpi eq, %2, %112 : vector<8x1xi32>
    %114 = vector.broadcast %99 : f32 to vector<1x32xf32>
    %115 = arith.mulf %114, %96 : vector<1x32xf32>
    %116 = vector.shape_cast %113 : vector<8x1xi1> to vector<8x1xi1>
    %117 = vector.broadcast %116 : vector<8x1xi1> to vector<8x32xi1>
    %118 = vector.shape_cast %115 : vector<1x32xf32> to vector<1x32xf32>
    %119 = vector.broadcast %118 : vector<1x32xf32> to vector<8x32xf32>
    %120 = arith.select %117, %119, %76 : vector<8x32xi1>, vector<8x32xf32>
    %121 = vector.extract_strided_slice %29 {offsets = [2, 0], sizes = [1, 128], strides = [1, 1]} : vector<8x128xf32> to vector<1x128xf32>
    %122 = arith.truncf %105 : vector<1x32xf32> to vector<1x32xbf16>
    %cst_44 = arith.constant dense<0.000000e+00> : vector<1x128xf32>
    %123 = tpu.matmul %122, %6, %cst_44 {dimension_numbers = #tpu.dot_dimension_numbers<[1], [0], [0], [1], [0, 0, 1, 1], [], []>} : vector<1x32xbf16>, vector<32x128xbf16>, vector<1x128xf32> -> vector<1x128xf32>
    %124 = arith.addf %121, %123 : vector<1x128xf32>
    %125 = arith.addf %124, %7 : vector<1x128xf32>
    %126 = arith.negf %125 : vector<1x128xf32>
    %127 = math.exp %126 : vector<1x128xf32>
    %cst_45 = arith.constant 1.000000e+00 : f32
    %128 = vector.broadcast %cst_45 : f32 to vector<1x128xf32>
    %129 = arith.addf %128, %127 : vector<1x128xf32>
    %130 = arith.divf %128, %129 : vector<1x128xf32>
    %131 = math.tanh %125 : vector<1x128xf32>
    %132 = vector.extract_strided_slice %130 {offsets = [0, 0], sizes = [1, 32], strides = [1, 1]} : vector<1x128xf32> to vector<1x32xf32>
    %133 = vector.extract_strided_slice %130 {offsets = [0, 32], sizes = [1, 32], strides = [1, 1]} : vector<1x128xf32> to vector<1x32xf32>
    %134 = vector.extract_strided_slice %130 {offsets = [0, 96], sizes = [1, 32], strides = [1, 1]} : vector<1x128xf32> to vector<1x32xf32>
    %135 = vector.extract_strided_slice %131 {offsets = [0, 64], sizes = [1, 32], strides = [1, 1]} : vector<1x128xf32> to vector<1x32xf32>
    %136 = arith.mulf %133, %111 : vector<1x32xf32>
    %137 = arith.mulf %132, %135 : vector<1x32xf32>
    %138 = arith.addf %136, %137 : vector<1x32xf32>
    %139 = math.tanh %138 : vector<1x32xf32>
    %140 = arith.mulf %134, %139 : vector<1x32xf32>
    %c2_i32 = arith.constant 2 : i32
    %141 = arith.cmpi sgt, %0, %c2_i32 : i32
    %142 = arith.extui %141 : i1 to i32
    %143 = arith.sitofp %142 : i32 to f32
    %144 = vector.broadcast %143 : f32 to vector<1x32xf32>
    %145 = arith.mulf %144, %140 : vector<1x32xf32>
    %cst_46 = arith.constant 1.000000e+00 : f32
    %146 = arith.subf %cst_46, %143 : f32
    %147 = vector.broadcast %146 : f32 to vector<1x32xf32>
    %148 = arith.mulf %147, %105 : vector<1x32xf32>
    %149 = arith.addf %145, %148 : vector<1x32xf32>
    %150 = vector.broadcast %143 : f32 to vector<1x32xf32>
    %151 = arith.mulf %150, %138 : vector<1x32xf32>
    %cst_47 = arith.constant 1.000000e+00 : f32
    %152 = arith.subf %cst_47, %143 : f32
    %153 = vector.broadcast %152 : f32 to vector<1x32xf32>
    %154 = arith.mulf %153, %111 : vector<1x32xf32>
    %155 = arith.addf %151, %154 : vector<1x32xf32>
    %c2_i32_48 = arith.constant 2 : i32
    %156 = vector.broadcast %c2_i32_48 : i32 to vector<8x1xi32>
    %157 = arith.cmpi eq, %2, %156 : vector<8x1xi32>
    %158 = vector.broadcast %143 : f32 to vector<1x32xf32>
    %159 = arith.mulf %158, %140 : vector<1x32xf32>
    %160 = vector.shape_cast %157 : vector<8x1xi1> to vector<8x1xi1>
    %161 = vector.broadcast %160 : vector<8x1xi1> to vector<8x32xi1>
    %162 = vector.shape_cast %159 : vector<1x32xf32> to vector<1x32xf32>
    %163 = vector.broadcast %162 : vector<1x32xf32> to vector<8x32xf32>
    %164 = arith.select %161, %163, %120 : vector<8x32xi1>, vector<8x32xf32>
    %165 = vector.extract_strided_slice %29 {offsets = [3, 0], sizes = [1, 128], strides = [1, 1]} : vector<8x128xf32> to vector<1x128xf32>
    %166 = arith.truncf %149 : vector<1x32xf32> to vector<1x32xbf16>
    %cst_49 = arith.constant dense<0.000000e+00> : vector<1x128xf32>
    %167 = tpu.matmul %166, %6, %cst_49 {dimension_numbers = #tpu.dot_dimension_numbers<[1], [0], [0], [1], [0, 0, 1, 1], [], []>} : vector<1x32xbf16>, vector<32x128xbf16>, vector<1x128xf32> -> vector<1x128xf32>
    %168 = arith.addf %165, %167 : vector<1x128xf32>
    %169 = arith.addf %168, %7 : vector<1x128xf32>
    %170 = arith.negf %169 : vector<1x128xf32>
    %171 = math.exp %170 : vector<1x128xf32>
    %cst_50 = arith.constant 1.000000e+00 : f32
    %172 = vector.broadcast %cst_50 : f32 to vector<1x128xf32>
    %173 = arith.addf %172, %171 : vector<1x128xf32>
    %174 = arith.divf %172, %173 : vector<1x128xf32>
    %175 = math.tanh %169 : vector<1x128xf32>
    %176 = vector.extract_strided_slice %174 {offsets = [0, 0], sizes = [1, 32], strides = [1, 1]} : vector<1x128xf32> to vector<1x32xf32>
    %177 = vector.extract_strided_slice %174 {offsets = [0, 32], sizes = [1, 32], strides = [1, 1]} : vector<1x128xf32> to vector<1x32xf32>
    %178 = vector.extract_strided_slice %174 {offsets = [0, 96], sizes = [1, 32], strides = [1, 1]} : vector<1x128xf32> to vector<1x32xf32>
    %179 = vector.extract_strided_slice %175 {offsets = [0, 64], sizes = [1, 32], strides = [1, 1]} : vector<1x128xf32> to vector<1x32xf32>
    %180 = arith.mulf %177, %155 : vector<1x32xf32>
    %181 = arith.mulf %176, %179 : vector<1x32xf32>
    %182 = arith.addf %180, %181 : vector<1x32xf32>
    %183 = math.tanh %182 : vector<1x32xf32>
    %184 = arith.mulf %178, %183 : vector<1x32xf32>
    %c3_i32 = arith.constant 3 : i32
    %185 = arith.cmpi sgt, %0, %c3_i32 : i32
    %186 = arith.extui %185 : i1 to i32
    %187 = arith.sitofp %186 : i32 to f32
    %188 = vector.broadcast %187 : f32 to vector<1x32xf32>
    %189 = arith.mulf %188, %184 : vector<1x32xf32>
    %cst_51 = arith.constant 1.000000e+00 : f32
    %190 = arith.subf %cst_51, %187 : f32
    %191 = vector.broadcast %190 : f32 to vector<1x32xf32>
    %192 = arith.mulf %191, %149 : vector<1x32xf32>
    %193 = arith.addf %189, %192 : vector<1x32xf32>
    %194 = vector.broadcast %187 : f32 to vector<1x32xf32>
    %195 = arith.mulf %194, %182 : vector<1x32xf32>
    %cst_52 = arith.constant 1.000000e+00 : f32
    %196 = arith.subf %cst_52, %187 : f32
    %197 = vector.broadcast %196 : f32 to vector<1x32xf32>
    %198 = arith.mulf %197, %155 : vector<1x32xf32>
    %199 = arith.addf %195, %198 : vector<1x32xf32>
    %c3_i32_53 = arith.constant 3 : i32
    %200 = vector.broadcast %c3_i32_53 : i32 to vector<8x1xi32>
    %201 = arith.cmpi eq, %2, %200 : vector<8x1xi32>
    %202 = vector.broadcast %187 : f32 to vector<1x32xf32>
    %203 = arith.mulf %202, %184 : vector<1x32xf32>
    %204 = vector.shape_cast %201 : vector<8x1xi1> to vector<8x1xi1>
    %205 = vector.broadcast %204 : vector<8x1xi1> to vector<8x32xi1>
    %206 = vector.shape_cast %203 : vector<1x32xf32> to vector<1x32xf32>
    %207 = vector.broadcast %206 : vector<1x32xf32> to vector<8x32xf32>
    %208 = arith.select %205, %207, %164 : vector<8x32xi1>, vector<8x32xf32>
    %209 = vector.extract_strided_slice %29 {offsets = [4, 0], sizes = [1, 128], strides = [1, 1]} : vector<8x128xf32> to vector<1x128xf32>
    %210 = arith.truncf %193 : vector<1x32xf32> to vector<1x32xbf16>
    %cst_54 = arith.constant dense<0.000000e+00> : vector<1x128xf32>
    %211 = tpu.matmul %210, %6, %cst_54 {dimension_numbers = #tpu.dot_dimension_numbers<[1], [0], [0], [1], [0, 0, 1, 1], [], []>} : vector<1x32xbf16>, vector<32x128xbf16>, vector<1x128xf32> -> vector<1x128xf32>
    %212 = arith.addf %209, %211 : vector<1x128xf32>
    %213 = arith.addf %212, %7 : vector<1x128xf32>
    %214 = arith.negf %213 : vector<1x128xf32>
    %215 = math.exp %214 : vector<1x128xf32>
    %cst_55 = arith.constant 1.000000e+00 : f32
    %216 = vector.broadcast %cst_55 : f32 to vector<1x128xf32>
    %217 = arith.addf %216, %215 : vector<1x128xf32>
    %218 = arith.divf %216, %217 : vector<1x128xf32>
    %219 = math.tanh %213 : vector<1x128xf32>
    %220 = vector.extract_strided_slice %218 {offsets = [0, 0], sizes = [1, 32], strides = [1, 1]} : vector<1x128xf32> to vector<1x32xf32>
    %221 = vector.extract_strided_slice %218 {offsets = [0, 32], sizes = [1, 32], strides = [1, 1]} : vector<1x128xf32> to vector<1x32xf32>
    %222 = vector.extract_strided_slice %218 {offsets = [0, 96], sizes = [1, 32], strides = [1, 1]} : vector<1x128xf32> to vector<1x32xf32>
    %223 = vector.extract_strided_slice %219 {offsets = [0, 64], sizes = [1, 32], strides = [1, 1]} : vector<1x128xf32> to vector<1x32xf32>
    %224 = arith.mulf %221, %199 : vector<1x32xf32>
    %225 = arith.mulf %220, %223 : vector<1x32xf32>
    %226 = arith.addf %224, %225 : vector<1x32xf32>
    %227 = math.tanh %226 : vector<1x32xf32>
    %228 = arith.mulf %222, %227 : vector<1x32xf32>
    %c4_i32 = arith.constant 4 : i32
    %229 = arith.cmpi sgt, %0, %c4_i32 : i32
    %230 = arith.extui %229 : i1 to i32
    %231 = arith.sitofp %230 : i32 to f32
    %232 = vector.broadcast %231 : f32 to vector<1x32xf32>
    %233 = arith.mulf %232, %228 : vector<1x32xf32>
    %cst_56 = arith.constant 1.000000e+00 : f32
    %234 = arith.subf %cst_56, %231 : f32
    %235 = vector.broadcast %234 : f32 to vector<1x32xf32>
    %236 = arith.mulf %235, %193 : vector<1x32xf32>
    %237 = arith.addf %233, %236 : vector<1x32xf32>
    %238 = vector.broadcast %231 : f32 to vector<1x32xf32>
    %239 = arith.mulf %238, %226 : vector<1x32xf32>
    %cst_57 = arith.constant 1.000000e+00 : f32
    %240 = arith.subf %cst_57, %231 : f32
    %241 = vector.broadcast %240 : f32 to vector<1x32xf32>
    %242 = arith.mulf %241, %199 : vector<1x32xf32>
    %243 = arith.addf %239, %242 : vector<1x32xf32>
    %c4_i32_58 = arith.constant 4 : i32
    %244 = vector.broadcast %c4_i32_58 : i32 to vector<8x1xi32>
    %245 = arith.cmpi eq, %2, %244 : vector<8x1xi32>
    %246 = vector.broadcast %231 : f32 to vector<1x32xf32>
    %247 = arith.mulf %246, %228 : vector<1x32xf32>
    %248 = vector.shape_cast %245 : vector<8x1xi1> to vector<8x1xi1>
    %249 = vector.broadcast %248 : vector<8x1xi1> to vector<8x32xi1>
    %250 = vector.shape_cast %247 : vector<1x32xf32> to vector<1x32xf32>
    %251 = vector.broadcast %250 : vector<1x32xf32> to vector<8x32xf32>
    %252 = arith.select %249, %251, %208 : vector<8x32xi1>, vector<8x32xf32>
    %253 = vector.extract_strided_slice %29 {offsets = [5, 0], sizes = [1, 128], strides = [1, 1]} : vector<8x128xf32> to vector<1x128xf32>
    %254 = arith.truncf %237 : vector<1x32xf32> to vector<1x32xbf16>
    %cst_59 = arith.constant dense<0.000000e+00> : vector<1x128xf32>
    %255 = tpu.matmul %254, %6, %cst_59 {dimension_numbers = #tpu.dot_dimension_numbers<[1], [0], [0], [1], [0, 0, 1, 1], [], []>} : vector<1x32xbf16>, vector<32x128xbf16>, vector<1x128xf32> -> vector<1x128xf32>
    %256 = arith.addf %253, %255 : vector<1x128xf32>
    %257 = arith.addf %256, %7 : vector<1x128xf32>
    %258 = arith.negf %257 : vector<1x128xf32>
    %259 = math.exp %258 : vector<1x128xf32>
    %cst_60 = arith.constant 1.000000e+00 : f32
    %260 = vector.broadcast %cst_60 : f32 to vector<1x128xf32>
    %261 = arith.addf %260, %259 : vector<1x128xf32>
    %262 = arith.divf %260, %261 : vector<1x128xf32>
    %263 = math.tanh %257 : vector<1x128xf32>
    %264 = vector.extract_strided_slice %262 {offsets = [0, 0], sizes = [1, 32], strides = [1, 1]} : vector<1x128xf32> to vector<1x32xf32>
    %265 = vector.extract_strided_slice %262 {offsets = [0, 32], sizes = [1, 32], strides = [1, 1]} : vector<1x128xf32> to vector<1x32xf32>
    %266 = vector.extract_strided_slice %262 {offsets = [0, 96], sizes = [1, 32], strides = [1, 1]} : vector<1x128xf32> to vector<1x32xf32>
    %267 = vector.extract_strided_slice %263 {offsets = [0, 64], sizes = [1, 32], strides = [1, 1]} : vector<1x128xf32> to vector<1x32xf32>
    %268 = arith.mulf %265, %243 : vector<1x32xf32>
    %269 = arith.mulf %264, %267 : vector<1x32xf32>
    %270 = arith.addf %268, %269 : vector<1x32xf32>
    %271 = math.tanh %270 : vector<1x32xf32>
    %272 = arith.mulf %266, %271 : vector<1x32xf32>
    %c5_i32 = arith.constant 5 : i32
    %273 = arith.cmpi sgt, %0, %c5_i32 : i32
    %274 = arith.extui %273 : i1 to i32
    %275 = arith.sitofp %274 : i32 to f32
    %276 = vector.broadcast %275 : f32 to vector<1x32xf32>
    %277 = arith.mulf %276, %272 : vector<1x32xf32>
    %cst_61 = arith.constant 1.000000e+00 : f32
    %278 = arith.subf %cst_61, %275 : f32
    %279 = vector.broadcast %278 : f32 to vector<1x32xf32>
    %280 = arith.mulf %279, %237 : vector<1x32xf32>
    %281 = arith.addf %277, %280 : vector<1x32xf32>
    %282 = vector.broadcast %275 : f32 to vector<1x32xf32>
    %283 = arith.mulf %282, %270 : vector<1x32xf32>
    %cst_62 = arith.constant 1.000000e+00 : f32
    %284 = arith.subf %cst_62, %275 : f32
    %285 = vector.broadcast %284 : f32 to vector<1x32xf32>
    %286 = arith.mulf %285, %243 : vector<1x32xf32>
    %287 = arith.addf %283, %286 : vector<1x32xf32>
    %c5_i32_63 = arith.constant 5 : i32
    %288 = vector.broadcast %c5_i32_63 : i32 to vector<8x1xi32>
    %289 = arith.cmpi eq, %2, %288 : vector<8x1xi32>
    %290 = vector.broadcast %275 : f32 to vector<1x32xf32>
    %291 = arith.mulf %290, %272 : vector<1x32xf32>
    %292 = vector.shape_cast %289 : vector<8x1xi1> to vector<8x1xi1>
    %293 = vector.broadcast %292 : vector<8x1xi1> to vector<8x32xi1>
    %294 = vector.shape_cast %291 : vector<1x32xf32> to vector<1x32xf32>
    %295 = vector.broadcast %294 : vector<1x32xf32> to vector<8x32xf32>
    %296 = arith.select %293, %295, %252 : vector<8x32xi1>, vector<8x32xf32>
    %297 = vector.extract_strided_slice %29 {offsets = [6, 0], sizes = [1, 128], strides = [1, 1]} : vector<8x128xf32> to vector<1x128xf32>
    %298 = arith.truncf %281 : vector<1x32xf32> to vector<1x32xbf16>
    %cst_64 = arith.constant dense<0.000000e+00> : vector<1x128xf32>
    %299 = tpu.matmul %298, %6, %cst_64 {dimension_numbers = #tpu.dot_dimension_numbers<[1], [0], [0], [1], [0, 0, 1, 1], [], []>} : vector<1x32xbf16>, vector<32x128xbf16>, vector<1x128xf32> -> vector<1x128xf32>
    %300 = arith.addf %297, %299 : vector<1x128xf32>
    %301 = arith.addf %300, %7 : vector<1x128xf32>
    %302 = arith.negf %301 : vector<1x128xf32>
    %303 = math.exp %302 : vector<1x128xf32>
    %cst_65 = arith.constant 1.000000e+00 : f32
    %304 = vector.broadcast %cst_65 : f32 to vector<1x128xf32>
    %305 = arith.addf %304, %303 : vector<1x128xf32>
    %306 = arith.divf %304, %305 : vector<1x128xf32>
    %307 = math.tanh %301 : vector<1x128xf32>
    %308 = vector.extract_strided_slice %306 {offsets = [0, 0], sizes = [1, 32], strides = [1, 1]} : vector<1x128xf32> to vector<1x32xf32>
    %309 = vector.extract_strided_slice %306 {offsets = [0, 32], sizes = [1, 32], strides = [1, 1]} : vector<1x128xf32> to vector<1x32xf32>
    %310 = vector.extract_strided_slice %306 {offsets = [0, 96], sizes = [1, 32], strides = [1, 1]} : vector<1x128xf32> to vector<1x32xf32>
    %311 = vector.extract_strided_slice %307 {offsets = [0, 64], sizes = [1, 32], strides = [1, 1]} : vector<1x128xf32> to vector<1x32xf32>
    %312 = arith.mulf %309, %287 : vector<1x32xf32>
    %313 = arith.mulf %308, %311 : vector<1x32xf32>
    %314 = arith.addf %312, %313 : vector<1x32xf32>
    %315 = math.tanh %314 : vector<1x32xf32>
    %316 = arith.mulf %310, %315 : vector<1x32xf32>
    %c6_i32 = arith.constant 6 : i32
    %317 = arith.cmpi sgt, %0, %c6_i32 : i32
    %318 = arith.extui %317 : i1 to i32
    %319 = arith.sitofp %318 : i32 to f32
    %320 = vector.broadcast %319 : f32 to vector<1x32xf32>
    %321 = arith.mulf %320, %316 : vector<1x32xf32>
    %cst_66 = arith.constant 1.000000e+00 : f32
    %322 = arith.subf %cst_66, %319 : f32
    %323 = vector.broadcast %322 : f32 to vector<1x32xf32>
    %324 = arith.mulf %323, %281 : vector<1x32xf32>
    %325 = arith.addf %321, %324 : vector<1x32xf32>
    %326 = vector.broadcast %319 : f32 to vector<1x32xf32>
    %327 = arith.mulf %326, %314 : vector<1x32xf32>
    %cst_67 = arith.constant 1.000000e+00 : f32
    %328 = arith.subf %cst_67, %319 : f32
    %329 = vector.broadcast %328 : f32 to vector<1x32xf32>
    %330 = arith.mulf %329, %287 : vector<1x32xf32>
    %331 = arith.addf %327, %330 : vector<1x32xf32>
    %c6_i32_68 = arith.constant 6 : i32
    %332 = vector.broadcast %c6_i32_68 : i32 to vector<8x1xi32>
    %333 = arith.cmpi eq, %2, %332 : vector<8x1xi32>
    %334 = vector.broadcast %319 : f32 to vector<1x32xf32>
    %335 = arith.mulf %334, %316 : vector<1x32xf32>
    %336 = vector.shape_cast %333 : vector<8x1xi1> to vector<8x1xi1>
    %337 = vector.broadcast %336 : vector<8x1xi1> to vector<8x32xi1>
    %338 = vector.shape_cast %335 : vector<1x32xf32> to vector<1x32xf32>
    %339 = vector.broadcast %338 : vector<1x32xf32> to vector<8x32xf32>
    %340 = arith.select %337, %339, %296 : vector<8x32xi1>, vector<8x32xf32>
    %341 = vector.extract_strided_slice %29 {offsets = [7, 0], sizes = [1, 128], strides = [1, 1]} : vector<8x128xf32> to vector<1x128xf32>
    %342 = arith.truncf %325 : vector<1x32xf32> to vector<1x32xbf16>
    %cst_69 = arith.constant dense<0.000000e+00> : vector<1x128xf32>
    %343 = tpu.matmul %342, %6, %cst_69 {dimension_numbers = #tpu.dot_dimension_numbers<[1], [0], [0], [1], [0, 0, 1, 1], [], []>} : vector<1x32xbf16>, vector<32x128xbf16>, vector<1x128xf32> -> vector<1x128xf32>
    %344 = arith.addf %341, %343 : vector<1x128xf32>
    %345 = arith.addf %344, %7 : vector<1x128xf32>
    %346 = arith.negf %345 : vector<1x128xf32>
    %347 = math.exp %346 : vector<1x128xf32>
    %cst_70 = arith.constant 1.000000e+00 : f32
    %348 = vector.broadcast %cst_70 : f32 to vector<1x128xf32>
    %349 = arith.addf %348, %347 : vector<1x128xf32>
    %350 = arith.divf %348, %349 : vector<1x128xf32>
    %351 = math.tanh %345 : vector<1x128xf32>
    %352 = vector.extract_strided_slice %350 {offsets = [0, 0], sizes = [1, 32], strides = [1, 1]} : vector<1x128xf32> to vector<1x32xf32>
    %353 = vector.extract_strided_slice %350 {offsets = [0, 32], sizes = [1, 32], strides = [1, 1]} : vector<1x128xf32> to vector<1x32xf32>
    %354 = vector.extract_strided_slice %350 {offsets = [0, 96], sizes = [1, 32], strides = [1, 1]} : vector<1x128xf32> to vector<1x32xf32>
    %355 = vector.extract_strided_slice %351 {offsets = [0, 64], sizes = [1, 32], strides = [1, 1]} : vector<1x128xf32> to vector<1x32xf32>
    %356 = arith.mulf %353, %331 : vector<1x32xf32>
    %357 = arith.mulf %352, %355 : vector<1x32xf32>
    %358 = arith.addf %356, %357 : vector<1x32xf32>
    %359 = math.tanh %358 : vector<1x32xf32>
    %360 = arith.mulf %354, %359 : vector<1x32xf32>
    %c7_i32 = arith.constant 7 : i32
    %361 = arith.cmpi sgt, %0, %c7_i32 : i32
    %362 = arith.extui %361 : i1 to i32
    %363 = arith.sitofp %362 : i32 to f32
    %364 = vector.broadcast %363 : f32 to vector<1x32xf32>
    %365 = arith.mulf %364, %360 : vector<1x32xf32>
    %cst_71 = arith.constant 1.000000e+00 : f32
    %366 = arith.subf %cst_71, %363 : f32
    %367 = vector.broadcast %366 : f32 to vector<1x32xf32>
    %368 = arith.mulf %367, %325 : vector<1x32xf32>
    %369 = arith.addf %365, %368 : vector<1x32xf32>
    %370 = vector.broadcast %363 : f32 to vector<1x32xf32>
    %371 = arith.mulf %370, %358 : vector<1x32xf32>
    %cst_72 = arith.constant 1.000000e+00 : f32
    %372 = arith.subf %cst_72, %363 : f32
    %373 = vector.broadcast %372 : f32 to vector<1x32xf32>
    %374 = arith.mulf %373, %331 : vector<1x32xf32>
    %375 = arith.addf %371, %374 : vector<1x32xf32>
    %c7_i32_73 = arith.constant 7 : i32
    %376 = vector.broadcast %c7_i32_73 : i32 to vector<8x1xi32>
    %377 = arith.cmpi eq, %2, %376 : vector<8x1xi32>
    %378 = vector.broadcast %363 : f32 to vector<1x32xf32>
    %379 = arith.mulf %378, %360 : vector<1x32xf32>
    %380 = vector.shape_cast %377 : vector<8x1xi1> to vector<8x1xi1>
    %381 = vector.broadcast %380 : vector<8x1xi1> to vector<8x32xi1>
    %382 = vector.shape_cast %379 : vector<1x32xf32> to vector<1x32xf32>
    %383 = vector.broadcast %382 : vector<1x32xf32> to vector<8x32xf32>
    %384 = arith.select %381, %383, %340 : vector<8x32xi1>, vector<8x32xf32>
    %385 = tpu.transpose %384, [1, 0] : vector<8x32xf32> -> vector<32x8xf32>
    %386 = vector.broadcast %0 : i32 to vector<1x8xi32>
    %387 = arith.cmpi slt, %3, %386 : vector<1x8xi32>
    %cst_74 = arith.constant 0.000000e+00 : f32
    %cst_75 = arith.constant -1.000000e+30 : f32
    %388 = vector.broadcast %cst_74 : f32 to vector<1x8xf32>
    %389 = vector.broadcast %cst_75 : f32 to vector<1x8xf32>
    %390 = arith.select %387, %388, %389 : vector<1x8xi1>, vector<1x8xf32>
    %c1_i32_76 = arith.constant 1 : i32
    %391 = vector.broadcast %c1_i32_76 : i32 to vector<1x1xi32>
    %c0_i32_77 = arith.constant 0 : i32
    %392 = vector.broadcast %c0_i32_77 : i32 to vector<1x8xi32>
    %cst_78 = arith.constant 0.000000e+00 : f32
    %393 = vector.broadcast %cst_78 : f32 to vector<1x8xf32>
    %394 = vector.broadcast %391 : vector<1x1xi32> to vector<1x128xi32>
    %395 = arith.cmpi eq, %1, %394 : vector<1x128xi32>
    %cst_79 = arith.constant 1.000000e+00 : f32
    %cst_80 = arith.constant 0.000000e+00 : f32
    %396 = vector.broadcast %cst_79 : f32 to vector<1x128xf32>
    %397 = vector.broadcast %cst_80 : f32 to vector<1x128xf32>
    %398 = arith.select %395, %396, %397 : vector<1x128xi1>, vector<1x128xf32>
    %399 = arith.truncf %398 : vector<1x128xf32> to vector<1x128xbf16>
    %cst_81 = arith.constant dense<0.000000e+00> : vector<1x128xf32>
    %400 = tpu.matmul %399, %20, %cst_81 {dimension_numbers = #tpu.dot_dimension_numbers<[1], [0], [0], [1], [0, 0, 1, 1], [], []>} : vector<1x128xbf16>, vector<128x128xbf16>, vector<1x128xf32> -> vector<1x128xf32>
    %401 = arith.truncf %369 : vector<1x32xf32> to vector<1x32xbf16>
    %cst_82 = arith.constant dense<0.000000e+00> : vector<1x128xf32>
    %402 = tpu.matmul %401, %8, %cst_82 {dimension_numbers = #tpu.dot_dimension_numbers<[1], [0], [0], [1], [0, 0, 1, 1], [], []>} : vector<1x32xbf16>, vector<32x128xbf16>, vector<1x128xf32> -> vector<1x128xf32>
    %403 = arith.addf %400, %402 : vector<1x128xf32>
    %404 = arith.addf %403, %9 : vector<1x128xf32>
    %405 = arith.negf %404 : vector<1x128xf32>
    %406 = math.exp %405 : vector<1x128xf32>
    %cst_83 = arith.constant 1.000000e+00 : f32
    %407 = vector.broadcast %cst_83 : f32 to vector<1x128xf32>
    %408 = arith.addf %407, %406 : vector<1x128xf32>
    %409 = arith.divf %407, %408 : vector<1x128xf32>
    %410 = math.tanh %404 : vector<1x128xf32>
    %411 = vector.extract_strided_slice %409 {offsets = [0, 0], sizes = [1, 32], strides = [1, 1]} : vector<1x128xf32> to vector<1x32xf32>
    %412 = vector.extract_strided_slice %409 {offsets = [0, 32], sizes = [1, 32], strides = [1, 1]} : vector<1x128xf32> to vector<1x32xf32>
    %413 = vector.extract_strided_slice %409 {offsets = [0, 96], sizes = [1, 32], strides = [1, 1]} : vector<1x128xf32> to vector<1x32xf32>
    %414 = vector.extract_strided_slice %410 {offsets = [0, 64], sizes = [1, 32], strides = [1, 1]} : vector<1x128xf32> to vector<1x32xf32>
    %415 = arith.mulf %412, %375 : vector<1x32xf32>
    %416 = arith.mulf %411, %414 : vector<1x32xf32>
    %417 = arith.addf %415, %416 : vector<1x32xf32>
    %418 = math.tanh %417 : vector<1x32xf32>
    %419 = arith.mulf %413, %418 : vector<1x32xf32>
    %cst_84 = arith.constant dense<0.000000e+00> : vector<1x8xf32>
    %420 = tpu.matmul %419, %385, %cst_84 {dimension_numbers = #tpu.dot_dimension_numbers<[1], [0], [0], [1], [0, 0, 1, 1], [], []>} : vector<1x32xf32>, vector<32x8xf32>, vector<1x8xf32> -> vector<1x8xf32>
    %421 = arith.addf %420, %390 : vector<1x8xf32>
    %cst_85 = arith.constant dense<0xFF800000> : vector<1xf32>
    %422 = vector.multi_reduction <maximumf>, %421, %cst_85 [1] : vector<1x8xf32> to vector<1xf32>
    %423 = vector.shape_cast %422 : vector<1xf32> to vector<1x1xf32>
    %424 = vector.broadcast %423 : vector<1x1xf32> to vector<1x8xf32>
    %425 = arith.subf %421, %424 : vector<1x8xf32>
    %426 = math.exp %425 : vector<1x8xf32>
    %cst_86 = arith.constant dense<0.000000e+00> : vector<1xf32>
    %427 = vector.multi_reduction <add>, %426, %cst_86 [1] : vector<1x8xf32> to vector<1xf32>
    %428 = vector.shape_cast %427 : vector<1xf32> to vector<1x1xf32>
    %429 = vector.broadcast %428 : vector<1x1xf32> to vector<1x8xf32>
    %430 = arith.divf %426, %429 : vector<1x8xf32>
    %cst_87 = arith.constant dense<0.000000e+00> : vector<1x32xf32>
    %431 = tpu.matmul %430, %384, %cst_87 {dimension_numbers = #tpu.dot_dimension_numbers<[1], [0], [0], [1], [0, 0, 1, 1], [], []>} : vector<1x8xf32>, vector<8x32xf32>, vector<1x32xf32> -> vector<1x32xf32>
    %432 = arith.truncf %419 : vector<1x32xf32> to vector<1x32xbf16>
    %cst_88 = arith.constant dense<0.000000e+00> : vector<1x32xf32>
    %433 = tpu.matmul %432, %10, %cst_88 {dimension_numbers = #tpu.dot_dimension_numbers<[1], [0], [0], [1], [0, 0, 1, 1], [], []>} : vector<1x32xbf16>, vector<32x32xbf16>, vector<1x32xf32> -> vector<1x32xf32>
    %434 = arith.truncf %431 : vector<1x32xf32> to vector<1x32xbf16>
    %cst_89 = arith.constant dense<0.000000e+00> : vector<1x32xf32>
    %435 = tpu.matmul %434, %11, %cst_89 {dimension_numbers = #tpu.dot_dimension_numbers<[1], [0], [0], [1], [0, 0, 1, 1], [], []>} : vector<1x32xbf16>, vector<32x32xbf16>, vector<1x32xf32> -> vector<1x32xf32>
    %436 = arith.addf %433, %435 : vector<1x32xf32>
    %437 = arith.addf %436, %12 : vector<1x32xf32>
    %438 = math.tanh %437 : vector<1x32xf32>
    %439 = arith.truncf %438 : vector<1x32xf32> to vector<1x32xbf16>
    %cst_90 = arith.constant dense<0.000000e+00> : vector<1x128xf32>
    %440 = tpu.matmul %439, %13, %cst_90 {dimension_numbers = #tpu.dot_dimension_numbers<[1], [0], [0], [1], [0, 0, 1, 1], [], []>} : vector<1x32xbf16>, vector<32x128xbf16>, vector<1x128xf32> -> vector<1x128xf32>
    %441 = arith.addf %440, %14 : vector<1x128xf32>
    %cst_91 = arith.constant dense<0xFF800000> : vector<1xf32>
    %442 = vector.multi_reduction <maximumf>, %441, %cst_91 [1] : vector<1x128xf32> to vector<1xf32>
    %443 = vector.shape_cast %442 : vector<1xf32> to vector<1x1xf32>
    %444 = vector.broadcast %443 : vector<1x1xf32> to vector<1x128xf32>
    %445 = arith.subf %441, %444 : vector<1x128xf32>
    %446 = math.exp %445 : vector<1x128xf32>
    %cst_92 = arith.constant dense<0.000000e+00> : vector<1xf32>
    %447 = vector.multi_reduction <add>, %446, %cst_92 [1] : vector<1x128xf32> to vector<1xf32>
    %448 = vector.shape_cast %447 : vector<1xf32> to vector<1x1xf32>
    %449 = vector.broadcast %443 : vector<1x1xf32> to vector<1x128xf32>
    %450 = arith.cmpf oeq, %441, %449 : vector<1x128xf32>
    %c128_i32 = arith.constant 128 : i32
    %451 = vector.broadcast %c128_i32 : i32 to vector<1x128xi32>
    %452 = arith.select %450, %1, %451 : vector<1x128xi1>, vector<1x128xi32>
    %cst_93 = arith.constant dense<2147483647> : vector<1xi32>
    %453 = vector.multi_reduction <minsi>, %452, %cst_93 [1] : vector<1x128xi32> to vector<1xi32>
    %454 = vector.shape_cast %453 : vector<1xi32> to vector<1x1xi32>
    %cst_94 = arith.constant 1.000000e+00 : f32
    %455 = vector.broadcast %cst_94 : f32 to vector<1x1xf32>
    %456 = arith.divf %455, %448 : vector<1x1xf32>
    %c0_i32_95 = arith.constant 0 : i32
    %457 = vector.broadcast %c0_i32_95 : i32 to vector<1x8xi32>
    %458 = arith.cmpi eq, %4, %457 : vector<1x8xi32>
    %459 = vector.shape_cast %454 : vector<1x1xi32> to vector<1x1xi32>
    %460 = vector.broadcast %459 : vector<1x1xi32> to vector<1x8xi32>
    %461 = arith.select %458, %460, %392 : vector<1x8xi1>, vector<1x8xi32>
    %c0_i32_96 = arith.constant 0 : i32
    %462 = vector.broadcast %c0_i32_96 : i32 to vector<1x8xi32>
    %463 = arith.cmpi eq, %4, %462 : vector<1x8xi32>
    %464 = vector.shape_cast %456 : vector<1x1xf32> to vector<1x1xf32>
    %465 = vector.broadcast %464 : vector<1x1xf32> to vector<1x8xf32>
    %466 = arith.select %463, %465, %393 : vector<1x8xi1>, vector<1x8xf32>
    %467 = vector.broadcast %454 : vector<1x1xi32> to vector<1x128xi32>
    %468 = arith.cmpi eq, %1, %467 : vector<1x128xi32>
    %cst_97 = arith.constant 1.000000e+00 : f32
    %cst_98 = arith.constant 0.000000e+00 : f32
    %469 = vector.broadcast %cst_97 : f32 to vector<1x128xf32>
    %470 = vector.broadcast %cst_98 : f32 to vector<1x128xf32>
    %471 = arith.select %468, %469, %470 : vector<1x128xi1>, vector<1x128xf32>
    %472 = arith.truncf %471 : vector<1x128xf32> to vector<1x128xbf16>
    %cst_99 = arith.constant dense<0.000000e+00> : vector<1x128xf32>
    %473 = tpu.matmul %472, %20, %cst_99 {dimension_numbers = #tpu.dot_dimension_numbers<[1], [0], [0], [1], [0, 0, 1, 1], [], []>} : vector<1x128xbf16>, vector<128x128xbf16>, vector<1x128xf32> -> vector<1x128xf32>
    %474 = arith.truncf %419 : vector<1x32xf32> to vector<1x32xbf16>
    %cst_100 = arith.constant dense<0.000000e+00> : vector<1x128xf32>
    %475 = tpu.matmul %474, %8, %cst_100 {dimension_numbers = #tpu.dot_dimension_numbers<[1], [0], [0], [1], [0, 0, 1, 1], [], []>} : vector<1x32xbf16>, vector<32x128xbf16>, vector<1x128xf32> -> vector<1x128xf32>
    %476 = arith.addf %473, %475 : vector<1x128xf32>
    %477 = arith.addf %476, %9 : vector<1x128xf32>
    %478 = arith.negf %477 : vector<1x128xf32>
    %479 = math.exp %478 : vector<1x128xf32>
    %cst_101 = arith.constant 1.000000e+00 : f32
    %480 = vector.broadcast %cst_101 : f32 to vector<1x128xf32>
    %481 = arith.addf %480, %479 : vector<1x128xf32>
    %482 = arith.divf %480, %481 : vector<1x128xf32>
    %483 = math.tanh %477 : vector<1x128xf32>
    %484 = vector.extract_strided_slice %482 {offsets = [0, 0], sizes = [1, 32], strides = [1, 1]} : vector<1x128xf32> to vector<1x32xf32>
    %485 = vector.extract_strided_slice %482 {offsets = [0, 32], sizes = [1, 32], strides = [1, 1]} : vector<1x128xf32> to vector<1x32xf32>
    %486 = vector.extract_strided_slice %482 {offsets = [0, 96], sizes = [1, 32], strides = [1, 1]} : vector<1x128xf32> to vector<1x32xf32>
    %487 = vector.extract_strided_slice %483 {offsets = [0, 64], sizes = [1, 32], strides = [1, 1]} : vector<1x128xf32> to vector<1x32xf32>
    %488 = arith.mulf %485, %417 : vector<1x32xf32>
    %489 = arith.mulf %484, %487 : vector<1x32xf32>
    %490 = arith.addf %488, %489 : vector<1x32xf32>
    %491 = math.tanh %490 : vector<1x32xf32>
    %492 = arith.mulf %486, %491 : vector<1x32xf32>
    %cst_102 = arith.constant dense<0.000000e+00> : vector<1x8xf32>
    %493 = tpu.matmul %492, %385, %cst_102 {dimension_numbers = #tpu.dot_dimension_numbers<[1], [0], [0], [1], [0, 0, 1, 1], [], []>} : vector<1x32xf32>, vector<32x8xf32>, vector<1x8xf32> -> vector<1x8xf32>
    %494 = arith.addf %493, %390 : vector<1x8xf32>
    %cst_103 = arith.constant dense<0xFF800000> : vector<1xf32>
    %495 = vector.multi_reduction <maximumf>, %494, %cst_103 [1] : vector<1x8xf32> to vector<1xf32>
    %496 = vector.shape_cast %495 : vector<1xf32> to vector<1x1xf32>
    %497 = vector.broadcast %496 : vector<1x1xf32> to vector<1x8xf32>
    %498 = arith.subf %494, %497 : vector<1x8xf32>
    %499 = math.exp %498 : vector<1x8xf32>
    %cst_104 = arith.constant dense<0.000000e+00> : vector<1xf32>
    %500 = vector.multi_reduction <add>, %499, %cst_104 [1] : vector<1x8xf32> to vector<1xf32>
    %501 = vector.shape_cast %500 : vector<1xf32> to vector<1x1xf32>
    %502 = vector.broadcast %501 : vector<1x1xf32> to vector<1x8xf32>
    %503 = arith.divf %499, %502 : vector<1x8xf32>
    %cst_105 = arith.constant dense<0.000000e+00> : vector<1x32xf32>
    %504 = tpu.matmul %503, %384, %cst_105 {dimension_numbers = #tpu.dot_dimension_numbers<[1], [0], [0], [1], [0, 0, 1, 1], [], []>} : vector<1x8xf32>, vector<8x32xf32>, vector<1x32xf32> -> vector<1x32xf32>
    %505 = arith.truncf %492 : vector<1x32xf32> to vector<1x32xbf16>
    %cst_106 = arith.constant dense<0.000000e+00> : vector<1x32xf32>
    %506 = tpu.matmul %505, %10, %cst_106 {dimension_numbers = #tpu.dot_dimension_numbers<[1], [0], [0], [1], [0, 0, 1, 1], [], []>} : vector<1x32xbf16>, vector<32x32xbf16>, vector<1x32xf32> -> vector<1x32xf32>
    %507 = arith.truncf %504 : vector<1x32xf32> to vector<1x32xbf16>
    %cst_107 = arith.constant dense<0.000000e+00> : vector<1x32xf32>
    %508 = tpu.matmul %507, %11, %cst_107 {dimension_numbers = #tpu.dot_dimension_numbers<[1], [0], [0], [1], [0, 0, 1, 1], [], []>} : vector<1x32xbf16>, vector<32x32xbf16>, vector<1x32xf32> -> vector<1x32xf32>
    %509 = arith.addf %506, %508 : vector<1x32xf32>
    %510 = arith.addf %509, %12 : vector<1x32xf32>
    %511 = math.tanh %510 : vector<1x32xf32>
    %512 = arith.truncf %511 : vector<1x32xf32> to vector<1x32xbf16>
    %cst_108 = arith.constant dense<0.000000e+00> : vector<1x128xf32>
    %513 = tpu.matmul %512, %13, %cst_108 {dimension_numbers = #tpu.dot_dimension_numbers<[1], [0], [0], [1], [0, 0, 1, 1], [], []>} : vector<1x32xbf16>, vector<32x128xbf16>, vector<1x128xf32> -> vector<1x128xf32>
    %514 = arith.addf %513, %14 : vector<1x128xf32>
    %cst_109 = arith.constant dense<0xFF800000> : vector<1xf32>
    %515 = vector.multi_reduction <maximumf>, %514, %cst_109 [1] : vector<1x128xf32> to vector<1xf32>
    %516 = vector.shape_cast %515 : vector<1xf32> to vector<1x1xf32>
    %517 = vector.broadcast %516 : vector<1x1xf32> to vector<1x128xf32>
    %518 = arith.subf %514, %517 : vector<1x128xf32>
    %519 = math.exp %518 : vector<1x128xf32>
    %cst_110 = arith.constant dense<0.000000e+00> : vector<1xf32>
    %520 = vector.multi_reduction <add>, %519, %cst_110 [1] : vector<1x128xf32> to vector<1xf32>
    %521 = vector.shape_cast %520 : vector<1xf32> to vector<1x1xf32>
    %522 = vector.broadcast %516 : vector<1x1xf32> to vector<1x128xf32>
    %523 = arith.cmpf oeq, %514, %522 : vector<1x128xf32>
    %c128_i32_111 = arith.constant 128 : i32
    %524 = vector.broadcast %c128_i32_111 : i32 to vector<1x128xi32>
    %525 = arith.select %523, %1, %524 : vector<1x128xi1>, vector<1x128xi32>
    %cst_112 = arith.constant dense<2147483647> : vector<1xi32>
    %526 = vector.multi_reduction <minsi>, %525, %cst_112 [1] : vector<1x128xi32> to vector<1xi32>
    %527 = vector.shape_cast %526 : vector<1xi32> to vector<1x1xi32>
    %cst_113 = arith.constant 1.000000e+00 : f32
    %528 = vector.broadcast %cst_113 : f32 to vector<1x1xf32>
    %529 = arith.divf %528, %521 : vector<1x1xf32>
    %c1_i32_114 = arith.constant 1 : i32
    %530 = vector.broadcast %c1_i32_114 : i32 to vector<1x8xi32>
    %531 = arith.cmpi eq, %4, %530 : vector<1x8xi32>
    %532 = vector.shape_cast %527 : vector<1x1xi32> to vector<1x1xi32>
    %533 = vector.broadcast %532 : vector<1x1xi32> to vector<1x8xi32>
    %534 = arith.select %531, %533, %461 : vector<1x8xi1>, vector<1x8xi32>
    %c1_i32_115 = arith.constant 1 : i32
    %535 = vector.broadcast %c1_i32_115 : i32 to vector<1x8xi32>
    %536 = arith.cmpi eq, %4, %535 : vector<1x8xi32>
    %537 = vector.shape_cast %529 : vector<1x1xf32> to vector<1x1xf32>
    %538 = vector.broadcast %537 : vector<1x1xf32> to vector<1x8xf32>
    %539 = arith.select %536, %538, %466 : vector<1x8xi1>, vector<1x8xf32>
    %540 = vector.broadcast %527 : vector<1x1xi32> to vector<1x128xi32>
    %541 = arith.cmpi eq, %1, %540 : vector<1x128xi32>
    %cst_116 = arith.constant 1.000000e+00 : f32
    %cst_117 = arith.constant 0.000000e+00 : f32
    %542 = vector.broadcast %cst_116 : f32 to vector<1x128xf32>
    %543 = vector.broadcast %cst_117 : f32 to vector<1x128xf32>
    %544 = arith.select %541, %542, %543 : vector<1x128xi1>, vector<1x128xf32>
    %545 = arith.truncf %544 : vector<1x128xf32> to vector<1x128xbf16>
    %cst_118 = arith.constant dense<0.000000e+00> : vector<1x128xf32>
    %546 = tpu.matmul %545, %20, %cst_118 {dimension_numbers = #tpu.dot_dimension_numbers<[1], [0], [0], [1], [0, 0, 1, 1], [], []>} : vector<1x128xbf16>, vector<128x128xbf16>, vector<1x128xf32> -> vector<1x128xf32>
    %547 = arith.truncf %492 : vector<1x32xf32> to vector<1x32xbf16>
    %cst_119 = arith.constant dense<0.000000e+00> : vector<1x128xf32>
    %548 = tpu.matmul %547, %8, %cst_119 {dimension_numbers = #tpu.dot_dimension_numbers<[1], [0], [0], [1], [0, 0, 1, 1], [], []>} : vector<1x32xbf16>, vector<32x128xbf16>, vector<1x128xf32> -> vector<1x128xf32>
    %549 = arith.addf %546, %548 : vector<1x128xf32>
    %550 = arith.addf %549, %9 : vector<1x128xf32>
    %551 = arith.negf %550 : vector<1x128xf32>
    %552 = math.exp %551 : vector<1x128xf32>
    %cst_120 = arith.constant 1.000000e+00 : f32
    %553 = vector.broadcast %cst_120 : f32 to vector<1x128xf32>
    %554 = arith.addf %553, %552 : vector<1x128xf32>
    %555 = arith.divf %553, %554 : vector<1x128xf32>
    %556 = math.tanh %550 : vector<1x128xf32>
    %557 = vector.extract_strided_slice %555 {offsets = [0, 0], sizes = [1, 32], strides = [1, 1]} : vector<1x128xf32> to vector<1x32xf32>
    %558 = vector.extract_strided_slice %555 {offsets = [0, 32], sizes = [1, 32], strides = [1, 1]} : vector<1x128xf32> to vector<1x32xf32>
    %559 = vector.extract_strided_slice %555 {offsets = [0, 96], sizes = [1, 32], strides = [1, 1]} : vector<1x128xf32> to vector<1x32xf32>
    %560 = vector.extract_strided_slice %556 {offsets = [0, 64], sizes = [1, 32], strides = [1, 1]} : vector<1x128xf32> to vector<1x32xf32>
    %561 = arith.mulf %558, %490 : vector<1x32xf32>
    %562 = arith.mulf %557, %560 : vector<1x32xf32>
    %563 = arith.addf %561, %562 : vector<1x32xf32>
    %564 = math.tanh %563 : vector<1x32xf32>
    %565 = arith.mulf %559, %564 : vector<1x32xf32>
    %cst_121 = arith.constant dense<0.000000e+00> : vector<1x8xf32>
    %566 = tpu.matmul %565, %385, %cst_121 {dimension_numbers = #tpu.dot_dimension_numbers<[1], [0], [0], [1], [0, 0, 1, 1], [], []>} : vector<1x32xf32>, vector<32x8xf32>, vector<1x8xf32> -> vector<1x8xf32>
    %567 = arith.addf %566, %390 : vector<1x8xf32>
    %cst_122 = arith.constant dense<0xFF800000> : vector<1xf32>
    %568 = vector.multi_reduction <maximumf>, %567, %cst_122 [1] : vector<1x8xf32> to vector<1xf32>
    %569 = vector.shape_cast %568 : vector<1xf32> to vector<1x1xf32>
    %570 = vector.broadcast %569 : vector<1x1xf32> to vector<1x8xf32>
    %571 = arith.subf %567, %570 : vector<1x8xf32>
    %572 = math.exp %571 : vector<1x8xf32>
    %cst_123 = arith.constant dense<0.000000e+00> : vector<1xf32>
    %573 = vector.multi_reduction <add>, %572, %cst_123 [1] : vector<1x8xf32> to vector<1xf32>
    %574 = vector.shape_cast %573 : vector<1xf32> to vector<1x1xf32>
    %575 = vector.broadcast %574 : vector<1x1xf32> to vector<1x8xf32>
    %576 = arith.divf %572, %575 : vector<1x8xf32>
    %cst_124 = arith.constant dense<0.000000e+00> : vector<1x32xf32>
    %577 = tpu.matmul %576, %384, %cst_124 {dimension_numbers = #tpu.dot_dimension_numbers<[1], [0], [0], [1], [0, 0, 1, 1], [], []>} : vector<1x8xf32>, vector<8x32xf32>, vector<1x32xf32> -> vector<1x32xf32>
    %578 = arith.truncf %565 : vector<1x32xf32> to vector<1x32xbf16>
    %cst_125 = arith.constant dense<0.000000e+00> : vector<1x32xf32>
    %579 = tpu.matmul %578, %10, %cst_125 {dimension_numbers = #tpu.dot_dimension_numbers<[1], [0], [0], [1], [0, 0, 1, 1], [], []>} : vector<1x32xbf16>, vector<32x32xbf16>, vector<1x32xf32> -> vector<1x32xf32>
    %580 = arith.truncf %577 : vector<1x32xf32> to vector<1x32xbf16>
    %cst_126 = arith.constant dense<0.000000e+00> : vector<1x32xf32>
    %581 = tpu.matmul %580, %11, %cst_126 {dimension_numbers = #tpu.dot_dimension_numbers<[1], [0], [0], [1], [0, 0, 1, 1], [], []>} : vector<1x32xbf16>, vector<32x32xbf16>, vector<1x32xf32> -> vector<1x32xf32>
    %582 = arith.addf %579, %581 : vector<1x32xf32>
    %583 = arith.addf %582, %12 : vector<1x32xf32>
    %584 = math.tanh %583 : vector<1x32xf32>
    %585 = arith.truncf %584 : vector<1x32xf32> to vector<1x32xbf16>
    %cst_127 = arith.constant dense<0.000000e+00> : vector<1x128xf32>
    %586 = tpu.matmul %585, %13, %cst_127 {dimension_numbers = #tpu.dot_dimension_numbers<[1], [0], [0], [1], [0, 0, 1, 1], [], []>} : vector<1x32xbf16>, vector<32x128xbf16>, vector<1x128xf32> -> vector<1x128xf32>
    %587 = arith.addf %586, %14 : vector<1x128xf32>
    %cst_128 = arith.constant dense<0xFF800000> : vector<1xf32>
    %588 = vector.multi_reduction <maximumf>, %587, %cst_128 [1] : vector<1x128xf32> to vector<1xf32>
    %589 = vector.shape_cast %588 : vector<1xf32> to vector<1x1xf32>
    %590 = vector.broadcast %589 : vector<1x1xf32> to vector<1x128xf32>
    %591 = arith.subf %587, %590 : vector<1x128xf32>
    %592 = math.exp %591 : vector<1x128xf32>
    %cst_129 = arith.constant dense<0.000000e+00> : vector<1xf32>
    %593 = vector.multi_reduction <add>, %592, %cst_129 [1] : vector<1x128xf32> to vector<1xf32>
    %594 = vector.shape_cast %593 : vector<1xf32> to vector<1x1xf32>
    %595 = vector.broadcast %589 : vector<1x1xf32> to vector<1x128xf32>
    %596 = arith.cmpf oeq, %587, %595 : vector<1x128xf32>
    %c128_i32_130 = arith.constant 128 : i32
    %597 = vector.broadcast %c128_i32_130 : i32 to vector<1x128xi32>
    %598 = arith.select %596, %1, %597 : vector<1x128xi1>, vector<1x128xi32>
    %cst_131 = arith.constant dense<2147483647> : vector<1xi32>
    %599 = vector.multi_reduction <minsi>, %598, %cst_131 [1] : vector<1x128xi32> to vector<1xi32>
    %600 = vector.shape_cast %599 : vector<1xi32> to vector<1x1xi32>
    %cst_132 = arith.constant 1.000000e+00 : f32
    %601 = vector.broadcast %cst_132 : f32 to vector<1x1xf32>
    %602 = arith.divf %601, %594 : vector<1x1xf32>
    %c2_i32_133 = arith.constant 2 : i32
    %603 = vector.broadcast %c2_i32_133 : i32 to vector<1x8xi32>
    %604 = arith.cmpi eq, %4, %603 : vector<1x8xi32>
    %605 = vector.shape_cast %600 : vector<1x1xi32> to vector<1x1xi32>
    %606 = vector.broadcast %605 : vector<1x1xi32> to vector<1x8xi32>
    %607 = arith.select %604, %606, %534 : vector<1x8xi1>, vector<1x8xi32>
    %c2_i32_134 = arith.constant 2 : i32
    %608 = vector.broadcast %c2_i32_134 : i32 to vector<1x8xi32>
    %609 = arith.cmpi eq, %4, %608 : vector<1x8xi32>
    %610 = vector.shape_cast %602 : vector<1x1xf32> to vector<1x1xf32>
    %611 = vector.broadcast %610 : vector<1x1xf32> to vector<1x8xf32>
    %612 = arith.select %609, %611, %539 : vector<1x8xi1>, vector<1x8xf32>
    %613 = vector.broadcast %600 : vector<1x1xi32> to vector<1x128xi32>
    %614 = arith.cmpi eq, %1, %613 : vector<1x128xi32>
    %cst_135 = arith.constant 1.000000e+00 : f32
    %cst_136 = arith.constant 0.000000e+00 : f32
    %615 = vector.broadcast %cst_135 : f32 to vector<1x128xf32>
    %616 = vector.broadcast %cst_136 : f32 to vector<1x128xf32>
    %617 = arith.select %614, %615, %616 : vector<1x128xi1>, vector<1x128xf32>
    %618 = arith.truncf %617 : vector<1x128xf32> to vector<1x128xbf16>
    %cst_137 = arith.constant dense<0.000000e+00> : vector<1x128xf32>
    %619 = tpu.matmul %618, %20, %cst_137 {dimension_numbers = #tpu.dot_dimension_numbers<[1], [0], [0], [1], [0, 0, 1, 1], [], []>} : vector<1x128xbf16>, vector<128x128xbf16>, vector<1x128xf32> -> vector<1x128xf32>
    %620 = arith.truncf %565 : vector<1x32xf32> to vector<1x32xbf16>
    %cst_138 = arith.constant dense<0.000000e+00> : vector<1x128xf32>
    %621 = tpu.matmul %620, %8, %cst_138 {dimension_numbers = #tpu.dot_dimension_numbers<[1], [0], [0], [1], [0, 0, 1, 1], [], []>} : vector<1x32xbf16>, vector<32x128xbf16>, vector<1x128xf32> -> vector<1x128xf32>
    %622 = arith.addf %619, %621 : vector<1x128xf32>
    %623 = arith.addf %622, %9 : vector<1x128xf32>
    %624 = arith.negf %623 : vector<1x128xf32>
    %625 = math.exp %624 : vector<1x128xf32>
    %cst_139 = arith.constant 1.000000e+00 : f32
    %626 = vector.broadcast %cst_139 : f32 to vector<1x128xf32>
    %627 = arith.addf %626, %625 : vector<1x128xf32>
    %628 = arith.divf %626, %627 : vector<1x128xf32>
    %629 = math.tanh %623 : vector<1x128xf32>
    %630 = vector.extract_strided_slice %628 {offsets = [0, 0], sizes = [1, 32], strides = [1, 1]} : vector<1x128xf32> to vector<1x32xf32>
    %631 = vector.extract_strided_slice %628 {offsets = [0, 32], sizes = [1, 32], strides = [1, 1]} : vector<1x128xf32> to vector<1x32xf32>
    %632 = vector.extract_strided_slice %628 {offsets = [0, 96], sizes = [1, 32], strides = [1, 1]} : vector<1x128xf32> to vector<1x32xf32>
    %633 = vector.extract_strided_slice %629 {offsets = [0, 64], sizes = [1, 32], strides = [1, 1]} : vector<1x128xf32> to vector<1x32xf32>
    %634 = arith.mulf %631, %563 : vector<1x32xf32>
    %635 = arith.mulf %630, %633 : vector<1x32xf32>
    %636 = arith.addf %634, %635 : vector<1x32xf32>
    %637 = math.tanh %636 : vector<1x32xf32>
    %638 = arith.mulf %632, %637 : vector<1x32xf32>
    %cst_140 = arith.constant dense<0.000000e+00> : vector<1x8xf32>
    %639 = tpu.matmul %638, %385, %cst_140 {dimension_numbers = #tpu.dot_dimension_numbers<[1], [0], [0], [1], [0, 0, 1, 1], [], []>} : vector<1x32xf32>, vector<32x8xf32>, vector<1x8xf32> -> vector<1x8xf32>
    %640 = arith.addf %639, %390 : vector<1x8xf32>
    %cst_141 = arith.constant dense<0xFF800000> : vector<1xf32>
    %641 = vector.multi_reduction <maximumf>, %640, %cst_141 [1] : vector<1x8xf32> to vector<1xf32>
    %642 = vector.shape_cast %641 : vector<1xf32> to vector<1x1xf32>
    %643 = vector.broadcast %642 : vector<1x1xf32> to vector<1x8xf32>
    %644 = arith.subf %640, %643 : vector<1x8xf32>
    %645 = math.exp %644 : vector<1x8xf32>
    %cst_142 = arith.constant dense<0.000000e+00> : vector<1xf32>
    %646 = vector.multi_reduction <add>, %645, %cst_142 [1] : vector<1x8xf32> to vector<1xf32>
    %647 = vector.shape_cast %646 : vector<1xf32> to vector<1x1xf32>
    %648 = vector.broadcast %647 : vector<1x1xf32> to vector<1x8xf32>
    %649 = arith.divf %645, %648 : vector<1x8xf32>
    %cst_143 = arith.constant dense<0.000000e+00> : vector<1x32xf32>
    %650 = tpu.matmul %649, %384, %cst_143 {dimension_numbers = #tpu.dot_dimension_numbers<[1], [0], [0], [1], [0, 0, 1, 1], [], []>} : vector<1x8xf32>, vector<8x32xf32>, vector<1x32xf32> -> vector<1x32xf32>
    %651 = arith.truncf %638 : vector<1x32xf32> to vector<1x32xbf16>
    %cst_144 = arith.constant dense<0.000000e+00> : vector<1x32xf32>
    %652 = tpu.matmul %651, %10, %cst_144 {dimension_numbers = #tpu.dot_dimension_numbers<[1], [0], [0], [1], [0, 0, 1, 1], [], []>} : vector<1x32xbf16>, vector<32x32xbf16>, vector<1x32xf32> -> vector<1x32xf32>
    %653 = arith.truncf %650 : vector<1x32xf32> to vector<1x32xbf16>
    %cst_145 = arith.constant dense<0.000000e+00> : vector<1x32xf32>
    %654 = tpu.matmul %653, %11, %cst_145 {dimension_numbers = #tpu.dot_dimension_numbers<[1], [0], [0], [1], [0, 0, 1, 1], [], []>} : vector<1x32xbf16>, vector<32x32xbf16>, vector<1x32xf32> -> vector<1x32xf32>
    %655 = arith.addf %652, %654 : vector<1x32xf32>
    %656 = arith.addf %655, %12 : vector<1x32xf32>
    %657 = math.tanh %656 : vector<1x32xf32>
    %658 = arith.truncf %657 : vector<1x32xf32> to vector<1x32xbf16>
    %cst_146 = arith.constant dense<0.000000e+00> : vector<1x128xf32>
    %659 = tpu.matmul %658, %13, %cst_146 {dimension_numbers = #tpu.dot_dimension_numbers<[1], [0], [0], [1], [0, 0, 1, 1], [], []>} : vector<1x32xbf16>, vector<32x128xbf16>, vector<1x128xf32> -> vector<1x128xf32>
    %660 = arith.addf %659, %14 : vector<1x128xf32>
    %cst_147 = arith.constant dense<0xFF800000> : vector<1xf32>
    %661 = vector.multi_reduction <maximumf>, %660, %cst_147 [1] : vector<1x128xf32> to vector<1xf32>
    %662 = vector.shape_cast %661 : vector<1xf32> to vector<1x1xf32>
    %663 = vector.broadcast %662 : vector<1x1xf32> to vector<1x128xf32>
    %664 = arith.subf %660, %663 : vector<1x128xf32>
    %665 = math.exp %664 : vector<1x128xf32>
    %cst_148 = arith.constant dense<0.000000e+00> : vector<1xf32>
    %666 = vector.multi_reduction <add>, %665, %cst_148 [1] : vector<1x128xf32> to vector<1xf32>
    %667 = vector.shape_cast %666 : vector<1xf32> to vector<1x1xf32>
    %668 = vector.broadcast %662 : vector<1x1xf32> to vector<1x128xf32>
    %669 = arith.cmpf oeq, %660, %668 : vector<1x128xf32>
    %c128_i32_149 = arith.constant 128 : i32
    %670 = vector.broadcast %c128_i32_149 : i32 to vector<1x128xi32>
    %671 = arith.select %669, %1, %670 : vector<1x128xi1>, vector<1x128xi32>
    %cst_150 = arith.constant dense<2147483647> : vector<1xi32>
    %672 = vector.multi_reduction <minsi>, %671, %cst_150 [1] : vector<1x128xi32> to vector<1xi32>
    %673 = vector.shape_cast %672 : vector<1xi32> to vector<1x1xi32>
    %cst_151 = arith.constant 1.000000e+00 : f32
    %674 = vector.broadcast %cst_151 : f32 to vector<1x1xf32>
    %675 = arith.divf %674, %667 : vector<1x1xf32>
    %c3_i32_152 = arith.constant 3 : i32
    %676 = vector.broadcast %c3_i32_152 : i32 to vector<1x8xi32>
    %677 = arith.cmpi eq, %4, %676 : vector<1x8xi32>
    %678 = vector.shape_cast %673 : vector<1x1xi32> to vector<1x1xi32>
    %679 = vector.broadcast %678 : vector<1x1xi32> to vector<1x8xi32>
    %680 = arith.select %677, %679, %607 : vector<1x8xi1>, vector<1x8xi32>
    %c3_i32_153 = arith.constant 3 : i32
    %681 = vector.broadcast %c3_i32_153 : i32 to vector<1x8xi32>
    %682 = arith.cmpi eq, %4, %681 : vector<1x8xi32>
    %683 = vector.shape_cast %675 : vector<1x1xf32> to vector<1x1xf32>
    %684 = vector.broadcast %683 : vector<1x1xf32> to vector<1x8xf32>
    %685 = arith.select %682, %684, %612 : vector<1x8xi1>, vector<1x8xf32>
    %686 = vector.broadcast %673 : vector<1x1xi32> to vector<1x128xi32>
    %687 = arith.cmpi eq, %1, %686 : vector<1x128xi32>
    %cst_154 = arith.constant 1.000000e+00 : f32
    %cst_155 = arith.constant 0.000000e+00 : f32
    %688 = vector.broadcast %cst_154 : f32 to vector<1x128xf32>
    %689 = vector.broadcast %cst_155 : f32 to vector<1x128xf32>
    %690 = arith.select %687, %688, %689 : vector<1x128xi1>, vector<1x128xf32>
    %691 = arith.truncf %690 : vector<1x128xf32> to vector<1x128xbf16>
    %cst_156 = arith.constant dense<0.000000e+00> : vector<1x128xf32>
    %692 = tpu.matmul %691, %20, %cst_156 {dimension_numbers = #tpu.dot_dimension_numbers<[1], [0], [0], [1], [0, 0, 1, 1], [], []>} : vector<1x128xbf16>, vector<128x128xbf16>, vector<1x128xf32> -> vector<1x128xf32>
    %693 = arith.truncf %638 : vector<1x32xf32> to vector<1x32xbf16>
    %cst_157 = arith.constant dense<0.000000e+00> : vector<1x128xf32>
    %694 = tpu.matmul %693, %8, %cst_157 {dimension_numbers = #tpu.dot_dimension_numbers<[1], [0], [0], [1], [0, 0, 1, 1], [], []>} : vector<1x32xbf16>, vector<32x128xbf16>, vector<1x128xf32> -> vector<1x128xf32>
    %695 = arith.addf %692, %694 : vector<1x128xf32>
    %696 = arith.addf %695, %9 : vector<1x128xf32>
    %697 = arith.negf %696 : vector<1x128xf32>
    %698 = math.exp %697 : vector<1x128xf32>
    %cst_158 = arith.constant 1.000000e+00 : f32
    %699 = vector.broadcast %cst_158 : f32 to vector<1x128xf32>
    %700 = arith.addf %699, %698 : vector<1x128xf32>
    %701 = arith.divf %699, %700 : vector<1x128xf32>
    %702 = math.tanh %696 : vector<1x128xf32>
    %703 = vector.extract_strided_slice %701 {offsets = [0, 0], sizes = [1, 32], strides = [1, 1]} : vector<1x128xf32> to vector<1x32xf32>
    %704 = vector.extract_strided_slice %701 {offsets = [0, 32], sizes = [1, 32], strides = [1, 1]} : vector<1x128xf32> to vector<1x32xf32>
    %705 = vector.extract_strided_slice %701 {offsets = [0, 96], sizes = [1, 32], strides = [1, 1]} : vector<1x128xf32> to vector<1x32xf32>
    %706 = vector.extract_strided_slice %702 {offsets = [0, 64], sizes = [1, 32], strides = [1, 1]} : vector<1x128xf32> to vector<1x32xf32>
    %707 = arith.mulf %704, %636 : vector<1x32xf32>
    %708 = arith.mulf %703, %706 : vector<1x32xf32>
    %709 = arith.addf %707, %708 : vector<1x32xf32>
    %710 = math.tanh %709 : vector<1x32xf32>
    %711 = arith.mulf %705, %710 : vector<1x32xf32>
    %cst_159 = arith.constant dense<0.000000e+00> : vector<1x8xf32>
    %712 = tpu.matmul %711, %385, %cst_159 {dimension_numbers = #tpu.dot_dimension_numbers<[1], [0], [0], [1], [0, 0, 1, 1], [], []>} : vector<1x32xf32>, vector<32x8xf32>, vector<1x8xf32> -> vector<1x8xf32>
    %713 = arith.addf %712, %390 : vector<1x8xf32>
    %cst_160 = arith.constant dense<0xFF800000> : vector<1xf32>
    %714 = vector.multi_reduction <maximumf>, %713, %cst_160 [1] : vector<1x8xf32> to vector<1xf32>
    %715 = vector.shape_cast %714 : vector<1xf32> to vector<1x1xf32>
    %716 = vector.broadcast %715 : vector<1x1xf32> to vector<1x8xf32>
    %717 = arith.subf %713, %716 : vector<1x8xf32>
    %718 = math.exp %717 : vector<1x8xf32>
    %cst_161 = arith.constant dense<0.000000e+00> : vector<1xf32>
    %719 = vector.multi_reduction <add>, %718, %cst_161 [1] : vector<1x8xf32> to vector<1xf32>
    %720 = vector.shape_cast %719 : vector<1xf32> to vector<1x1xf32>
    %721 = vector.broadcast %720 : vector<1x1xf32> to vector<1x8xf32>
    %722 = arith.divf %718, %721 : vector<1x8xf32>
    %cst_162 = arith.constant dense<0.000000e+00> : vector<1x32xf32>
    %723 = tpu.matmul %722, %384, %cst_162 {dimension_numbers = #tpu.dot_dimension_numbers<[1], [0], [0], [1], [0, 0, 1, 1], [], []>} : vector<1x8xf32>, vector<8x32xf32>, vector<1x32xf32> -> vector<1x32xf32>
    %724 = arith.truncf %711 : vector<1x32xf32> to vector<1x32xbf16>
    %cst_163 = arith.constant dense<0.000000e+00> : vector<1x32xf32>
    %725 = tpu.matmul %724, %10, %cst_163 {dimension_numbers = #tpu.dot_dimension_numbers<[1], [0], [0], [1], [0, 0, 1, 1], [], []>} : vector<1x32xbf16>, vector<32x32xbf16>, vector<1x32xf32> -> vector<1x32xf32>
    %726 = arith.truncf %723 : vector<1x32xf32> to vector<1x32xbf16>
    %cst_164 = arith.constant dense<0.000000e+00> : vector<1x32xf32>
    %727 = tpu.matmul %726, %11, %cst_164 {dimension_numbers = #tpu.dot_dimension_numbers<[1], [0], [0], [1], [0, 0, 1, 1], [], []>} : vector<1x32xbf16>, vector<32x32xbf16>, vector<1x32xf32> -> vector<1x32xf32>
    %728 = arith.addf %725, %727 : vector<1x32xf32>
    %729 = arith.addf %728, %12 : vector<1x32xf32>
    %730 = math.tanh %729 : vector<1x32xf32>
    %731 = arith.truncf %730 : vector<1x32xf32> to vector<1x32xbf16>
    %cst_165 = arith.constant dense<0.000000e+00> : vector<1x128xf32>
    %732 = tpu.matmul %731, %13, %cst_165 {dimension_numbers = #tpu.dot_dimension_numbers<[1], [0], [0], [1], [0, 0, 1, 1], [], []>} : vector<1x32xbf16>, vector<32x128xbf16>, vector<1x128xf32> -> vector<1x128xf32>
    %733 = arith.addf %732, %14 : vector<1x128xf32>
    %cst_166 = arith.constant dense<0xFF800000> : vector<1xf32>
    %734 = vector.multi_reduction <maximumf>, %733, %cst_166 [1] : vector<1x128xf32> to vector<1xf32>
    %735 = vector.shape_cast %734 : vector<1xf32> to vector<1x1xf32>
    %736 = vector.broadcast %735 : vector<1x1xf32> to vector<1x128xf32>
    %737 = arith.subf %733, %736 : vector<1x128xf32>
    %738 = math.exp %737 : vector<1x128xf32>
    %cst_167 = arith.constant dense<0.000000e+00> : vector<1xf32>
    %739 = vector.multi_reduction <add>, %738, %cst_167 [1] : vector<1x128xf32> to vector<1xf32>
    %740 = vector.shape_cast %739 : vector<1xf32> to vector<1x1xf32>
    %741 = vector.broadcast %735 : vector<1x1xf32> to vector<1x128xf32>
    %742 = arith.cmpf oeq, %733, %741 : vector<1x128xf32>
    %c128_i32_168 = arith.constant 128 : i32
    %743 = vector.broadcast %c128_i32_168 : i32 to vector<1x128xi32>
    %744 = arith.select %742, %1, %743 : vector<1x128xi1>, vector<1x128xi32>
    %cst_169 = arith.constant dense<2147483647> : vector<1xi32>
    %745 = vector.multi_reduction <minsi>, %744, %cst_169 [1] : vector<1x128xi32> to vector<1xi32>
    %746 = vector.shape_cast %745 : vector<1xi32> to vector<1x1xi32>
    %cst_170 = arith.constant 1.000000e+00 : f32
    %747 = vector.broadcast %cst_170 : f32 to vector<1x1xf32>
    %748 = arith.divf %747, %740 : vector<1x1xf32>
    %c4_i32_171 = arith.constant 4 : i32
    %749 = vector.broadcast %c4_i32_171 : i32 to vector<1x8xi32>
    %750 = arith.cmpi eq, %4, %749 : vector<1x8xi32>
    %751 = vector.shape_cast %746 : vector<1x1xi32> to vector<1x1xi32>
    %752 = vector.broadcast %751 : vector<1x1xi32> to vector<1x8xi32>
    %753 = arith.select %750, %752, %680 : vector<1x8xi1>, vector<1x8xi32>
    %c4_i32_172 = arith.constant 4 : i32
    %754 = vector.broadcast %c4_i32_172 : i32 to vector<1x8xi32>
    %755 = arith.cmpi eq, %4, %754 : vector<1x8xi32>
    %756 = vector.shape_cast %748 : vector<1x1xf32> to vector<1x1xf32>
    %757 = vector.broadcast %756 : vector<1x1xf32> to vector<1x8xf32>
    %758 = arith.select %755, %757, %685 : vector<1x8xi1>, vector<1x8xf32>
    %759 = vector.broadcast %746 : vector<1x1xi32> to vector<1x128xi32>
    %760 = arith.cmpi eq, %1, %759 : vector<1x128xi32>
    %cst_173 = arith.constant 1.000000e+00 : f32
    %cst_174 = arith.constant 0.000000e+00 : f32
    %761 = vector.broadcast %cst_173 : f32 to vector<1x128xf32>
    %762 = vector.broadcast %cst_174 : f32 to vector<1x128xf32>
    %763 = arith.select %760, %761, %762 : vector<1x128xi1>, vector<1x128xf32>
    %764 = arith.truncf %763 : vector<1x128xf32> to vector<1x128xbf16>
    %cst_175 = arith.constant dense<0.000000e+00> : vector<1x128xf32>
    %765 = tpu.matmul %764, %20, %cst_175 {dimension_numbers = #tpu.dot_dimension_numbers<[1], [0], [0], [1], [0, 0, 1, 1], [], []>} : vector<1x128xbf16>, vector<128x128xbf16>, vector<1x128xf32> -> vector<1x128xf32>
    %766 = arith.truncf %711 : vector<1x32xf32> to vector<1x32xbf16>
    %cst_176 = arith.constant dense<0.000000e+00> : vector<1x128xf32>
    %767 = tpu.matmul %766, %8, %cst_176 {dimension_numbers = #tpu.dot_dimension_numbers<[1], [0], [0], [1], [0, 0, 1, 1], [], []>} : vector<1x32xbf16>, vector<32x128xbf16>, vector<1x128xf32> -> vector<1x128xf32>
    %768 = arith.addf %765, %767 : vector<1x128xf32>
    %769 = arith.addf %768, %9 : vector<1x128xf32>
    %770 = arith.negf %769 : vector<1x128xf32>
    %771 = math.exp %770 : vector<1x128xf32>
    %cst_177 = arith.constant 1.000000e+00 : f32
    %772 = vector.broadcast %cst_177 : f32 to vector<1x128xf32>
    %773 = arith.addf %772, %771 : vector<1x128xf32>
    %774 = arith.divf %772, %773 : vector<1x128xf32>
    %775 = math.tanh %769 : vector<1x128xf32>
    %776 = vector.extract_strided_slice %774 {offsets = [0, 0], sizes = [1, 32], strides = [1, 1]} : vector<1x128xf32> to vector<1x32xf32>
    %777 = vector.extract_strided_slice %774 {offsets = [0, 32], sizes = [1, 32], strides = [1, 1]} : vector<1x128xf32> to vector<1x32xf32>
    %778 = vector.extract_strided_slice %774 {offsets = [0, 96], sizes = [1, 32], strides = [1, 1]} : vector<1x128xf32> to vector<1x32xf32>
    %779 = vector.extract_strided_slice %775 {offsets = [0, 64], sizes = [1, 32], strides = [1, 1]} : vector<1x128xf32> to vector<1x32xf32>
    %780 = arith.mulf %777, %709 : vector<1x32xf32>
    %781 = arith.mulf %776, %779 : vector<1x32xf32>
    %782 = arith.addf %780, %781 : vector<1x32xf32>
    %783 = math.tanh %782 : vector<1x32xf32>
    %784 = arith.mulf %778, %783 : vector<1x32xf32>
    %cst_178 = arith.constant dense<0.000000e+00> : vector<1x8xf32>
    %785 = tpu.matmul %784, %385, %cst_178 {dimension_numbers = #tpu.dot_dimension_numbers<[1], [0], [0], [1], [0, 0, 1, 1], [], []>} : vector<1x32xf32>, vector<32x8xf32>, vector<1x8xf32> -> vector<1x8xf32>
    %786 = arith.addf %785, %390 : vector<1x8xf32>
    %cst_179 = arith.constant dense<0xFF800000> : vector<1xf32>
    %787 = vector.multi_reduction <maximumf>, %786, %cst_179 [1] : vector<1x8xf32> to vector<1xf32>
    %788 = vector.shape_cast %787 : vector<1xf32> to vector<1x1xf32>
    %789 = vector.broadcast %788 : vector<1x1xf32> to vector<1x8xf32>
    %790 = arith.subf %786, %789 : vector<1x8xf32>
    %791 = math.exp %790 : vector<1x8xf32>
    %cst_180 = arith.constant dense<0.000000e+00> : vector<1xf32>
    %792 = vector.multi_reduction <add>, %791, %cst_180 [1] : vector<1x8xf32> to vector<1xf32>
    %793 = vector.shape_cast %792 : vector<1xf32> to vector<1x1xf32>
    %794 = vector.broadcast %793 : vector<1x1xf32> to vector<1x8xf32>
    %795 = arith.divf %791, %794 : vector<1x8xf32>
    %cst_181 = arith.constant dense<0.000000e+00> : vector<1x32xf32>
    %796 = tpu.matmul %795, %384, %cst_181 {dimension_numbers = #tpu.dot_dimension_numbers<[1], [0], [0], [1], [0, 0, 1, 1], [], []>} : vector<1x8xf32>, vector<8x32xf32>, vector<1x32xf32> -> vector<1x32xf32>
    %797 = arith.truncf %784 : vector<1x32xf32> to vector<1x32xbf16>
    %cst_182 = arith.constant dense<0.000000e+00> : vector<1x32xf32>
    %798 = tpu.matmul %797, %10, %cst_182 {dimension_numbers = #tpu.dot_dimension_numbers<[1], [0], [0], [1], [0, 0, 1, 1], [], []>} : vector<1x32xbf16>, vector<32x32xbf16>, vector<1x32xf32> -> vector<1x32xf32>
    %799 = arith.truncf %796 : vector<1x32xf32> to vector<1x32xbf16>
    %cst_183 = arith.constant dense<0.000000e+00> : vector<1x32xf32>
    %800 = tpu.matmul %799, %11, %cst_183 {dimension_numbers = #tpu.dot_dimension_numbers<[1], [0], [0], [1], [0, 0, 1, 1], [], []>} : vector<1x32xbf16>, vector<32x32xbf16>, vector<1x32xf32> -> vector<1x32xf32>
    %801 = arith.addf %798, %800 : vector<1x32xf32>
    %802 = arith.addf %801, %12 : vector<1x32xf32>
    %803 = math.tanh %802 : vector<1x32xf32>
    %804 = arith.truncf %803 : vector<1x32xf32> to vector<1x32xbf16>
    %cst_184 = arith.constant dense<0.000000e+00> : vector<1x128xf32>
    %805 = tpu.matmul %804, %13, %cst_184 {dimension_numbers = #tpu.dot_dimension_numbers<[1], [0], [0], [1], [0, 0, 1, 1], [], []>} : vector<1x32xbf16>, vector<32x128xbf16>, vector<1x128xf32> -> vector<1x128xf32>
    %806 = arith.addf %805, %14 : vector<1x128xf32>
    %cst_185 = arith.constant dense<0xFF800000> : vector<1xf32>
    %807 = vector.multi_reduction <maximumf>, %806, %cst_185 [1] : vector<1x128xf32> to vector<1xf32>
    %808 = vector.shape_cast %807 : vector<1xf32> to vector<1x1xf32>
    %809 = vector.broadcast %808 : vector<1x1xf32> to vector<1x128xf32>
    %810 = arith.subf %806, %809 : vector<1x128xf32>
    %811 = math.exp %810 : vector<1x128xf32>
    %cst_186 = arith.constant dense<0.000000e+00> : vector<1xf32>
    %812 = vector.multi_reduction <add>, %811, %cst_186 [1] : vector<1x128xf32> to vector<1xf32>
    %813 = vector.shape_cast %812 : vector<1xf32> to vector<1x1xf32>
    %814 = vector.broadcast %808 : vector<1x1xf32> to vector<1x128xf32>
    %815 = arith.cmpf oeq, %806, %814 : vector<1x128xf32>
    %c128_i32_187 = arith.constant 128 : i32
    %816 = vector.broadcast %c128_i32_187 : i32 to vector<1x128xi32>
    %817 = arith.select %815, %1, %816 : vector<1x128xi1>, vector<1x128xi32>
    %cst_188 = arith.constant dense<2147483647> : vector<1xi32>
    %818 = vector.multi_reduction <minsi>, %817, %cst_188 [1] : vector<1x128xi32> to vector<1xi32>
    %819 = vector.shape_cast %818 : vector<1xi32> to vector<1x1xi32>
    %cst_189 = arith.constant 1.000000e+00 : f32
    %820 = vector.broadcast %cst_189 : f32 to vector<1x1xf32>
    %821 = arith.divf %820, %813 : vector<1x1xf32>
    %c5_i32_190 = arith.constant 5 : i32
    %822 = vector.broadcast %c5_i32_190 : i32 to vector<1x8xi32>
    %823 = arith.cmpi eq, %4, %822 : vector<1x8xi32>
    %824 = vector.shape_cast %819 : vector<1x1xi32> to vector<1x1xi32>
    %825 = vector.broadcast %824 : vector<1x1xi32> to vector<1x8xi32>
    %826 = arith.select %823, %825, %753 : vector<1x8xi1>, vector<1x8xi32>
    %c5_i32_191 = arith.constant 5 : i32
    %827 = vector.broadcast %c5_i32_191 : i32 to vector<1x8xi32>
    %828 = arith.cmpi eq, %4, %827 : vector<1x8xi32>
    %829 = vector.shape_cast %821 : vector<1x1xf32> to vector<1x1xf32>
    %830 = vector.broadcast %829 : vector<1x1xf32> to vector<1x8xf32>
    %831 = arith.select %828, %830, %758 : vector<1x8xi1>, vector<1x8xf32>
    %832 = vector.broadcast %819 : vector<1x1xi32> to vector<1x128xi32>
    %833 = arith.cmpi eq, %1, %832 : vector<1x128xi32>
    %cst_192 = arith.constant 1.000000e+00 : f32
    %cst_193 = arith.constant 0.000000e+00 : f32
    %834 = vector.broadcast %cst_192 : f32 to vector<1x128xf32>
    %835 = vector.broadcast %cst_193 : f32 to vector<1x128xf32>
    %836 = arith.select %833, %834, %835 : vector<1x128xi1>, vector<1x128xf32>
    %837 = arith.truncf %836 : vector<1x128xf32> to vector<1x128xbf16>
    %cst_194 = arith.constant dense<0.000000e+00> : vector<1x128xf32>
    %838 = tpu.matmul %837, %20, %cst_194 {dimension_numbers = #tpu.dot_dimension_numbers<[1], [0], [0], [1], [0, 0, 1, 1], [], []>} : vector<1x128xbf16>, vector<128x128xbf16>, vector<1x128xf32> -> vector<1x128xf32>
    %839 = arith.truncf %784 : vector<1x32xf32> to vector<1x32xbf16>
    %cst_195 = arith.constant dense<0.000000e+00> : vector<1x128xf32>
    %840 = tpu.matmul %839, %8, %cst_195 {dimension_numbers = #tpu.dot_dimension_numbers<[1], [0], [0], [1], [0, 0, 1, 1], [], []>} : vector<1x32xbf16>, vector<32x128xbf16>, vector<1x128xf32> -> vector<1x128xf32>
    %841 = arith.addf %838, %840 : vector<1x128xf32>
    %842 = arith.addf %841, %9 : vector<1x128xf32>
    %843 = arith.negf %842 : vector<1x128xf32>
    %844 = math.exp %843 : vector<1x128xf32>
    %cst_196 = arith.constant 1.000000e+00 : f32
    %845 = vector.broadcast %cst_196 : f32 to vector<1x128xf32>
    %846 = arith.addf %845, %844 : vector<1x128xf32>
    %847 = arith.divf %845, %846 : vector<1x128xf32>
    %848 = math.tanh %842 : vector<1x128xf32>
    %849 = vector.extract_strided_slice %847 {offsets = [0, 0], sizes = [1, 32], strides = [1, 1]} : vector<1x128xf32> to vector<1x32xf32>
    %850 = vector.extract_strided_slice %847 {offsets = [0, 32], sizes = [1, 32], strides = [1, 1]} : vector<1x128xf32> to vector<1x32xf32>
    %851 = vector.extract_strided_slice %847 {offsets = [0, 96], sizes = [1, 32], strides = [1, 1]} : vector<1x128xf32> to vector<1x32xf32>
    %852 = vector.extract_strided_slice %848 {offsets = [0, 64], sizes = [1, 32], strides = [1, 1]} : vector<1x128xf32> to vector<1x32xf32>
    %853 = arith.mulf %850, %782 : vector<1x32xf32>
    %854 = arith.mulf %849, %852 : vector<1x32xf32>
    %855 = arith.addf %853, %854 : vector<1x32xf32>
    %856 = math.tanh %855 : vector<1x32xf32>
    %857 = arith.mulf %851, %856 : vector<1x32xf32>
    %cst_197 = arith.constant dense<0.000000e+00> : vector<1x8xf32>
    %858 = tpu.matmul %857, %385, %cst_197 {dimension_numbers = #tpu.dot_dimension_numbers<[1], [0], [0], [1], [0, 0, 1, 1], [], []>} : vector<1x32xf32>, vector<32x8xf32>, vector<1x8xf32> -> vector<1x8xf32>
    %859 = arith.addf %858, %390 : vector<1x8xf32>
    %cst_198 = arith.constant dense<0xFF800000> : vector<1xf32>
    %860 = vector.multi_reduction <maximumf>, %859, %cst_198 [1] : vector<1x8xf32> to vector<1xf32>
    %861 = vector.shape_cast %860 : vector<1xf32> to vector<1x1xf32>
    %862 = vector.broadcast %861 : vector<1x1xf32> to vector<1x8xf32>
    %863 = arith.subf %859, %862 : vector<1x8xf32>
    %864 = math.exp %863 : vector<1x8xf32>
    %cst_199 = arith.constant dense<0.000000e+00> : vector<1xf32>
    %865 = vector.multi_reduction <add>, %864, %cst_199 [1] : vector<1x8xf32> to vector<1xf32>
    %866 = vector.shape_cast %865 : vector<1xf32> to vector<1x1xf32>
    %867 = vector.broadcast %866 : vector<1x1xf32> to vector<1x8xf32>
    %868 = arith.divf %864, %867 : vector<1x8xf32>
    %cst_200 = arith.constant dense<0.000000e+00> : vector<1x32xf32>
    %869 = tpu.matmul %868, %384, %cst_200 {dimension_numbers = #tpu.dot_dimension_numbers<[1], [0], [0], [1], [0, 0, 1, 1], [], []>} : vector<1x8xf32>, vector<8x32xf32>, vector<1x32xf32> -> vector<1x32xf32>
    %870 = arith.truncf %857 : vector<1x32xf32> to vector<1x32xbf16>
    %cst_201 = arith.constant dense<0.000000e+00> : vector<1x32xf32>
    %871 = tpu.matmul %870, %10, %cst_201 {dimension_numbers = #tpu.dot_dimension_numbers<[1], [0], [0], [1], [0, 0, 1, 1], [], []>} : vector<1x32xbf16>, vector<32x32xbf16>, vector<1x32xf32> -> vector<1x32xf32>
    %872 = arith.truncf %869 : vector<1x32xf32> to vector<1x32xbf16>
    %cst_202 = arith.constant dense<0.000000e+00> : vector<1x32xf32>
    %873 = tpu.matmul %872, %11, %cst_202 {dimension_numbers = #tpu.dot_dimension_numbers<[1], [0], [0], [1], [0, 0, 1, 1], [], []>} : vector<1x32xbf16>, vector<32x32xbf16>, vector<1x32xf32> -> vector<1x32xf32>
    %874 = arith.addf %871, %873 : vector<1x32xf32>
    %875 = arith.addf %874, %12 : vector<1x32xf32>
    %876 = math.tanh %875 : vector<1x32xf32>
    %877 = arith.truncf %876 : vector<1x32xf32> to vector<1x32xbf16>
    %cst_203 = arith.constant dense<0.000000e+00> : vector<1x128xf32>
    %878 = tpu.matmul %877, %13, %cst_203 {dimension_numbers = #tpu.dot_dimension_numbers<[1], [0], [0], [1], [0, 0, 1, 1], [], []>} : vector<1x32xbf16>, vector<32x128xbf16>, vector<1x128xf32> -> vector<1x128xf32>
    %879 = arith.addf %878, %14 : vector<1x128xf32>
    %cst_204 = arith.constant dense<0xFF800000> : vector<1xf32>
    %880 = vector.multi_reduction <maximumf>, %879, %cst_204 [1] : vector<1x128xf32> to vector<1xf32>
    %881 = vector.shape_cast %880 : vector<1xf32> to vector<1x1xf32>
    %882 = vector.broadcast %881 : vector<1x1xf32> to vector<1x128xf32>
    %883 = arith.subf %879, %882 : vector<1x128xf32>
    %884 = math.exp %883 : vector<1x128xf32>
    %cst_205 = arith.constant dense<0.000000e+00> : vector<1xf32>
    %885 = vector.multi_reduction <add>, %884, %cst_205 [1] : vector<1x128xf32> to vector<1xf32>
    %886 = vector.shape_cast %885 : vector<1xf32> to vector<1x1xf32>
    %887 = vector.broadcast %881 : vector<1x1xf32> to vector<1x128xf32>
    %888 = arith.cmpf oeq, %879, %887 : vector<1x128xf32>
    %c128_i32_206 = arith.constant 128 : i32
    %889 = vector.broadcast %c128_i32_206 : i32 to vector<1x128xi32>
    %890 = arith.select %888, %1, %889 : vector<1x128xi1>, vector<1x128xi32>
    %cst_207 = arith.constant dense<2147483647> : vector<1xi32>
    %891 = vector.multi_reduction <minsi>, %890, %cst_207 [1] : vector<1x128xi32> to vector<1xi32>
    %892 = vector.shape_cast %891 : vector<1xi32> to vector<1x1xi32>
    %cst_208 = arith.constant 1.000000e+00 : f32
    %893 = vector.broadcast %cst_208 : f32 to vector<1x1xf32>
    %894 = arith.divf %893, %886 : vector<1x1xf32>
    %c6_i32_209 = arith.constant 6 : i32
    %895 = vector.broadcast %c6_i32_209 : i32 to vector<1x8xi32>
    %896 = arith.cmpi eq, %4, %895 : vector<1x8xi32>
    %897 = vector.shape_cast %892 : vector<1x1xi32> to vector<1x1xi32>
    %898 = vector.broadcast %897 : vector<1x1xi32> to vector<1x8xi32>
    %899 = arith.select %896, %898, %826 : vector<1x8xi1>, vector<1x8xi32>
    %c6_i32_210 = arith.constant 6 : i32
    %900 = vector.broadcast %c6_i32_210 : i32 to vector<1x8xi32>
    %901 = arith.cmpi eq, %4, %900 : vector<1x8xi32>
    %902 = vector.shape_cast %894 : vector<1x1xf32> to vector<1x1xf32>
    %903 = vector.broadcast %902 : vector<1x1xf32> to vector<1x8xf32>
    %904 = arith.select %901, %903, %831 : vector<1x8xi1>, vector<1x8xf32>
    %905 = vector.broadcast %892 : vector<1x1xi32> to vector<1x128xi32>
    %906 = arith.cmpi eq, %1, %905 : vector<1x128xi32>
    %cst_211 = arith.constant 1.000000e+00 : f32
    %cst_212 = arith.constant 0.000000e+00 : f32
    %907 = vector.broadcast %cst_211 : f32 to vector<1x128xf32>
    %908 = vector.broadcast %cst_212 : f32 to vector<1x128xf32>
    %909 = arith.select %906, %907, %908 : vector<1x128xi1>, vector<1x128xf32>
    %910 = arith.truncf %909 : vector<1x128xf32> to vector<1x128xbf16>
    %cst_213 = arith.constant dense<0.000000e+00> : vector<1x128xf32>
    %911 = tpu.matmul %910, %20, %cst_213 {dimension_numbers = #tpu.dot_dimension_numbers<[1], [0], [0], [1], [0, 0, 1, 1], [], []>} : vector<1x128xbf16>, vector<128x128xbf16>, vector<1x128xf32> -> vector<1x128xf32>
    %912 = arith.truncf %857 : vector<1x32xf32> to vector<1x32xbf16>
    %cst_214 = arith.constant dense<0.000000e+00> : vector<1x128xf32>
    %913 = tpu.matmul %912, %8, %cst_214 {dimension_numbers = #tpu.dot_dimension_numbers<[1], [0], [0], [1], [0, 0, 1, 1], [], []>} : vector<1x32xbf16>, vector<32x128xbf16>, vector<1x128xf32> -> vector<1x128xf32>
    %914 = arith.addf %911, %913 : vector<1x128xf32>
    %915 = arith.addf %914, %9 : vector<1x128xf32>
    %916 = arith.negf %915 : vector<1x128xf32>
    %917 = math.exp %916 : vector<1x128xf32>
    %cst_215 = arith.constant 1.000000e+00 : f32
    %918 = vector.broadcast %cst_215 : f32 to vector<1x128xf32>
    %919 = arith.addf %918, %917 : vector<1x128xf32>
    %920 = arith.divf %918, %919 : vector<1x128xf32>
    %921 = math.tanh %915 : vector<1x128xf32>
    %922 = vector.extract_strided_slice %920 {offsets = [0, 0], sizes = [1, 32], strides = [1, 1]} : vector<1x128xf32> to vector<1x32xf32>
    %923 = vector.extract_strided_slice %920 {offsets = [0, 32], sizes = [1, 32], strides = [1, 1]} : vector<1x128xf32> to vector<1x32xf32>
    %924 = vector.extract_strided_slice %920 {offsets = [0, 96], sizes = [1, 32], strides = [1, 1]} : vector<1x128xf32> to vector<1x32xf32>
    %925 = vector.extract_strided_slice %921 {offsets = [0, 64], sizes = [1, 32], strides = [1, 1]} : vector<1x128xf32> to vector<1x32xf32>
    %926 = arith.mulf %923, %855 : vector<1x32xf32>
    %927 = arith.mulf %922, %925 : vector<1x32xf32>
    %928 = arith.addf %926, %927 : vector<1x32xf32>
    %929 = math.tanh %928 : vector<1x32xf32>
    %930 = arith.mulf %924, %929 : vector<1x32xf32>
    %cst_216 = arith.constant dense<0.000000e+00> : vector<1x8xf32>
    %931 = tpu.matmul %930, %385, %cst_216 {dimension_numbers = #tpu.dot_dimension_numbers<[1], [0], [0], [1], [0, 0, 1, 1], [], []>} : vector<1x32xf32>, vector<32x8xf32>, vector<1x8xf32> -> vector<1x8xf32>
    %932 = arith.addf %931, %390 : vector<1x8xf32>
    %cst_217 = arith.constant dense<0xFF800000> : vector<1xf32>
    %933 = vector.multi_reduction <maximumf>, %932, %cst_217 [1] : vector<1x8xf32> to vector<1xf32>
    %934 = vector.shape_cast %933 : vector<1xf32> to vector<1x1xf32>
    %935 = vector.broadcast %934 : vector<1x1xf32> to vector<1x8xf32>
    %936 = arith.subf %932, %935 : vector<1x8xf32>
    %937 = math.exp %936 : vector<1x8xf32>
    %cst_218 = arith.constant dense<0.000000e+00> : vector<1xf32>
    %938 = vector.multi_reduction <add>, %937, %cst_218 [1] : vector<1x8xf32> to vector<1xf32>
    %939 = vector.shape_cast %938 : vector<1xf32> to vector<1x1xf32>
    %940 = vector.broadcast %939 : vector<1x1xf32> to vector<1x8xf32>
    %941 = arith.divf %937, %940 : vector<1x8xf32>
    %cst_219 = arith.constant dense<0.000000e+00> : vector<1x32xf32>
    %942 = tpu.matmul %941, %384, %cst_219 {dimension_numbers = #tpu.dot_dimension_numbers<[1], [0], [0], [1], [0, 0, 1, 1], [], []>} : vector<1x8xf32>, vector<8x32xf32>, vector<1x32xf32> -> vector<1x32xf32>
    %943 = arith.truncf %930 : vector<1x32xf32> to vector<1x32xbf16>
    %cst_220 = arith.constant dense<0.000000e+00> : vector<1x32xf32>
    %944 = tpu.matmul %943, %10, %cst_220 {dimension_numbers = #tpu.dot_dimension_numbers<[1], [0], [0], [1], [0, 0, 1, 1], [], []>} : vector<1x32xbf16>, vector<32x32xbf16>, vector<1x32xf32> -> vector<1x32xf32>
    %945 = arith.truncf %942 : vector<1x32xf32> to vector<1x32xbf16>
    %cst_221 = arith.constant dense<0.000000e+00> : vector<1x32xf32>
    %946 = tpu.matmul %945, %11, %cst_221 {dimension_numbers = #tpu.dot_dimension_numbers<[1], [0], [0], [1], [0, 0, 1, 1], [], []>} : vector<1x32xbf16>, vector<32x32xbf16>, vector<1x32xf32> -> vector<1x32xf32>
    %947 = arith.addf %944, %946 : vector<1x32xf32>
    %948 = arith.addf %947, %12 : vector<1x32xf32>
    %949 = math.tanh %948 : vector<1x32xf32>
    %950 = arith.truncf %949 : vector<1x32xf32> to vector<1x32xbf16>
    %cst_222 = arith.constant dense<0.000000e+00> : vector<1x128xf32>
    %951 = tpu.matmul %950, %13, %cst_222 {dimension_numbers = #tpu.dot_dimension_numbers<[1], [0], [0], [1], [0, 0, 1, 1], [], []>} : vector<1x32xbf16>, vector<32x128xbf16>, vector<1x128xf32> -> vector<1x128xf32>
    %952 = arith.addf %951, %14 : vector<1x128xf32>
    %cst_223 = arith.constant dense<0xFF800000> : vector<1xf32>
    %953 = vector.multi_reduction <maximumf>, %952, %cst_223 [1] : vector<1x128xf32> to vector<1xf32>
    %954 = vector.shape_cast %953 : vector<1xf32> to vector<1x1xf32>
    %955 = vector.broadcast %954 : vector<1x1xf32> to vector<1x128xf32>
    %956 = arith.subf %952, %955 : vector<1x128xf32>
    %957 = math.exp %956 : vector<1x128xf32>
    %cst_224 = arith.constant dense<0.000000e+00> : vector<1xf32>
    %958 = vector.multi_reduction <add>, %957, %cst_224 [1] : vector<1x128xf32> to vector<1xf32>
    %959 = vector.shape_cast %958 : vector<1xf32> to vector<1x1xf32>
    %960 = vector.broadcast %954 : vector<1x1xf32> to vector<1x128xf32>
    %961 = arith.cmpf oeq, %952, %960 : vector<1x128xf32>
    %c128_i32_225 = arith.constant 128 : i32
    %962 = vector.broadcast %c128_i32_225 : i32 to vector<1x128xi32>
    %963 = arith.select %961, %1, %962 : vector<1x128xi1>, vector<1x128xi32>
    %cst_226 = arith.constant dense<2147483647> : vector<1xi32>
    %964 = vector.multi_reduction <minsi>, %963, %cst_226 [1] : vector<1x128xi32> to vector<1xi32>
    %965 = vector.shape_cast %964 : vector<1xi32> to vector<1x1xi32>
    %cst_227 = arith.constant 1.000000e+00 : f32
    %966 = vector.broadcast %cst_227 : f32 to vector<1x1xf32>
    %967 = arith.divf %966, %959 : vector<1x1xf32>
    %c7_i32_228 = arith.constant 7 : i32
    %968 = vector.broadcast %c7_i32_228 : i32 to vector<1x8xi32>
    %969 = arith.cmpi eq, %4, %968 : vector<1x8xi32>
    %970 = vector.shape_cast %965 : vector<1x1xi32> to vector<1x1xi32>
    %971 = vector.broadcast %970 : vector<1x1xi32> to vector<1x8xi32>
    %972 = arith.select %969, %971, %899 : vector<1x8xi1>, vector<1x8xi32>
    %c7_i32_229 = arith.constant 7 : i32
    %973 = vector.broadcast %c7_i32_229 : i32 to vector<1x8xi32>
    %974 = arith.cmpi eq, %4, %973 : vector<1x8xi32>
    %975 = vector.shape_cast %967 : vector<1x1xf32> to vector<1x1xf32>
    %976 = vector.broadcast %975 : vector<1x1xf32> to vector<1x8xf32>
    %977 = arith.select %974, %976, %904 : vector<1x8xi1>, vector<1x8xf32>
    %c0_230 = arith.constant 0 : index
    %c0_231 = arith.constant 0 : index
    %978 = vector.load %arg14[%c0_230, %c0_231] : memref<1x8xi32, #tpu.memory_space<vmem>>, vector<1x8xi32>
    tpu.vector_store %arg14[%c0_230, %c0_231], %972 {strides = array<i32>} : memref<1x8xi32, #tpu.memory_space<vmem>>, vector<1x8xi32>,
    %c0_232 = arith.constant 0 : index
    %c0_233 = arith.constant 0 : index
    %979 = vector.load %arg15[%c0_232, %c0_233] : memref<1x8xf32, #tpu.memory_space<vmem>>, vector<1x8xf32>
    tpu.vector_store %arg15[%c0_232, %c0_233], %977 {strides = array<i32>} : memref<1x8xf32, #tpu.memory_space<vmem>>, vector<1x8xf32>,
    return
  }
}

</mosaic_0001>

<bundles_post_ra>
// kernel: tpu_custom_call.1
= control target key start
LH: loop header
LB: loop body
LE: loop exit
PB: predicated region body
PF: predicated region fallthrough
CT: control target
= control target key end

     0   :  { %22 = vsyncpa [#allocation4], 0  ;;  %s7496_s0 = inlined_call_operand.vmem [shape: s32[8,1], index: 0, kind: input, shape index: {}]   ;;  %s7497_s1 = inlined_call_operand.<no memory space> [shape: s32[1,1], index: 1, kind: input, shape index: {}]   ;;  %s7498_s2 = inlined_call_operand.vmem [shape: bf16[128,32], index: 2, kind: input, shape index: {}]   ;;  %s7499_s3 = inlined_call_operand.vmem [shape: bf16[32,128], index: 3, kind: input, shape index: {}]   ;;  %s7500_s4 = inlined_call_operand.vmem [shape: bf16[32,128], index: 4, kind: input, shape index: {}]   ;;  %s7501_s5 = inlined_call_operand.vmem [shape: f32[1,128], index: 5, kind: input, shape index: {}]   ;;  %s7502_s6 = inlined_call_operand.vmem [shape: bf16[32,128], index: 6, kind: input, shape index: {}]   ;;  %s7503_s7 = inlined_call_operand.vmem [shape: bf16[32,128], index: 7, kind: input, shape index: {}]   ;;  %s7504_s8 = inlined_call_operand.vmem [shape: f32[1,128], index: 8, kind: input, shape index: {}]   ;;  %s7505_s9 = inlined_call_operand.vmem [shape: bf16[32,32], index: 9, kind: input, shape index: {}]   ;;  %s7506_s10 = inlined_call_operand.vmem [shape: bf16[32,32], index: 10, kind: input, shape index: {}]   ;;  %s7507_s11 = inlined_call_operand.hbm [shape: f32[1,32], index: 11, kind: input, shape index: {}]   ;;  %s7508_s12 = inlined_call_operand.vmem [shape: bf16[32,128], index: 12, kind: input, shape index: {}]   ;;  %s7509_s13 = inlined_call_operand.vmem [shape: f32[1,128], index: 13, kind: input, shape index: {}]   ;;  %s7510_s14 = inlined_call_operand.hbm [shape: s32[1,8], index: 14, kind: output, shape index: {0}]   ;;  %s7511_s15 = inlined_call_operand.hbm [shape: f32[1,8], index: 15, kind: output, shape index: {1}]  }
   0x1   :  { %23 = vsyncpa [#allocation5], 0 }
   0x2   :  { %24 = vsyncpa [#allocation8], 0  ;;  %s6231_s18 = smov [#allocation3]   ;;  %s6159_s22 = scalar_lea.hbm %s7507_s11, 16 }
   0x3   :  { %s53_s19 = sshll.u32 %s6231_s18, 4  ;;  %p6160_p0 = scmp.ne.s32.totalorder %s7507_s11, %s6159_s22  ;;  %s54_s19 = int_to_ptr.vmem [resolvable:$true] %s53_s19 }
   0x4   :  { %p6163_p1 = scmp.lt.u32.totalorder %s6159_s22, %s7507_s11 }
   0x6   :  { %p6165_p2 = pnand %p6163_p1, %p6160_p0 }
   0x8   :  { %6168 = shalt.err (!%p6165_p2)
}
   0x9   :  { %s6169_s27 = scalar_lea.vmem %s54_s19, 16  ;;  %s6173_s28 = scalar_lea.vmem %s54_s19, 32 }
   0xa   :  { %p6170_p3 = scmp.ne.s32.totalorder %s54_s19, %s6169_s27  ;;  %p6174_p4 = scmp.lt.s32.totalorder %s54_s19, %s54_s19 }
   0xb   :  { %p6175_p5 = scmp.lt.s32.totalorder %s6173_s28, %s6169_s27 }
   0xd   :  { %p6176_p6 = por %p6175_p5, %p6174_p4 }
   0xf   :  { %p6177_p7 = pnand %p6176_p6, %p6170_p3 }
  0x11   :  { %6180 = shalt.err (!%p6177_p7)
}
  0x12   :  { %56 = dma.hbm_to_vmem [thread:$0]  %s7507_s11, 16, %s54_s19, [#allocation4]  }
  0x13   :  { %6225 = dma.done.wait [#allocation4], 16  }
  0x14   :  { %6226 = vsyncadd [#allocation4], 4294967280  ;;  %v6232_v0 = vmov 0   ;;  %v5918_v1 = vld [vmem:[%s7499_s3] sm:$0xff]   ;;  %v5919_v2 = vld [vmem:[%s7499_s3 + $0x8] sm:$0xff]   ;;  %vm166_vm0 = vcmask 261120   ;;  %v66_v46 = vlaneseq }
  0x15   :  { %5917 = vset.pattern.permute.xlu0 %v6232_v0  ;;  %5287 = vmatprep.subr.bf16.mxu0 %v5918_v1  ;;  %v5920_v3 = vld [vmem:[%s7498_s2] sm:$0xff]   ;;  %v5921_v4 = vld [vmem:[%s7498_s2 + $0x8] sm:$0xff]   ;;  %v5922_v5 = vld [vmem:[%s7498_s2 + $0x10] sm:$0xff]   ;;  %v6233_v14 = vmov 0.0   ;;  %vm6234_vm1 = vmmov 0   ;;  %s6236_s25 = smov 64  }
  0x16   :  { %5288 = vmatpush3.bf16.msra.mxu0 %v5918_v1  ;;  %5291 = vmatprep.mubr.msk.bf16.mxu0 %vm166_vm0, %v5920_v3  ;;  %v417_v6 = vld [vmem:[%s7496_s0] sm:$0xff]  ;;  %v5923_v8 = vld [vmem:[%s7498_s2 + $0x18] sm:$0xff]   ;;  %v5929_v9 = vld [vmem:[%s7502_s6 + $0x8] sm:$0xff]   ;;  %v6429_v53 = vand.u32 127, %v66_v46  ;;  %p545_p8 = scmp.gt.s32.totalorder %s7497_s1, 0  ;;  %p649_p9 = scmp.gt.s32.totalorder %s7497_s1, 1 }
  0x17   :  { %5289 = vmatprep.subr.bf16.mxu0 %v5919_v2  ;;  %5311 = vmatprep.mubr.msk.bf16.mxu1 %vm166_vm0, %v5920_v3  ;;  %v5928_v7 = vld [vmem:[%s7502_s6] sm:$0xff]   ;;  %v5925_v11 = vld [vmem:[%s7498_s2 + $0x28] sm:$0xff]   ;;  %v5926_v12 = vld [vmem:[%s7498_s2 + $0x30] sm:$0xff]   ;;  %p756_p10 = scmp.gt.s32.totalorder %s7497_s1, 2  ;;  %p862_p11 = scmp.gt.s32.totalorder %s7497_s1, 3  ;;  %vm1532_vm15 = vcmask 57344  }
  0x18   :  { %419 = vperm.xlu0 %5917, %v417_v6   ;;  %v5924_v10 = vld [vmem:[%s7498_s2 + $0x20] sm:$0xff]   ;;  %5307 = vmatprep.subr.bf16.mxu1 %v5928_v7  ;;  %v5927_v13 = vld [vmem:[%s7498_s2 + $0x38] sm:$0xff]   ;;  %v6400_v16 = vld [vmem:[%s7500_s4 + $0x8] sm:$0xff]   ;;  %s546_s28 = scalar_select %p545_p8, 1, 0  ;;  %vm1319_vm11 = vcmp.eq.s32.totalorder %v6429_v53, 1 }
  0x19   :  { %5308 = vmatpush3.bf16.msra.mxu1 %v5928_v7  ;;  %v6393_v15 = vld [vmem:[%s7500_s4] sm:$0xff]   ;;  %s650_s18 = scalar_select %p649_p9, 1, 0  ;;  %vm4949_vm12 = vmpackc.low %vm1319_vm11, %vm1319_vm11 }
  0x1a   :  { %5290 = vmatpush3.bf16.msra.mxu0 %v5919_v2  ;;  %5309 = vmatprep.subr.bf16.mxu1 %v5929_v9  ;;  %s547_s29 = scvt.s32.f32 %s546_s28  ;;  %p970_p12 = scmp.gt.s32.totalorder %s7497_s1, 4 }
  0x1b   :  { %5327 = vmatprep.subr.bf16.mxu0 %v6233_v14  ;;  %s651_s0 = scvt.s32.f32 %s650_s18  ;;  %p1076_p13 = scmp.gt.s32.totalorder %s7497_s1, 5 }
  0x1c   :  { %s550_s30 = ssub.f32 1.0, %s547_s29  ;;  %p1184_p0 = scmp.gt.s32.totalorder %s7497_s1, 6 }
  0x1d   :  { %5292 = vmatmul.mubr.msk.bf16.vlgmr.msra.gmra.mrb[0].mxu0 %vm166_vm0, %v5921_v4  ;;  %5310 = vmatpush3.bf16.msra.mxu1 %v5929_v9  ;;  %v90_v9 = vld [vmem:[%s7501_s5] sm:$0x1]  ;;  %s6237_s5 = smov 32   ;;  %s654_s20 = ssub.f32 1.0, %s651_s0 }
  0x1e   :  { %5295 = vmatprep.mubr.msk.bf16.mxu0 %vm166_vm0, %v5922_v5  ;;  %5347 = vmatprep.subr.bf16.mxu1 %v6233_v14  ;;  %s757_s22 = scalar_select %p756_p10, 1, 0 }
  0x1f   :  { %s863_s24 = scalar_select %p862_p11, 1, 0 }
  0x20   :  { %5312 = vmatmul.mubr.msk.bf16.vlgmr.msra.gmra.mrb[0].mxu1 %vm166_vm0, %v5921_v4  ;;  %s758_s11 = scvt.s32.f32 %s757_s22  ;;  %p1290_p1 = scmp.gt.s32.totalorder %s7497_s1, 7 }
  0x21   :  { %5315 = vmatprep.mubr.msk.bf16.mxu1 %vm166_vm0, %v5922_v5  ;;  %5348 = vmatpush3.bf16.msra.mxu1 %v6393_v15  ;;  %s864_s4 = scvt.s32.f32 %s863_s24 }
  0x22   :  { %5349 = vmatprep.subr.bf16.mxu1 %v6233_v14  ;;  %s761_s19 = ssub.f32 1.0, %s758_s11 }
  0x23   :  { %s867_s3 = ssub.f32 1.0, %s864_s4 }
  0x24   :  { %s971_s28 = scalar_select %p970_p12, 1, 0 }
  0x25   :  { %5296 = vmatmul.mubr.msk.bf16.gmra.mrb[4].mxu0 %vm166_vm0, %v5923_v8  ;;  %5350 = vmatpush3.bf16.msra.mxu1 %v6400_v16  ;;  %s1077_s18 = scalar_select %p1076_p13, 1, 0 }
  0x26   :  { %5299 = vmatprep.mubr.msk.bf16.mxu0 %vm166_vm0, %v5924_v10  ;;  %5363 = vmatprep.subr.bf16.mxu1 %v6233_v14  ;;  %s1185_s22 = scalar_select %p1184_p0, 1, 0 }
  0x27   :  { %s1291_s24 = scalar_select %p1290_p1, 1, 0 }
  0x28   :  { %5316 = vmatmul.mubr.msk.bf16.gmra.mrb[4].mxu1 %vm166_vm0, %v5923_v8 }
  0x29   :  { %5319 = vmatprep.mubr.msk.bf16.mxu1 %vm166_vm0, %v5924_v10 }
  0x2d   :  { %5300 = vmatmul.mubr.msk.bf16.gmra.mrb[8].mxu0 %vm166_vm0, %v5925_v11 }
  0x2e   :  { %5303 = vmatprep.mubr.msk.bf16.mxu0 %vm166_vm0, %v5926_v12 }
  0x30   :  { %5320 = vmatmul.mubr.msk.bf16.gmra.mrb[8].mxu1 %vm166_vm0, %v5925_v11 }
  0x31   :  { %5323 = vmatprep.mubr.msk.bf16.mxu1 %vm166_vm0, %v5926_v12 }
  0x35   :  { %5304 = vmatmul.mubr.msk.bf16.gmra.mrb[12].mxu0 %vm166_vm0, %v5927_v13 }
  0x36   :  { %5343 = vmatprep.mubr.msk.bf16.mxu0 %vm6234_vm1, %v6233_v14 }
  0x38   :  { %5324 = vmatmul.mubr.msk.bf16.gmra.mrb[12].mxu1 %vm166_vm0, %v5927_v13 }
  0x39   :  { %5351 = vmatprep.mubr.msk.bf16.mxu1 %vm6234_vm1, %v6233_v14 }
  0x40   :  { %5352 = vmatmul.mubr.bf16.vlgmr.msra.gmra.mrb[16].mxu1 %v6232_v0  ;;  %v6235_v0 = vmov 1.0|1.0  }
  0x41   :  { %5364 = vmatpush3.bf16.msra.mxu1 %v6393_v15  ;;  %5367 = vmatprep.mubr.msk.bf16.mxu1 %vm6234_vm1, %v6233_v14 }
  0x42   :  { %5365 = vmatprep.subr.bf16.mxu1 %v6233_v14 }
  0x45   :  { %5366 = vmatpush3.bf16.msra.mxu1 %v6400_v16 }
  0x46   :  { %5379 = vmatprep.subr.bf16.mxu1 %v6233_v14 }
  0x97   :  { %v420_v56 = vpop.permute.xlu0 %419 }
  0x98   :  { %vm421_vm2 = vcmp.eq.s32.totalorder %v6429_v53, %v420_v56 }
  0x99   :  { %vm4927_vm3 = vmpackc.low %vm421_vm2, %vm421_vm2  ;;  %vm1545_vm2 = vcmask 64512  }
  0xf0   :  { %v5293_v17 = vpop.f32.mrb[0].mxu0 }
  0xf1   :  { %v225_v18 = vpop.f32.mrb[1].mxu0 }
  0xf2   :  { %v5294_v19 = vpop.f32.mrb[2].mxu0 }
  0xf3   :  { %v289_v20 = vpack.c.bf16 %v5294_v19, %v5293_v17  ;;  %v228_v21 = vpop.f32.mrb[3].mxu0  ;;  %v5313_v28 = vpop.f32.mrb[0].mxu1 }
  0xf4   :  { %v288_v22 = vpack.c.bf16 %v228_v21, %v225_v18  ;;  %v346_v30 = vpop.f32.mrb[1].mxu1 }
  0xf5   :  { %v5314_v31 = vpop.f32.mrb[2].mxu1 }
  0xf6   :  { %5328 = vmatpush3.bf16.msra.mxu0 %v288_v22  ;;  %v6416_v32 = vpack.c.bf16 %v5314_v31, %v5313_v28  ;;  %v349_v33 = vpop.f32.mrb[3].mxu1 }
  0xf7   :  { %5329 = vmatprep.subr.bf16.mxu0 %v6233_v14  ;;  %v6419_v34 = vpack.c.bf16 %v349_v33, %v346_v30  ;;  %v551_v30 = vstv %s550_s30 }
  0xf8   :  { %v5297_v23 = vpop.f32.mrb[4].mxu0 }
  0xf9   :  { %v241_v24 = vpop.f32.mrb[5].mxu0 }
  0xfa   :  { %v5298_v25 = vpop.f32.mrb[6].mxu0  ;;  %5330 = vmatpush3.bf16.msra.mxu0 %v289_v20 }
  0xfb   :  { %v291_v26 = vpack.c.bf16 %v5298_v25, %v5297_v23  ;;  %v244_v27 = vpop.f32.mrb[7].mxu0  ;;  %5331 = vmatprep.subr.bf16.mxu0 %v6233_v14  ;;  %v5317_v40 = vpop.f32.mrb[4].mxu1 }
  0xfc   :  { %v290_v29 = vpack.c.bf16 %v244_v27, %v241_v24  ;;  %v362_v42 = vpop.f32.mrb[5].mxu1 }
  0xfd   :  { %v5318_v43 = vpop.f32.mrb[6].mxu1 }
  0xfe   :  { %5332 = vmatpush3.bf16.msra.mxu0 %v290_v29  ;;  %v6422_v44 = vpack.c.bf16 %v5318_v43, %v5317_v40  ;;  %v365_v45 = vpop.f32.mrb[7].mxu1 }
  0xff   :  { %5333 = vmatprep.subr.bf16.mxu0 %v6233_v14  ;;  %v6425_v47 = vpack.c.bf16 %v365_v45, %v362_v42 }
 0x100   :  { %v5301_v35 = vpop.f32.mrb[8].mxu0 }
 0x101   :  { %v257_v36 = vpop.f32.mrb[9].mxu0 }
 0x102   :  { %v5302_v37 = vpop.f32.mrb[10].mxu0  ;;  %5334 = vmatpush3.bf16.msra.mxu0 %v291_v26 }
 0x103   :  { %v293_v38 = vpack.c.bf16 %v5302_v37, %v5301_v35  ;;  %v260_v39 = vpop.f32.mrb[11].mxu0  ;;  %5335 = vmatprep.subr.bf16.mxu0 %v6233_v14  ;;  %v5321_v54 = vpop.f32.mrb[8].mxu1  ;;  %v548_v35 = vstv %s547_s29  ;;  %s972_s29 = scvt.s32.f32 %s971_s28 }
 0x104   :  { %v292_v41 = vpack.c.bf16 %v260_v39, %v257_v36  ;;  %v378_v57 = vpop.f32.mrb[9].mxu1  ;;  %v552_v36 = vmul.f32 0.0, %v551_v30 }
 0x105   :  { %v5322_v58 = vpop.f32.mrb[10].mxu1  ;;  %s975_s30 = ssub.f32 1.0, %s972_s29 }
 0x106   :  { %5336 = vmatpush3.bf16.msra.mxu0 %v292_v41  ;;  %v6431_v59 = vpack.c.bf16 %v5322_v58, %v5321_v54  ;;  %v381_v60 = vpop.f32.mrb[11].mxu1  ;;  %v6470_v41 = vshrl.u32 %v66_v46, 7 }
 0x107   :  { %5337 = vmatprep.subr.bf16.mxu0 %v6233_v14  ;;  %v6435_v61 = vpack.c.bf16 %v381_v60, %v378_v57 }
 0x108   :  { %v5305_v48 = vpop.f32.mrb[12].mxu0  ;;  %v561_v42 = vsub.s32 0, %v6470_v41  ;;  %vm556_vm4 = vcmp.eq.s32.totalorder %v6470_v41, 0  ;;  %vm667_vm5 = vcmp.eq.s32.totalorder %v6470_v41, 1  ;;  %vm774_vm6 = vcmp.eq.s32.totalorder %v6470_v41, 2 }
 0x109   :  { %v273_v49 = vpop.f32.mrb[13].mxu0  ;;  %vm880_vm7 = vcmp.eq.s32.totalorder %v6470_v41, 3  ;;  %vm988_vm8 = vcmp.eq.s32.totalorder %v6470_v41, 4  ;;  %vm1094_vm9 = vcmp.eq.s32.totalorder %v6470_v41, 5  ;;  %vm1202_vm10 = vcmp.eq.s32.totalorder %v6470_v41, 6 }
 0x10a   :  { %v5306_v50 = vpop.f32.mrb[14].mxu0  ;;  %5338 = vmatpush3.bf16.msra.mxu0 %v293_v38  ;;  %v6473_v45 = vrot.slane %v90_v9, %v561_v42  ;;  %vm1308_vm13 = vcmp.eq.s32.totalorder %v6470_v41, 7 }
 0x10b   :  { %v295_v51 = vpack.c.bf16 %v5306_v50, %v5305_v48  ;;  %v276_v52 = vpop.f32.mrb[15].mxu0  ;;  %5339 = vmatprep.subr.bf16.mxu0 %v6233_v14  ;;  %v5325_v62 = vpop.f32.mrb[12].mxu1 }
 0x10c   :  { %v294_v55 = vpack.c.bf16 %v276_v52, %v273_v49  ;;  %v394_v63 = vpop.f32.mrb[13].mxu1 }
 0x10d   :  { %v5326_v1 = vpop.f32.mrb[14].mxu1 }
 0x10e   :  { %5340 = vmatpush3.bf16.msra.mxu0 %v294_v55  ;;  %v6439_v2 = vpack.c.bf16 %v5326_v1, %v5325_v62  ;;  %v397_v3 = vpop.f32.mrb[15].mxu1 }
 0x10f   :  { %5341 = vmatprep.subr.bf16.mxu0 %v6233_v14  ;;  %v6444_v4 = vpack.c.bf16 %v397_v3, %v394_v63  ;;  %v655_v3 = vstv %s654_s20 }
 0x112   :  { %5342 = vmatpush3.bf16.msra.mxu0 %v295_v51 }
 0x113   :  { %5355 = vmatprep.subr.bf16.mxu0 %v6233_v14  ;;  %v513_v5 = vpop.f32.mrb[16].mxu1 }
 0x114   :  { %v5353_v6 = vpop.f32.mrb[17].mxu1 }
 0x115   :  { %5344 = vmatmul.mubr.msk.bf16.vlgmr.msra.gmra.mrb[16].mxu0 %vm4927_vm3, %v6235_v0  ;;  %v516_v7 = vpop.f32.mrb[18].mxu1  ;;  %vm1792_vm3 = vcmask 1040384  }
 0x116   :  { %5356 = vmatpush3.bf16.msra.mxu0 %v6393_v15  ;;  %5359 = vmatprep.mubr.msk.bf16.mxu0 %vm6234_vm1, %v6233_v14  ;;  %v5354_v8 = vpop.f32.mrb[19].mxu1 }
 0x117   :  { %5357 = vmatprep.subr.bf16.mxu0 %v6233_v14  ;;  %v652_v8 = vstv %s651_s0  ;;  %s1078_s0 = scvt.s32.f32 %s1077_s18 }
 0x119   :  { %s1081_s20 = ssub.f32 1.0, %s1078_s0 }
 0x11a   :  { %5358 = vmatpush3.bf16.msra.mxu0 %v6400_v16 }
 0x11b   :  { %5371 = vmatprep.subr.bf16.mxu0 %v6233_v14 }
 0x1e8   :  { %v6452_v10 = vpop.f32.mrb[16].mxu0 }
 0x1e9   :  { %v519_v11 = vadd.f32 %v513_v5, %v6452_v10  ;;  %v5345_v12 = vpop.f32.mrb[17].mxu0 }
 0x1ea   :  { %v461_v13 = vpop.f32.mrb[18].mxu0 }
 0x1eb   :  { %v520_v17 = vadd.f32 %v519_v11, %v90_v9  ;;  %v5346_v18 = vpop.f32.mrb[19].mxu0 }
 0x1ed   :  { %5940 = vtanh.f32 %v520_v17  ;;  %v4931_v20 = vmul.f32 -1.442695, %v520_v17 }
 0x1ef   :  { %5942 = vpow2.f32 %v4931_v20 }
 0x1f7   :  { %v5941_v19 = vpop.eup %5940 }
 0x1f8   :  { %530 = vrot.lane.b32.xlu0 %v5941_v19, %s6236_s25 }
 0x1f9   :  { %v5943_v21 = vpop.eup %5942 }
 0x1fa   :  { %v524_v22 = vadd.f32 1.0, %v5943_v21  ;;  %v672_v21 = vsub.s32 1, %v6470_v41 }
 0x1fc   :  { %5944 = vrcp.f32 %v524_v22 }
 0x206   :  { %v5945_v23 = vpop.eup %5944 }
 0x207   :  { %v528_v26 = vmul.f32 0.0, %v5945_v23 }
 0x26a   :  { %v531_v24 = vpop.permute.xlu0 %530 }
 0x26b   :  { %v533_v25 = vmul.f32 %v5945_v23, %v531_v24 }
 0x26d   :  { %535 = vrot.lane.b32.xlu1 %v533_v25, %s6237_s5 }
 0x2df   :  { %v536_v27 = vpop.permute.xlu1 %535 }
 0x2e0   :  { %v538_v28 = vadd.f32 %v536_v27, %v528_v26 }
 0x2e2   :  { %5946 = vtanh.f32 %v538_v28  ;;  %v554_v63 = vmul.f32 %v548_v35, %v538_v28 }
 0x2e4   :  { %v555_v1 = vadd.f32 %v554_v63, %v552_v36 }
 0x2e6   :  { %v630_v5 = vrot.slane %v555_v1, 7  ;;  %v662_v6 = vmul.f32 %v655_v3, %v555_v1 }
 0x2e8   :  { %v664_v12 = vrot.slane %v662_v6, 7 }
 0x2ec   :  { %v5947_v29 = vpop.eup %5946 }
 0x2ed   :  { %541 = vrot.lane.b32.xlu1 %v5947_v29, %s6236_s25 }
 0x35f   :  { %v542_v31 = vpop.permute.xlu1 %541 }
 0x360   :  { %v544_v33 = vmul.f32 %v5945_v23, %v542_v31 }
 0x362   :  { %v549_v37 = vmul.f32 %v548_v35, %v544_v33 }
 0x364   :  { %v553_v38 = vadd.f32 %v552_v36, %v549_v37  ;;  %v562_v23 = vrot.slane %v549_v37, %v561_v42 }
 0x366   :  { %v564_v39 = vpack.c.bf16 %v553_v38, %v553_v38  ;;  %v656_v19 = vmul.f32 %v655_v3, %v553_v38  ;;  %v563_v28 = vsel %vm556_vm4, %v562_v23, 0.0 }
 0x368   :  { %566 = vrot.lane.b32.xlu0 %v564_v39, %s6237_s5  ;;  %v658_v24 = vrot.slane %v656_v19, 7 }
 0x3da   :  { %v567_v40 = vpop.permute.xlu0 %566 }
 0x3db   :  { %5360 = vmatmul.mubr.msk.bf16.vlgmr.msra.gmra.mrb[20].mxu0 %vm166_vm0, %v567_v40 }
 0x3dc   :  { %5372 = vmatpush3.bf16.msra.mxu0 %v6393_v15  ;;  %5375 = vmatprep.mubr.msk.bf16.mxu0 %vm6234_vm1, %v6233_v14 }
 0x3dd   :  { %5373 = vmatprep.subr.bf16.mxu0 %v6233_v14 }
 0x3e0   :  { %5374 = vmatpush3.bf16.msra.mxu0 %v6400_v16 }
 0x3e1   :  { %5387 = vmatprep.subr.bf16.mxu0 %v6233_v14 }
 0x4ae   :  { %v605_v43 = vpop.f32.mrb[20].mxu0 }
 0x4af   :  { %v612_v48 = vrot.slane %v605_v43, 7  ;;  %v5361_v49 = vpop.f32.mrb[21].mxu0 }
 0x4b0   :  { %v608_v50 = vpop.f32.mrb[22].mxu0 }
 0x4b1   :  { %v614_v51 = vadd.f32 %v612_v48, %v6452_v10  ;;  %v5362_v52 = vpop.f32.mrb[23].mxu0 }
 0x4b3   :  { %v621_v54 = vadd.f32 %v6473_v45, %v614_v51 }
 0x4b5   :  { %5948 = vtanh.f32 %v621_v54  ;;  %v4933_v56 = vmul.f32 -1.442695, %v621_v54 }
 0x4b7   :  { %5950 = vpow2.f32 %v4933_v56 }
 0x4bf   :  { %v5949_v55 = vpop.eup %5948 }
 0x4c0   :  { %634 = vrot.lane.b32.xlu1 %v5949_v55, %s6236_s25  ;;  %v762_v55 = vstv %s761_s19 }
 0x4c1   :  { %v5951_v46 = vpop.eup %5950 }
 0x4c2   :  { %v625_v57 = vadd.f32 1.0, %v5951_v46 }
 0x4c4   :  { %5952 = vrcp.f32 %v625_v57 }
 0x4ce   :  { %v5953_v58 = vpop.eup %5952 }
 0x4cf   :  { %v632_v7 = vmul.f32 %v5953_v58, %v630_v5 }
 0x532   :  { %v635_v60 = vpop.permute.xlu1 %634 }
 0x533   :  { %v637_v62 = vmul.f32 %v5953_v58, %v635_v60 }
 0x535   :  { %639 = vrot.lane.b32.xlu0 %v637_v62, %s6237_s5 }
 0x5a7   :  { %v640_v9 = vpop.permute.xlu0 %639 }
 0x5a8   :  { %v642_v11 = vadd.f32 %v640_v9, %v632_v7 }
 0x5aa   :  { %5954 = vtanh.f32 %v642_v11  ;;  %v661_v13 = vmul.f32 %v652_v8, %v642_v11 }
 0x5ac   :  { %v666_v17 = vadd.f32 %v664_v12, %v661_v13 }
 0x5ae   :  { %v737_v56 = vrot.slane %v666_v17, 7  ;;  %v769_v46 = vmul.f32 %v762_v55, %v666_v17 }
 0x5b0   :  { %v771_v63 = vrot.slane %v769_v46, 7  ;;  %v885_v46 = vsub.s32 3, %v6470_v41 }
 0x5b4   :  { %v5955_v18 = vpop.eup %5954 }
 0x5b5   :  { %645 = vrot.lane.b32.xlu1 %v5955_v18, %s6236_s25 }
 0x627   :  { %v646_v20 = vpop.permute.xlu1 %645 }
 0x628   :  { %v648_v22 = vmul.f32 %v5953_v58, %v646_v20  ;;  %v759_v58 = vstv %s758_s11  ;;  %s1186_s11 = scvt.s32.f32 %s1185_s22 }
 0x62a   :  { %v653_v25 = vmul.f32 %v652_v8, %v648_v22  ;;  %v779_v8 = vsub.s32 2, %v6470_v41  ;;  %s1189_s19 = ssub.f32 1.0, %s1186_s11 }
 0x62c   :  { %v660_v26 = vadd.f32 %v658_v24, %v653_v25  ;;  %v673_v27 = vrot.slane %v653_v25, %v672_v21 }
 0x62e   :  { %v674_v29 = vsel %vm667_vm5, %v673_v27, %v563_v28  ;;  %v675_v30 = vpack.c.bf16 %v660_v26, %v660_v26  ;;  %v763_v6 = vmul.f32 %v762_v55, %v660_v26 }
 0x630   :  { %v677_v31 = vshrl.u32 %v675_v30, 16  ;;  %v765_v11 = vrot.slane %v763_v6, 7 }
 0x632   :  { %679 = vrot.lane.b32.xlu0 %v677_v31, %s6237_s5 }
 0x6a4   :  { %v680_v33 = vpop.permute.xlu0 %679 }
 0x6a5   :  { %5368 = vmatmul.mubr.msk.bf16.vlgmr.msra.gmra.mrb[20].mxu1 %vm166_vm0, %v680_v33 }
 0x6a6   :  { %5380 = vmatpush3.bf16.msra.mxu1 %v6393_v15  ;;  %5383 = vmatprep.mubr.msk.bf16.mxu1 %vm6234_vm1, %v6233_v14 }
 0x6a7   :  { %5381 = vmatprep.subr.bf16.mxu1 %v6233_v14 }
 0x6aa   :  { %5382 = vmatpush3.bf16.msra.mxu1 %v6400_v16 }
 0x6ab   :  { %5395 = vmatprep.subr.bf16.mxu1 %v6233_v14 }
 0x778   :  { %v718_v35 = vpop.f32.mrb[20].mxu1 }
 0x779   :  { %v725_v36 = vrot.slane %v718_v35, 6  ;;  %v5369_v37 = vpop.f32.mrb[21].mxu1 }
 0x77a   :  { %v721_v38 = vpop.f32.mrb[22].mxu1 }
 0x77b   :  { %v727_v39 = vadd.f32 %v725_v36, %v6452_v10  ;;  %v5370_v40 = vpop.f32.mrb[23].mxu1  ;;  %v868_v38 = vstv %s867_s3 }
 0x77d   :  { %v728_v42 = vadd.f32 %v727_v39, %v6473_v45 }
 0x77f   :  { %5956 = vtanh.f32 %v728_v42  ;;  %v4935_v48 = vmul.f32 -1.442695, %v728_v42 }
 0x781   :  { %5958 = vpow2.f32 %v4935_v48 }
 0x789   :  { %v5957_v43 = vpop.eup %5956 }
 0x78a   :  { %741 = vrot.lane.b32.xlu1 %v5957_v43, %s6236_s25  ;;  %v865_v43 = vstv %s864_s4  ;;  %s1292_s4 = scvt.s32.f32 %s1291_s24 }
 0x78b   :  { %v5959_v49 = vpop.eup %5958 }
 0x78c   :  { %v732_v50 = vadd.f32 1.0, %v5959_v49  ;;  %s1295_s3 = ssub.f32 1.0, %s1292_s4 }
 0x78e   :  { %5960 = vrcp.f32 %v732_v50 }
 0x798   :  { %v5961_v51 = vpop.eup %5960 }
 0x799   :  { %v739_v57 = vmul.f32 %v5961_v51, %v737_v56 }
 0x7fc   :  { %v742_v52 = vpop.permute.xlu1 %741 }
 0x7fd   :  { %v744_v54 = vmul.f32 %v5961_v51, %v742_v52 }
 0x7ff   :  { %746 = vrot.lane.b32.xlu0 %v744_v54, %s6237_s5 }
 0x871   :  { %v747_v60 = vpop.permute.xlu0 %746 }
 0x872   :  { %v749_v62 = vadd.f32 %v747_v60, %v739_v57 }
 0x874   :  { %5962 = vtanh.f32 %v749_v62  ;;  %v768_v1 = vmul.f32 %v759_v58, %v749_v62 }
 0x876   :  { %v773_v3 = vadd.f32 %v771_v63, %v768_v1 }
 0x878   :  { %v843_v39 = vrot.slane %v773_v3, 7  ;;  %v875_v40 = vmul.f32 %v868_v38, %v773_v3 }
 0x87a   :  { %v877_v50 = vrot.slane %v875_v40, 7 }
 0x87e   :  { %v5963_v5 = vpop.eup %5962 }
 0x87f   :  { %752 = vrot.lane.b32.xlu1 %v5963_v5, %s6236_s25 }
 0x8f1   :  { %v753_v7 = vpop.permute.xlu1 %752 }
 0x8f2   :  { %v755_v9 = vmul.f32 %v5961_v51, %v753_v7 }
 0x8f4   :  { %v760_v12 = vmul.f32 %v759_v58, %v755_v9 }
 0x8f6   :  { %v767_v13 = vadd.f32 %v765_v11, %v760_v12  ;;  %v780_v17 = vrot.slane %v760_v12, %v779_v8 }
 0x8f8   :  { %v781_v18 = vsel %vm774_vm6, %v780_v17, %v674_v29  ;;  %v782_v19 = vpack.c.bf16 %v767_v13, %v767_v13  ;;  %v869_v55 = vmul.f32 %v868_v38, %v767_v13 }
 0x8fa   :  { %v784_v20 = vrot.slane %v782_v19, 1  ;;  %v871_v58 = vrot.slane %v869_v55, 7 }
 0x8fc   :  { %785 = vrot.lane.b32.xlu0 %v784_v20, %s6237_s5 }
 0x96e   :  { %v786_v21 = vpop.permute.xlu0 %785 }
 0x96f   :  { %5376 = vmatmul.mubr.msk.bf16.vlgmr.msra.gmra.mrb[24].mxu0 %vm166_vm0, %v786_v21 }
 0x970   :  { %5388 = vmatpush3.bf16.msra.mxu0 %v6393_v15  ;;  %5391 = vmatprep.mubr.msk.bf16.mxu0 %vm6234_vm1, %v6233_v14 }
 0x971   :  { %5389 = vmatprep.subr.bf16.mxu0 %v6233_v14 }
 0x974   :  { %5390 = vmatpush3.bf16.msra.mxu0 %v6400_v16 }
 0x975   :  { %5403 = vmatprep.subr.bf16.mxu0 %v6233_v14 }
 0xa42   :  { %v824_v22 = vpop.f32.mrb[24].mxu0 }
 0xa43   :  { %v831_v23 = vrot.slane %v824_v22, 5  ;;  %v5377_v24 = vpop.f32.mrb[25].mxu0 }
 0xa44   :  { %v827_v25 = vpop.f32.mrb[26].mxu0 }
 0xa45   :  { %v833_v26 = vadd.f32 %v831_v23, %v6452_v10  ;;  %v5378_v27 = vpop.f32.mrb[27].mxu0 }
 0xa47   :  { %v834_v28 = vadd.f32 %v833_v26, %v6473_v45  ;;  %v976_v26 = vstv %s975_s30 }
 0xa49   :  { %5964 = vtanh.f32 %v834_v28  ;;  %v4937_v30 = vmul.f32 -1.442695, %v834_v28 }
 0xa4b   :  { %5966 = vpow2.f32 %v4937_v30  ;;  %v973_v30 = vstv %s972_s29 }
 0xa53   :  { %v5965_v29 = vpop.eup %5964 }
 0xa54   :  { %847 = vrot.lane.b32.xlu1 %v5965_v29, %s6236_s25 }
 0xa55   :  { %v5967_v31 = vpop.eup %5966 }
 0xa56   :  { %v838_v33 = vadd.f32 1.0, %v5967_v31 }
 0xa58   :  { %5968 = vrcp.f32 %v838_v33 }
 0xa62   :  { %v5969_v35 = vpop.eup %5968 }
 0xa63   :  { %v845_v42 = vmul.f32 %v5969_v35, %v843_v39 }
 0xac6   :  { %v848_v36 = vpop.permute.xlu1 %847 }
 0xac7   :  { %v850_v37 = vmul.f32 %v5969_v35, %v848_v36 }
 0xac9   :  { %852 = vrot.lane.b32.xlu0 %v850_v37, %s6237_s5 }
 0xb3b   :  { %v853_v48 = vpop.permute.xlu0 %852 }
 0xb3c   :  { %v855_v49 = vadd.f32 %v853_v48, %v845_v42  ;;  %v993_v42 = vsub.s32 4, %v6470_v41 }
 0xb3e   :  { %5970 = vtanh.f32 %v855_v49  ;;  %v874_v51 = vmul.f32 %v865_v43, %v855_v49 }
 0xb40   :  { %v879_v52 = vadd.f32 %v877_v50, %v874_v51 }
 0xb42   :  { %v951_v27 = vrot.slane %v879_v52, 7  ;;  %v983_v28 = vmul.f32 %v976_v26, %v879_v52 }
 0xb48   :  { %v5971_v54 = vpop.eup %5970 }
 0xb49   :  { %858 = vrot.lane.b32.xlu1 %v5971_v54, %s6236_s25 }
 0xbbb   :  { %v859_v56 = vpop.permute.xlu1 %858 }
 0xbbc   :  { %v861_v57 = vmul.f32 %v5969_v35, %v859_v56  ;;  %v985_v35 = vrot.slane %v983_v28, 7 }
 0xbbe   :  { %v866_v60 = vmul.f32 %v865_v43, %v861_v57 }
 0xbc0   :  { %v873_v62 = vadd.f32 %v871_v58, %v866_v60  ;;  %v886_v63 = vrot.slane %v866_v60, %v885_v46 }
 0xbc2   :  { %v887_v1 = vsel %vm880_vm7, %v886_v63, %v781_v18  ;;  %v888_v3 = vpack.c.bf16 %v873_v62, %v873_v62  ;;  %v977_v39 = vmul.f32 %v976_v26, %v873_v62  ;;  %v1099_v26 = vsub.s32 5, %v6470_v41 }
 0xbc4   :  { %v890_v5 = vshrl.u32 %v888_v3, 16  ;;  %v979_v48 = vrot.slane %v977_v39, 7 }
 0xbc6   :  { %v892_v6 = vrot.slane %v890_v5, 1 }
 0xbc8   :  { %893 = vrot.lane.b32.xlu0 %v892_v6, %s6237_s5 }
 0xc3a   :  { %v894_v7 = vpop.permute.xlu0 %893 }
 0xc3b   :  { %5384 = vmatmul.mubr.msk.bf16.vlgmr.msra.gmra.mrb[24].mxu1 %vm166_vm0, %v894_v7 }
 0xc3c   :  { %5396 = vmatpush3.bf16.msra.mxu1 %v6393_v15  ;;  %5399 = vmatprep.mubr.msk.bf16.mxu1 %vm6234_vm1, %v6233_v14 }
 0xc3d   :  { %5397 = vmatprep.subr.bf16.mxu1 %v6233_v14 }
 0xc40   :  { %5398 = vmatpush3.bf16.msra.mxu1 %v6400_v16 }
 0xc41   :  { %5411 = vmatprep.subr.bf16.mxu1 %v6233_v14 }
 0xd0e   :  { %v932_v8 = vpop.f32.mrb[24].mxu1 }
 0xd0f   :  { %v939_v9 = vrot.slane %v932_v8, 4  ;;  %v5385_v11 = vpop.f32.mrb[25].mxu1 }
 0xd10   :  { %v935_v12 = vpop.f32.mrb[26].mxu1 }
 0xd11   :  { %v941_v13 = vadd.f32 %v939_v9, %v6452_v10  ;;  %v5386_v17 = vpop.f32.mrb[27].mxu1  ;;  %v1082_v9 = vstv %s1081_s20 }
 0xd12   :  { %v1079_v17 = vstv %s1078_s0 }
 0xd13   :  { %v942_v18 = vadd.f32 %v941_v13, %v6473_v45 }
 0xd15   :  { %5972 = vtanh.f32 %v942_v18  ;;  %v4939_v20 = vmul.f32 -1.442695, %v942_v18 }
 0xd17   :  { %5974 = vpow2.f32 %v4939_v20 }
 0xd1f   :  { %v5973_v19 = vpop.eup %5972 }
 0xd20   :  { %955 = vrot.lane.b32.xlu1 %v5973_v19, %s6236_s25 }
 0xd21   :  { %v5975_v21 = vpop.eup %5974 }
 0xd22   :  { %v946_v22 = vadd.f32 1.0, %v5975_v21 }
 0xd24   :  { %5976 = vrcp.f32 %v946_v22 }
 0xd2e   :  { %v5977_v23 = vpop.eup %5976 }
 0xd2f   :  { %v953_v29 = vmul.f32 %v5977_v23, %v951_v27 }
 0xd92   :  { %v956_v24 = vpop.permute.xlu1 %955 }
 0xd93   :  { %v958_v25 = vmul.f32 %v5977_v23, %v956_v24 }
 0xd95   :  { %960 = vrot.lane.b32.xlu0 %v958_v25, %s6237_s5 }
 0xe07   :  { %v961_v31 = vpop.permute.xlu0 %960 }
 0xe08   :  { %v963_v33 = vadd.f32 %v961_v31, %v953_v29 }
 0xe0a   :  { %5978 = vtanh.f32 %v963_v33  ;;  %v982_v36 = vmul.f32 %v973_v30, %v963_v33 }
 0xe0c   :  { %v987_v37 = vadd.f32 %v985_v35, %v982_v36 }
 0xe0e   :  { %v1057_v11 = vrot.slane %v987_v37, 7  ;;  %v1089_v12 = vmul.f32 %v1082_v9, %v987_v37 }
 0xe10   :  { %v1091_v20 = vrot.slane %v1089_v12, 7 }
 0xe14   :  { %v5979_v38 = vpop.eup %5978 }
 0xe15   :  { %966 = vrot.lane.b32.xlu1 %v5979_v38, %s6236_s25 }
 0xe87   :  { %v967_v40 = vpop.permute.xlu1 %966 }
 0xe88   :  { %v969_v43 = vmul.f32 %v5977_v23, %v967_v40 }
 0xe8a   :  { %v974_v49 = vmul.f32 %v973_v30, %v969_v43 }
 0xe8c   :  { %v981_v50 = vadd.f32 %v979_v48, %v974_v49  ;;  %v994_v51 = vrot.slane %v974_v49, %v993_v42 }
 0xe8e   :  { %v996_v52 = vpack.c.bf16 %v981_v50, %v981_v50  ;;  %v995_v54 = vsel %vm988_vm8, %v994_v51, %v887_v1  ;;  %v1083_v24 = vmul.f32 %v1082_v9, %v981_v50 }
 0xe90   :  { %v998_v55 = vrot.slane %v996_v52, 2  ;;  %v1085_v28 = vrot.slane %v1083_v24, 7 }
 0xe92   :  { %999 = vrot.lane.b32.xlu0 %v998_v55, %s6237_s5 }
 0xf04   :  { %v1000_v56 = vpop.permute.xlu0 %999 }
 0xf05   :  { %5392 = vmatmul.mubr.msk.bf16.vlgmr.msra.gmra.mrb[28].mxu0 %vm166_vm0, %v1000_v56 }
 0xf06   :  { %5404 = vmatpush3.bf16.msra.mxu0 %v6393_v15  ;;  %5407 = vmatprep.mubr.msk.bf16.mxu0 %vm6234_vm1, %v6233_v14 }
 0xf07   :  { %5405 = vmatprep.subr.bf16.mxu0 %v6233_v14 }
 0xf0a   :  { %5406 = vmatpush3.bf16.msra.mxu0 %v6400_v16 }
 0xf0b   :  { %5419 = vmatprep.subr.bf16.mxu0 %v6233_v14 }
 0xfd8   :  { %v1038_v46 = vpop.f32.mrb[28].mxu0 }
 0xfd9   :  { %v1045_v57 = vrot.slane %v1038_v46, 3  ;;  %v5393_v58 = vpop.f32.mrb[29].mxu0 }
 0xfda   :  { %v1041_v60 = vpop.f32.mrb[30].mxu0  ;;  %v1190_v58 = vstv %s1189_s19 }
 0xfdb   :  { %v1047_v62 = vadd.f32 %v1045_v57, %v6452_v10  ;;  %v5394_v63 = vpop.f32.mrb[31].mxu0 }
 0xfdd   :  { %v1048_v1 = vadd.f32 %v1047_v62, %v6473_v45 }
 0xfdf   :  { %5980 = vtanh.f32 %v1048_v1  ;;  %v4941_v3 = vmul.f32 -1.442695, %v1048_v1  ;;  %v1187_v1 = vstv %s1186_s11 }
 0xfe1   :  { %5982 = vpow2.f32 %v4941_v3 }
 0xfe9   :  { %v5981_v15 = vpop.eup %5980 }
 0xfea   :  { %1061 = vrot.lane.b32.xlu1 %v5981_v15, %s6236_s25 }
 0xfeb   :  { %v5983_v5 = vpop.eup %5982 }
 0xfec   :  { %v1052_v6 = vadd.f32 1.0, %v5983_v5 }
 0xfee   :  { %5984 = vrcp.f32 %v1052_v6 }
 0xff8   :  { %v5985_v16 = vpop.eup %5984 }
 0xff9   :  { %v1059_v13 = vmul.f32 %v5985_v16, %v1057_v11  ;;  %v1207_v11 = vsub.s32 6, %v6470_v41 }
0x105c   :  { %v1062_v7 = vpop.permute.xlu1 %1061 }
0x105d   :  { %v1064_v8 = vmul.f32 %v5985_v16, %v1062_v7 }
0x105f   :  { %1066 = vrot.lane.b32.xlu0 %v1064_v8, %s6237_s5 }
0x10d1   :  { %v1067_v18 = vpop.permute.xlu0 %1066 }
0x10d2   :  { %v1069_v19 = vadd.f32 %v1067_v18, %v1059_v13 }
0x10d4   :  { %5986 = vtanh.f32 %v1069_v19  ;;  %v1088_v21 = vmul.f32 %v1079_v17, %v1069_v19 }
0x10d6   :  { %v1093_v22 = vadd.f32 %v1091_v20, %v1088_v21 }
0x10d8   :  { %v1165_v60 = vrot.slane %v1093_v22, 7  ;;  %v1197_v62 = vmul.f32 %v1190_v58, %v1093_v22 }
0x10da   :  { %v1199_v5 = vrot.slane %v1197_v62, 7 }
0x10de   :  { %v5987_v23 = vpop.eup %5986 }
0x10df   :  { %1072 = vrot.lane.b32.xlu1 %v5987_v23, %s6236_s25 }
0x1151   :  { %v1073_v25 = vpop.permute.xlu1 %1072 }
0x1152   :  { %v1075_v27 = vmul.f32 %v5985_v16, %v1073_v25 }
0x1154   :  { %v1080_v29 = vmul.f32 %v1079_v17, %v1075_v27 }
0x1156   :  { %v1087_v30 = vadd.f32 %v1085_v28, %v1080_v29  ;;  %v1100_v31 = vrot.slane %v1080_v29, %v1099_v26 }
0x1158   :  { %v1102_v33 = vpack.c.bf16 %v1087_v30, %v1087_v30  ;;  %v1101_v35 = vsel %vm1094_vm9, %v1100_v31, %v995_v54  ;;  %v1191_v8 = vmul.f32 %v1190_v58, %v1087_v30  ;;  %v1313_v58 = vsub.s32 7, %v6470_v41  ;;  %v6642_v41 = vld [vmem:[%s7504_s8] sm:$0x1] }
0x115a   :  { %v1104_v36 = vshrl.u32 %v1102_v33, 16  ;;  %v1193_v13 = vrot.slane %v1191_v8, 7 }
0x115c   :  { %v1106_v37 = vrot.slane %v1104_v36, 2 }
0x115e   :  { %1107 = vrot.lane.b32.xlu0 %v1106_v37, %s6237_s5 }
0x11d0   :  { %v1108_v38 = vpop.permute.xlu0 %1107 }
0x11d1   :  { %5400 = vmatmul.mubr.msk.bf16.vlgmr.msra.gmra.mrb[28].mxu1 %vm166_vm0, %v1108_v38 }
0x11d2   :  { %5415 = vmatprep.mubr.msk.bf16.mxu1 %vm6234_vm1, %v6233_v14 }
0x12a4   :  { %v1146_v39 = vpop.f32.mrb[28].mxu1 }
0x12a5   :  { %v1153_v40 = vrot.slane %v1146_v39, 2  ;;  %v5401_v42 = vpop.f32.mrb[29].mxu1 }
0x12a6   :  { %v1149_v43 = vpop.f32.mrb[30].mxu1 }
0x12a7   :  { %v1155_v48 = vadd.f32 %v1153_v40, %v6452_v10  ;;  %v5402_v49 = vpop.f32.mrb[31].mxu1  ;;  %v1293_v43 = vstv %s1292_s4 }
0x12a9   :  { %v1156_v50 = vadd.f32 %v1155_v48, %v6473_v45 }
0x12ab   :  { %5988 = vtanh.f32 %v1156_v50  ;;  %v4943_v52 = vmul.f32 -1.442695, %v1156_v50 }
0x12ad   :  { %5990 = vpow2.f32 %v4943_v52 }
0x12b5   :  { %v5989_v51 = vpop.eup %5988 }
0x12b6   :  { %1169 = vrot.lane.b32.xlu1 %v5989_v51, %s6236_s25 }
0x12b7   :  { %v5991_v54 = vpop.eup %5990 }
0x12b8   :  { %v1160_v55 = vadd.f32 1.0, %v5991_v54 }
0x12ba   :  { %5992 = vrcp.f32 %v1160_v55  ;;  %v6608_v55 = vld [vmem:[%s7503_s7] sm:$0xff]  }
0x12bb   :  { %5412 = vmatpush3.bf16.msra.mxu1 %v6608_v55 }
0x12bc   :  { %5413 = vmatprep.subr.bf16.mxu1 %v6233_v14 }
0x12c4   :  { %v5993_v56 = vpop.eup %5992 }
0x12c5   :  { %v1167_v63 = vmul.f32 %v5993_v56, %v1165_v60 }
0x1328   :  { %v1170_v46 = vpop.permute.xlu1 %1169 }
0x1329   :  { %v1172_v57 = vmul.f32 %v5993_v56, %v1170_v46 }
0x132b   :  { %1174 = vrot.lane.b32.xlu0 %v1172_v57, %s6237_s5 }
0x139d   :  { %v1175_v15 = vpop.permute.xlu0 %1174 }
0x139e   :  { %v1177_v3 = vadd.f32 %v1175_v15, %v1167_v63 }
0x13a0   :  { %5994 = vtanh.f32 %v1177_v3  ;;  %v1196_v6 = vmul.f32 %v1187_v1, %v1177_v3 }
0x13a2   :  { %v1201_v16 = vadd.f32 %v1199_v5, %v1196_v6 }
0x13aa   :  { %v5995_v7 = vpop.eup %5994 }
0x13ab   :  { %1180 = vrot.lane.b32.xlu1 %v5995_v7, %s6236_s25 }
0x141d   :  { %v1181_v9 = vpop.permute.xlu1 %1180 }
0x141e   :  { %v1183_v12 = vmul.f32 %v5993_v56, %v1181_v9  ;;  %v6619_v56 = vld [vmem:[%s7503_s7 + $0x8] sm:$0xff]  }
0x141f   :  { %5414 = vmatpush3.bf16.msra.mxu1 %v6619_v56 }
0x1420   :  { %v1188_v17 = vmul.f32 %v1187_v1, %v1183_v12  ;;  %5439 = vmatprep.subr.mxu1 %v6233_v14 }
0x1422   :  { %v6572_v18 = vadd.f32 %v1193_v13, %v1188_v17  ;;  %v1208_v19 = vrot.slane %v1188_v17, %v1207_v11 }
0x1424   :  { %v1210_v20 = vpack.c.bf16 %v6572_v18, %v6572_v18  ;;  %v6576_v21 = vsel %vm1202_vm10, %v1208_v19, %v1101_v35  ;;  %vm1821_vm10 = vcmp.eq.s32.totalorder %v6429_v53, 0 }
0x1426   :  { %v1212_v22 = vrot.slane %v1210_v20, 3 }
0x1428   :  { %1213 = vrot.lane.b32.xlu0 %v1212_v22, %s6237_s5 }
0x149a   :  { %v1214_v23 = vpop.permute.xlu0 %1213 }
0x149b   :  { %5408 = vmatmul.mubr.msk.bf16.vlgmr.msra.gmra.mrb[32].mxu0 %vm166_vm0, %v1214_v23 }
0x149c   :  { %5420 = vmatpush3.bf16.msra.mxu0 %v6419_v34  ;;  %5435 = vmatprep.mubr.msk.bf16.mxu0 %vm6234_vm1, %v6233_v14 }
0x149d   :  { %5421 = vmatprep.subr.bf16.mxu0 %v6233_v14 }
0x14a0   :  { %5422 = vmatpush3.bf16.msra.mxu0 %v6416_v32 }
0x14a1   :  { %5423 = vmatprep.subr.bf16.mxu0 %v6233_v14 }
0x14a4   :  { %5424 = vmatpush3.bf16.msra.mxu0 %v6425_v47 }
0x14a5   :  { %5425 = vmatprep.subr.bf16.mxu0 %v6233_v14 }
0x14a8   :  { %5426 = vmatpush3.bf16.msra.mxu0 %v6422_v44 }
0x14a9   :  { %5427 = vmatprep.subr.bf16.mxu0 %v6233_v14 }
0x14ac   :  { %5428 = vmatpush3.bf16.msra.mxu0 %v6435_v61 }
0x14ad   :  { %5429 = vmatprep.subr.bf16.mxu0 %v6233_v14 }
0x14b0   :  { %5430 = vmatpush3.bf16.msra.mxu0 %v6431_v59 }
0x14b1   :  { %5431 = vmatprep.subr.bf16.mxu0 %v6233_v14 }
0x14b4   :  { %5432 = vmatpush3.bf16.msra.mxu0 %v6444_v4 }
0x14b5   :  { %5433 = vmatprep.subr.bf16.mxu0 %v6233_v14 }
0x14b8   :  { %5434 = vmatpush3.bf16.msra.mxu0 %v6439_v2 }
0x14b9   :  { %5473 = vmatprep.subr.bf16.mxu0 %v6233_v14 }
0x14bb   :  { %5436 = vmatmul.mubr.msk.bf16.vlgmr.msra.gmra.mrb[36].mxu0 %vm4949_vm12, %v6235_v0 }
0x14bc   :  { %5474 = vmatpush3.bf16.msra.mxu0 %v6608_v55  ;;  %5477 = vmatprep.mubr.msk.bf16.mxu0 %vm6234_vm1, %v6233_v14 }
0x14bd   :  { %5475 = vmatprep.subr.bf16.mxu0 %v6233_v14 }
0x14c0   :  { %5476 = vmatpush3.bf16.msra.mxu0 %v6619_v56 }
0x14c1   :  { %5501 = vmatprep.subr.mxu0 %v6233_v14 }
0x156e   :  { %v1252_v24 = vpop.f32.mrb[32].mxu0 }
0x156f   :  { %v1259_v25 = vrot.slane %v1252_v24, 1  ;;  %v5409_v26 = vpop.f32.mrb[33].mxu0 }
0x1570   :  { %v1255_v27 = vpop.f32.mrb[34].mxu0 }
0x1571   :  { %v1261_v28 = vadd.f32 %v1259_v25, %v6452_v10  ;;  %v5410_v29 = vpop.f32.mrb[35].mxu0  ;;  %v1296_v10 = vstv %s1295_s3 }
0x1572   :  { %v1303_v40 = vmul.f32 %v1296_v10, %v1201_v16  ;;  %v1297_v46 = vmul.f32 %v1296_v10, %v6572_v18  ;;  %v1316_v10 = vstv %s7497_s1 }
0x1573   :  { %v1262_v30 = vadd.f32 %v1261_v28, %v6473_v45  ;;  %v1271_v45 = vrot.slane %v1201_v16, 7  ;;  %vm1317_vm14 = vcmp.lt.s32.totalorder %v6429_v53, %v1316_v10 }
0x1574   :  { %v1305_v50 = vrot.slane %v1303_v40, 7  ;;  %v1299_v63 = vrot.slane %v1297_v46, 7 }
0x1575   :  { %5996 = vtanh.f32 %v1262_v30  ;;  %v4945_v33 = vmul.f32 -1.442695, %v1262_v30 }
0x1577   :  { %5998 = vpow2.f32 %v4945_v33 }
0x157f   :  { %v5997_v31 = vpop.eup %5996 }
0x1580   :  { %1275 = vrot.lane.b32.xlu1 %v5997_v31, %s6236_s25 }
0x1581   :  { %v5999_v35 = vpop.eup %5998 }
0x1582   :  { %v1266_v36 = vadd.f32 1.0, %v5999_v35 }
0x1584   :  { %6000 = vrcp.f32 %v1266_v36 }
0x158e   :  { %v6001_v37 = vpop.eup %6000  ;;  %v1418_v7 = vpop.f32.mrb[36].mxu0 }
0x158f   :  { %v1273_v42 = vmul.f32 %v6001_v37, %v1271_v45  ;;  %v5437_v8 = vpop.f32.mrb[37].mxu0  ;;  %v6238_v45 = vmov -1e+30  }
0x1590   :  { %v1421_v9 = vpop.f32.mrb[38].mxu0  ;;  %v6667_v40 = vsel %vm1317_vm14, 0.0, %v6238_v45  ;;  %v6701_v8 = vld [vmem:[%s7505_s9] sm:$0xff]  }
0x1591   :  { %v5438_v11 = vpop.f32.mrb[39].mxu0 }
0x15f2   :  { %v1276_v38 = vpop.permute.xlu1 %1275 }
0x15f3   :  { %v1278_v39 = vmul.f32 %v6001_v37, %v1276_v38 }
0x15f5   :  { %1280 = vrot.lane.b32.xlu0 %v1278_v39, %s6237_s5 }
0x1667   :  { %v1281_v48 = vpop.permute.xlu0 %1280 }
0x1668   :  { %v1283_v49 = vadd.f32 %v1281_v48, %v1273_v42 }
0x166a   :  { %6002 = vtanh.f32 %v1283_v49  ;;  %v1302_v51 = vmul.f32 %v1293_v43, %v1283_v49 }
0x166c   :  { %v1307_v52 = vadd.f32 %v1305_v50, %v1302_v51 }
0x166e   :  { %v1433_v29 = vrot.slane %v1307_v52, 7 }
0x1674   :  { %v6003_v54 = vpop.eup %6002 }
0x1675   :  { %1286 = vrot.lane.b32.xlu1 %v6003_v54, %s6236_s25 }
0x16e7   :  { %v1287_v57 = vpop.permute.xlu1 %1286 }
0x16e8   :  { %v1289_v60 = vmul.f32 %v6001_v37, %v1287_v57 }
0x16ea   :  { %v1294_v62 = vmul.f32 %v1293_v43, %v1289_v60 }
0x16ec   :  { %v1314_v1 = vrot.slane %v1294_v62, %v1313_v58  ;;  %v1301_v15 = vadd.f32 %v1299_v63, %v1294_v62  ;;  %v6682_v63 = vld [vmem:[%s7506_s10] sm:$0xff]  }
0x16ee   :  { %v1322_v3 = vpack.c.bf16 %v1301_v15, %v1301_v15  ;;  %v1315_v5 = vsel %vm1308_vm13, %v1314_v1, %v6576_v21 }
0x16f0   :  { %v1324_v6 = vshrl.u32 %v1322_v3, 16 }
0x16f2   :  { %v1326_v16 = vrot.slane %v1324_v6, 3 }
0x16f4   :  { %1327 = vrot.lane.b32.xlu0 %v1326_v16, %s6237_s5  ;;  %v6694_v16 = vld [vmem:[%s7506_s10 + $0x8] sm:$0xff]  }
0x1766   :  { %v1328_v12 = vpop.permute.xlu0 %1327 }
0x1767   :  { %5416 = vmatmul.mubr.msk.bf16.vlgmr.msra.gmra.mrb[32].mxu1 %vm166_vm0, %v1328_v12  ;;  %v6708_v12 = vld [vmem:[%s7505_s9 + $0x8] sm:$0xff]  }
0x1768   :  { %5441 = vmatprep.mubr.msk.f32.mxu1 %vm6234_vm1, %v6233_v14 }
0x183a   :  { %v1378_v13 = vpop.f32.mrb[32].mxu1 }
0x183b   :  { %v1419_v17 = vadd.f32 %v1418_v7, %v1378_v13  ;;  %v5417_v18 = vpop.f32.mrb[33].mxu1  ;;  %v6721_v13 = vld [vmem:[%s7508_s12] sm:$0xff]  }
0x183c   :  { %v1381_v19 = vpop.f32.mrb[34].mxu1 }
0x183d   :  { %v1424_v20 = vadd.f32 %v1419_v17, %v6642_v41  ;;  %v5418_v21 = vpop.f32.mrb[35].mxu1  ;;  %v6728_v17 = vld [vmem:[%s7508_s12 + $0x8] sm:$0xff]  }
0x183f   :  { %6004 = vtanh.f32 %v1424_v20  ;;  %v4951_v23 = vmul.f32 -1.442695, %v1424_v20 }
0x1841   :  { %6006 = vpow2.f32 %v4951_v23 }
0x1849   :  { %v6005_v22 = vpop.eup %6004 }
0x184a   :  { %1437 = vrot.lane.b32.xlu1 %v6005_v22, %s6236_s25  ;;  %v6732_v22 = vld [vmem:[#allocation3] sm:$0x1] }
0x184b   :  { %v6007_v24 = vpop.eup %6006 }
0x184c   :  { %v1428_v25 = vadd.f32 1.0, %v6007_v24 }
0x184e   :  { %6008 = vrcp.f32 %v1428_v25 }
0x1858   :  { %v6009_v26 = vpop.eup %6008 }
0x1859   :  { %v1435_v30 = vmul.f32 %v6009_v26, %v1433_v29 }
0x18bc   :  { %v1438_v27 = vpop.permute.xlu1 %1437 }
0x18bd   :  { %v1440_v28 = vmul.f32 %v6009_v26, %v1438_v27 }
0x18bf   :  { %1442 = vrot.lane.b32.xlu0 %v1440_v28, %s6237_s5 }
0x18c3   :  { %1456 = vrot.lane.b32.xlu0 %v1315_v5, %s6237_s5 }
0x1931   :  { %v1443_v31 = vpop.permute.xlu0 %1442 }
0x1932   :  { %v6648_v33 = vadd.f32 %v1443_v31, %v1435_v30  ;;  %v6757_v31 = vld [vmem:[%s7509_s13] sm:$0x1] }
0x1934   :  { %6010 = vtanh.f32 %v6648_v33 }
0x1935   :  { %v6651_v35 = vpop.permute.xlu0 %1456 }
0x1936   :  { %5440 = vmatpush3.xpose.msk.msra.mxu1 %vm166_vm0, %v6651_v35 }
0x1937   :  { %5444 = vmatprep.subr.mxu1 %v6233_v14 }
0x193e   :  { %v6011_v36 = vpop.eup %6010 }
0x193f   :  { %1448 = vrot.lane.b32.xlu1 %v6011_v36, %s6236_s25 }
0x19b1   :  { %v1449_v37 = vpop.permute.xlu1 %1448 }
0x19b2   :  { %v1451_v38 = vmul.f32 %v6009_v26, %v1449_v37 }
0x19b4   :  { %1453 = vrot.lane.b32.xlu1 %v1451_v38, %s6237_s5  ;;  %v1619_v50 = vpack.c.bf16 %v1451_v38, %v1451_v38 }
0x1a26   :  { %v1454_v39 = vpop.permute.xlu1 %1453 }
0x1a27   :  { %5442 = vmatmul.mubr.msk.f32.vlgmr.msra.gmra.mrb[36].mxu1 %vm166_vm0, %v1454_v39 }
0x1a28   :  { %5445 = vmatpush3.msra.mxu1 %v6651_v35  ;;  %5446 = vmatprep.mubr.msk.f32.mxu1 %vm6234_vm1, %v6233_v14 }
0x1a29   :  { %5449 = vmatprep.subr.bf16.mxu1 %v6233_v14 }
0x1afa   :  { %v1528_v42 = vpop.f32.mrb[36].mxu1 }
0x1afb   :  { %v1529_v43 = vadd.f32 %v1528_v42, %v6667_v40  ;;  %v5443_v48 = vpop.f32.mrb[37].mxu1 }
0x1afd   :  { %v1533_v49 = vsel %vm1532_vm15, %v1529_v43, -inf }
0x1afe   :  { %1534 = vmax.xlane.f32.xlu0 %v1533_v49 }
0x1b14   :  { %1677 = vrot.lane.b32.xlu0 %v1619_v50, %s6237_s5 }
0x1b8b   :  { %v1535_v51 = vpop.xlane.xlu0 %1534 }
0x1b8c   :  { %v1536_v52 = vsub.f32 %v1529_v43, %v1535_v51 }
0x1b8e   :  { %v1537_v54 = vmul.f32 1.442695, %v1536_v52 }
0x1b8f   :  { %v1678_v46 = vpop.permute.xlu0 %1677 }
0x1b90   :  { %6012 = vpow2.f32 %v1537_v54  ;;  %5478 = vmatmul.mubr.msk.bf16.vlgmr.msra.gmra.mrb[40].mxu0 %vm166_vm0, %v1678_v46 }
0x1b91   :  { %5502 = vmatpush3.xpose.msk.msra.mxu0 %vm166_vm0, %v6651_v35  ;;  %5503 = vmatprep.mubr.msk.f32.mxu0 %vm6234_vm1, %v6233_v14 }
0x1b92   :  { %5506 = vmatprep.subr.mxu0 %v6233_v14 }
0x1b9a   :  { %v6013_v57 = vpop.eup %6012 }
0x1b9b   :  { %v1539_v58 = vsel %vm1532_vm15, %v6013_v57, 0.0 }
0x1b9c   :  { %1540 = vadd.xlane.f32.xlu1 %v1539_v58 }
0x1c29   :  { %v1541_v60 = vpop.xlane.xlu1 %1540 }
0x1c2a   :  { %6014 = vrcp.f32 %v1541_v60 }
0x1c34   :  { %v6015_v62 = vpop.eup %6014 }
0x1c35   :  { %v1543_v1 = vmul.f32 %v6015_v62, %v6013_v57 }
0x1c37   :  { %5447 = vmatmul.mubr.msk.f32.vlgmr.msra.gmra.mrb[38].mxu1 %vm1545_vm2, %v1543_v1 }
0x1c38   :  { %5450 = vmatpush3.bf16.msra.mxu1 %v6682_v63  ;;  %5453 = vmatprep.mubr.msk.bf16.mxu1 %vm6234_vm1, %v6233_v14 }
0x1c39   :  { %5451 = vmatprep.subr.bf16.mxu1 %v6233_v14 }
0x1c3c   :  { %5452 = vmatpush3.bf16.msra.mxu1 %v6694_v16 }
0x1c3d   :  { %5457 = vmatprep.subr.bf16.mxu1 %v6233_v14 }
0x1c63   :  { %v6689_v15 = vpop.f32.mrb[40].mxu0 }
0x1c64   :  { %v5479_v3 = vpop.f32.mrb[41].mxu0 }
0x1c65   :  { %v1864_v5 = vpop.f32.mrb[42].mxu0 }
0x1c66   :  { %v5480_v6 = vpop.f32.mrb[43].mxu0 }
0x1d0a   :  { %v1615_v7 = vpop.f32.mrb[38].mxu1 }
0x1d0b   :  { %v1620_v9 = vpack.c.bf16 %v1615_v7, %v1615_v7  ;;  %v5448_v11 = vpop.f32.mrb[39].mxu1 }
0x1d0d   :  { %5454 = vmatmul.mubr.msk.bf16.vlgmr.msra.gmra.mrb[40].mxu1 %vm166_vm0, %v1620_v9 }
0x1d0e   :  { %5458 = vmatpush3.bf16.msra.mxu1 %v6701_v8  ;;  %5461 = vmatprep.mubr.msk.bf16.mxu1 %vm6234_vm1, %v6233_v14 }
0x1d0f   :  { %5459 = vmatprep.subr.bf16.mxu1 %v6233_v14 }
0x1d12   :  { %5460 = vmatpush3.bf16.msra.mxu1 %v6708_v12 }
0x1d13   :  { %5465 = vmatprep.subr.bf16.mxu1 %v6233_v14 }
0x1d15   :  { %5462 = vmatmul.mubr.msk.bf16.vlgmr.msra.gmra.mrb[44].mxu1 %vm166_vm0, %v1678_v46 }
0x1d16   :  { %5469 = vmatprep.mubr.msk.bf16.mxu1 %vm6234_vm1, %v6233_v14  ;;  %5466 = vmatpush3.bf16.msra.mxu1 %v6721_v13 }
0x1d17   :  { %5467 = vmatprep.subr.bf16.mxu1 %v6233_v14 }
0x1d1a   :  { %5468 = vmatpush3.bf16.msra.mxu1 %v6728_v17 }
0x1d1b   :  { %5481 = vmatprep.subr.bf16.mxu1 %v6233_v14 }
0x1de0   :  { %v1670_v18 = vpop.f32.mrb[40].mxu1 }
0x1de1   :  { %v5455_v19 = vpop.f32.mrb[41].mxu1 }
0x1de2   :  { %v1673_v20 = vpop.f32.mrb[42].mxu1 }
0x1de3   :  { %v5456_v21 = vpop.f32.mrb[43].mxu1 }
0x1de8   :  { %v1728_v23 = vpop.f32.mrb[44].mxu1 }
0x1de9   :  { %v1729_v24 = vadd.f32 %v1728_v23, %v1670_v18  ;;  %v5463_v25 = vpop.f32.mrb[45].mxu1 }
0x1dea   :  { %v1731_v26 = vpop.f32.mrb[46].mxu1 }
0x1deb   :  { %v1734_v27 = vadd.f32 %v1729_v24, %v6732_v22  ;;  %v5464_v28 = vpop.f32.mrb[47].mxu1 }
0x1ded   :  { %6016 = vtanh.f32 %v1734_v27 }
0x1df7   :  { %v6017_v29 = vpop.eup %6016 }
0x1df8   :  { %v1736_v30 = vpack.c.bf16 %v6017_v29, %v6017_v29 }
0x1dfa   :  { %5470 = vmatmul.mubr.msk.bf16.vlgmr.msra.gmra.mrb[48].mxu1 %vm166_vm0, %v1736_v30 }
0x1dfb   :  { %5482 = vmatpush3.bf16.msra.mxu1 %v6419_v34  ;;  %5497 = vmatprep.mubr.msk.bf16.mxu1 %vm6234_vm1, %v6233_v14 }
0x1dfc   :  { %5483 = vmatprep.subr.bf16.mxu1 %v6233_v14 }
0x1dff   :  { %5484 = vmatpush3.bf16.msra.mxu1 %v6416_v32 }
0x1e00   :  { %5485 = vmatprep.subr.bf16.mxu1 %v6233_v14 }
0x1e03   :  { %5486 = vmatpush3.bf16.msra.mxu1 %v6425_v47 }
0x1e04   :  { %5487 = vmatprep.subr.bf16.mxu1 %v6233_v14 }
0x1e07   :  { %5488 = vmatpush3.bf16.msra.mxu1 %v6422_v44 }
0x1e08   :  { %5489 = vmatprep.subr.bf16.mxu1 %v6233_v14 }
0x1e0b   :  { %5490 = vmatpush3.bf16.msra.mxu1 %v6435_v61 }
0x1e0c   :  { %5491 = vmatprep.subr.bf16.mxu1 %v6233_v14 }
0x1e0f   :  { %5492 = vmatpush3.bf16.msra.mxu1 %v6431_v59 }
0x1e10   :  { %5493 = vmatprep.subr.bf16.mxu1 %v6233_v14 }
0x1e13   :  { %5494 = vmatpush3.bf16.msra.mxu1 %v6444_v4 }
0x1e14   :  { %5495 = vmatprep.subr.bf16.mxu1 %v6233_v14 }
0x1e17   :  { %5496 = vmatpush3.bf16.msra.mxu1 %v6439_v2 }
0x1e18   :  { %5535 = vmatprep.subr.bf16.mxu1 %v6233_v14 }
0x1ecd   :  { %v1786_v36 = vpop.f32.mrb[48].mxu1 }
0x1ece   :  { %v6760_v37 = vadd.f32 %v1786_v36, %v6757_v31  ;;  %v5471_v38 = vpop.f32.mrb[49].mxu1 }
0x1ecf   :  { %v1789_v39 = vpop.f32.mrb[50].mxu1 }
0x1ed0   :  { %v5472_v10 = vpop.f32.mrb[51].mxu1  ;;  %v1793_v45 = vsel %vm1792_vm3, %v6760_v37, -inf }
0x1ed1   :  { %1794 = vmax.xlane.f32.xlu1 %v1793_v45 }
0x1f5e   :  { %v6764_v42 = vpop.xlane.xlu1 %1794 }
0x1f5f   :  { %vm1802_vm4 = vcmp.eq.f32.partialorder %v6760_v37, %v6764_v42 }
0x1f60   :  { %v1803_v43 = vsel %vm1802_vm4, %v6429_v53, 128 }
0x1f61   :  { %v1804_v48 = vsel %vm1792_vm3, %v1803_v43, 2147483647 }
0x1f62   :  { %v1806_v49 = vshra.s32 %v1804_v48, 16  ;;  %v1805_v51 = vand.u32 65535, %v1804_v48 }
0x1f64   :  { %v1808_v50 = vcvt.s32.f32 %v1806_v49  ;;  %v1807_v54 = vcvt.s32.f32 %v1805_v51 }
0x1f66   :  { %1809 = vmin.xlane.f32.xlu1 %v1808_v50 }
0x1ff3   :  { %v1810_v52 = vpop.xlane.xlu1 %1809 }
0x1ff4   :  { %vm1811_vm5 = vcmp.eq.f32.partialorder %v1808_v50, %v1810_v52  ;;  %v1816_v57 = vcvt.f32.s32 %v1810_v52 }
0x1ff5   :  { %v1812_v46 = vsel %vm1811_vm5, %v1807_v54, inf  ;;  %vm2690_vm5 = vcmp.eq.s32.totalorder %v6429_v53, 2 }
0x1ff6   :  { %1813 = vmin.xlane.f32.xlu1 %v1812_v46  ;;  %v1817_v60 = vshll.u32 %v1816_v57, 16 }
0x2083   :  { %v1814_v58 = vpop.xlane.xlu1 %1813 }
0x2084   :  { %v1815_v62 = vcvt.f32.s32 %v1814_v58 }
0x2086   :  { %v6770_v1 = vadd.s32 %v1817_v60, %v1815_v62 }
0x2088   :  { %vm1824_vm6 = vcmp.eq.s32.totalorder %v6429_v53, %v6770_v1 }
0x2089   :  { %vm4965_vm7 = vmpackc.low %vm1824_vm6, %vm1824_vm6 }
0x208a   :  { %5498 = vmatmul.mubr.msk.bf16.vlgmr.msra.gmra.mrb[52].mxu1 %vm4965_vm7, %v6235_v0 }
0x208b   :  { %5536 = vmatpush3.bf16.msra.mxu1 %v6608_v55  ;;  %5539 = vmatprep.mubr.msk.bf16.mxu1 %vm6234_vm1, %v6233_v14 }
0x208c   :  { %5537 = vmatprep.subr.bf16.mxu1 %v6233_v14 }
0x208f   :  { %5538 = vmatpush3.bf16.msra.mxu1 %v6619_v56 }
0x2090   :  { %5563 = vmatprep.subr.mxu1 %v6233_v14 }
0x215d   :  { %v1901_v3 = vpop.f32.mrb[52].mxu1 }
0x215e   :  { %v1902_v5 = vadd.f32 %v1901_v3, %v6689_v15  ;;  %v5499_v6 = vpop.f32.mrb[53].mxu1 }
0x215f   :  { %v1904_v7 = vpop.f32.mrb[54].mxu1 }
0x2160   :  { %v1907_v9 = vadd.f32 %v1902_v5, %v6642_v41  ;;  %v5500_v11 = vpop.f32.mrb[55].mxu1 }
0x2162   :  { %6018 = vtanh.f32 %v1907_v9  ;;  %v4967_v19 = vmul.f32 -1.442695, %v1907_v9 }
0x2164   :  { %6020 = vpow2.f32 %v4967_v19 }
0x216c   :  { %v6019_v18 = vpop.eup %6018 }
0x216d   :  { %1917 = vrot.lane.b32.xlu1 %v6019_v18, %s6236_s25 }
0x216e   :  { %v6021_v20 = vpop.eup %6020 }
0x216f   :  { %v1911_v21 = vadd.f32 1.0, %v6021_v20 }
0x2171   :  { %6022 = vrcp.f32 %v1911_v21 }
0x217b   :  { %v6023_v23 = vpop.eup %6022 }
0x217c   :  { %v1915_v15 = vmul.f32 %v6023_v23, %v6648_v33 }
0x21df   :  { %v1918_v24 = vpop.permute.xlu1 %1917 }
0x21e0   :  { %v1920_v25 = vmul.f32 %v6023_v23, %v1918_v24 }
0x21e2   :  { %1922 = vrot.lane.b32.xlu0 %v1920_v25, %s6237_s5 }
0x2254   :  { %v1923_v26 = vpop.permute.xlu0 %1922 }
0x2255   :  { %v6786_v27 = vadd.f32 %v1923_v26, %v1915_v15 }
0x2257   :  { %6024 = vtanh.f32 %v6786_v27 }
0x2261   :  { %v6025_v28 = vpop.eup %6024 }
0x2262   :  { %1928 = vrot.lane.b32.xlu0 %v6025_v28, %s6236_s25 }
0x22d4   :  { %v1929_v29 = vpop.permute.xlu0 %1928 }
0x22d5   :  { %v1931_v30 = vmul.f32 %v6023_v23, %v1929_v29 }
0x22d7   :  { %1933 = vrot.lane.b32.xlu0 %v1931_v30, %s6237_s5  ;;  %v2091_v45 = vpack.c.bf16 %v1931_v30, %v1931_v30 }
0x2349   :  { %v1934_v36 = vpop.permute.xlu0 %1933 }
0x234a   :  { %5504 = vmatmul.mubr.msk.f32.vlgmr.msra.gmra.mrb[44].mxu0 %vm166_vm0, %v1934_v36 }
0x234b   :  { %5507 = vmatpush3.msra.mxu0 %v6651_v35  ;;  %5508 = vmatprep.mubr.msk.f32.mxu0 %vm6234_vm1, %v6233_v14 }
0x234c   :  { %5511 = vmatprep.subr.bf16.mxu0 %v6233_v14 }
0x241d   :  { %v2003_v33 = vpop.f32.mrb[44].mxu0 }
0x241e   :  { %v2004_v38 = vadd.f32 %v2003_v33, %v6667_v40  ;;  %v5505_v39 = vpop.f32.mrb[45].mxu0 }
0x2420   :  { %v2007_v10 = vsel %vm1532_vm15, %v2004_v38, -inf }
0x2421   :  { %2008 = vmax.xlane.f32.xlu0 %v2007_v10 }
0x2437   :  { %2137 = vrot.lane.b32.xlu0 %v2091_v45, %s6237_s5 }
0x24ae   :  { %v2009_v43 = vpop.xlane.xlu0 %2008 }
0x24af   :  { %v2010_v48 = vsub.f32 %v2004_v38, %v2009_v43 }
0x24b1   :  { %v2011_v49 = vmul.f32 1.442695, %v2010_v48 }
0x24b2   :  { %v2138_v50 = vpop.permute.xlu0 %2137 }
0x24b3   :  { %6026 = vpow2.f32 %v2011_v49  ;;  %5540 = vmatmul.mubr.msk.bf16.vlgmr.msra.gmra.mrb[56].mxu1 %vm166_vm0, %v2138_v50 }
0x24b4   :  { %5564 = vmatpush3.xpose.msk.msra.mxu1 %vm166_vm0, %v6651_v35  ;;  %5565 = vmatprep.mubr.msk.f32.mxu1 %vm6234_vm1, %v6233_v14 }
0x24b5   :  { %5568 = vmatprep.subr.mxu1 %v6233_v14 }
0x24bd   :  { %v6027_v51 = vpop.eup %6026 }
0x24be   :  { %v2013_v52 = vsel %vm1532_vm15, %v6027_v51, 0.0 }
0x24bf   :  { %2014 = vadd.xlane.f32.xlu1 %v2013_v52 }
0x254c   :  { %v2015_v54 = vpop.xlane.xlu1 %2014 }
0x254d   :  { %6028 = vrcp.f32 %v2015_v54 }
0x2557   :  { %v6029_v46 = vpop.eup %6028 }
0x2558   :  { %v2017_v57 = vmul.f32 %v6029_v46, %v6027_v51 }
0x255a   :  { %5509 = vmatmul.mubr.msk.f32.vlgmr.msra.gmra.mrb[46].mxu0 %vm1545_vm2, %v2017_v57 }
0x255b   :  { %5512 = vmatpush3.bf16.msra.mxu0 %v6682_v63  ;;  %5515 = vmatprep.mubr.msk.bf16.mxu0 %vm6234_vm1, %v6233_v14 }
0x255c   :  { %5513 = vmatprep.subr.bf16.mxu0 %v6233_v14 }
0x255f   :  { %5514 = vmatpush3.bf16.msra.mxu0 %v6694_v16 }
0x2560   :  { %5519 = vmatprep.subr.bf16.mxu0 %v6233_v14 }
0x2586   :  { %v6813_v58 = vpop.f32.mrb[56].mxu1 }
0x2587   :  { %v5541_v60 = vpop.f32.mrb[57].mxu1 }
0x2588   :  { %v2298_v62 = vpop.f32.mrb[58].mxu1 }
0x2589   :  { %v5542_v3 = vpop.f32.mrb[59].mxu1 }
0x262d   :  { %v2087_v5 = vpop.f32.mrb[46].mxu0 }
0x262e   :  { %v2092_v6 = vpack.c.bf16 %v2087_v5, %v2087_v5  ;;  %v5510_v7 = vpop.f32.mrb[47].mxu0  ;;  %v1822_v5 = vsel %vm1821_vm10, %v6770_v1, 0 }
0x2630   :  { %5516 = vmatmul.mubr.msk.bf16.vlgmr.msra.gmra.mrb[48].mxu0 %vm166_vm0, %v2092_v6 }
0x2631   :  { %5520 = vmatpush3.bf16.msra.mxu0 %v6701_v8  ;;  %5523 = vmatprep.mubr.msk.bf16.mxu0 %vm6234_vm1, %v6233_v14 }
0x2632   :  { %5521 = vmatprep.subr.bf16.mxu0 %v6233_v14 }
0x2635   :  { %5522 = vmatpush3.bf16.msra.mxu0 %v6708_v12 }
0x2636   :  { %5527 = vmatprep.subr.bf16.mxu0 %v6233_v14 }
0x2638   :  { %5524 = vmatmul.mubr.msk.bf16.vlgmr.msra.gmra.mrb[52].mxu0 %vm166_vm0, %v2138_v50 }
0x2639   :  { %5528 = vmatpush3.bf16.msra.mxu0 %v6721_v13  ;;  %5531 = vmatprep.mubr.msk.bf16.mxu0 %vm6234_vm1, %v6233_v14 }
0x263a   :  { %5529 = vmatprep.subr.bf16.mxu0 %v6233_v14 }
0x263d   :  { %5530 = vmatpush3.bf16.msra.mxu0 %v6728_v17 }
0x263e   :  { %5543 = vmatprep.subr.bf16.mxu0 %v6233_v14 }
0x2703   :  { %v2130_v9 = vpop.f32.mrb[48].mxu0 }
0x2704   :  { %v5517_v11 = vpop.f32.mrb[49].mxu0 }
0x2705   :  { %v2133_v18 = vpop.f32.mrb[50].mxu0 }
0x2706   :  { %v5518_v19 = vpop.f32.mrb[51].mxu0 }
0x270b   :  { %v2176_v20 = vpop.f32.mrb[52].mxu0 }
0x270c   :  { %v2177_v21 = vadd.f32 %v2176_v20, %v2130_v9  ;;  %v5525_v23 = vpop.f32.mrb[53].mxu0 }
0x270d   :  { %v2179_v24 = vpop.f32.mrb[54].mxu0 }
0x270e   :  { %v2182_v25 = vadd.f32 %v2177_v21, %v6732_v22  ;;  %v5526_v15 = vpop.f32.mrb[55].mxu0 }
0x2710   :  { %6030 = vtanh.f32 %v2182_v25 }
0x271a   :  { %v6031_v26 = vpop.eup %6030 }
0x271b   :  { %v2184_v28 = vpack.c.bf16 %v6031_v26, %v6031_v26 }
0x271d   :  { %5532 = vmatmul.mubr.msk.bf16.vlgmr.msra.gmra.mrb[56].mxu0 %vm166_vm0, %v2184_v28 }
0x271e   :  { %5544 = vmatpush3.bf16.msra.mxu0 %v6419_v34  ;;  %5559 = vmatprep.mubr.msk.bf16.mxu0 %vm6234_vm1, %v6233_v14 }
0x271f   :  { %5545 = vmatprep.subr.bf16.mxu0 %v6233_v14 }
0x2722   :  { %5546 = vmatpush3.bf16.msra.mxu0 %v6416_v32 }
0x2723   :  { %5547 = vmatprep.subr.bf16.mxu0 %v6233_v14 }
0x2726   :  { %5548 = vmatpush3.bf16.msra.mxu0 %v6425_v47 }
0x2727   :  { %5549 = vmatprep.subr.bf16.mxu0 %v6233_v14 }
0x272a   :  { %5550 = vmatpush3.bf16.msra.mxu0 %v6422_v44 }
0x272b   :  { %5551 = vmatprep.subr.bf16.mxu0 %v6233_v14 }
0x272e   :  { %5552 = vmatpush3.bf16.msra.mxu0 %v6435_v61 }
0x272f   :  { %5553 = vmatprep.subr.bf16.mxu0 %v6233_v14 }
0x2732   :  { %5554 = vmatpush3.bf16.msra.mxu0 %v6431_v59 }
0x2733   :  { %5555 = vmatprep.subr.bf16.mxu0 %v6233_v14 }
0x2736   :  { %5556 = vmatpush3.bf16.msra.mxu0 %v6444_v4 }
0x2737   :  { %5557 = vmatprep.subr.bf16.mxu0 %v6233_v14 }
0x273a   :  { %5558 = vmatpush3.bf16.msra.mxu0 %v6439_v2 }
0x273b   :  { %5597 = vmatprep.subr.bf16.mxu0 %v6233_v14 }
0x27f0   :  { %v2222_v29 = vpop.f32.mrb[56].mxu0 }
0x27f1   :  { %v6850_v30 = vadd.f32 %v2222_v29, %v6757_v31  ;;  %v5533_v36 = vpop.f32.mrb[57].mxu0 }
0x27f2   :  { %v2225_v33 = vpop.f32.mrb[58].mxu0 }
0x27f3   :  { %v5534_v38 = vpop.f32.mrb[59].mxu0  ;;  %v2228_v39 = vsel %vm1792_vm3, %v6850_v30, -inf }
0x27f4   :  { %2229 = vmax.xlane.f32.xlu1 %v2228_v39 }
0x2881   :  { %v6854_v10 = vpop.xlane.xlu1 %2229 }
0x2882   :  { %vm2237_vm8 = vcmp.eq.f32.partialorder %v6850_v30, %v6854_v10 }
0x2883   :  { %v2238_v45 = vsel %vm2237_vm8, %v6429_v53, 128 }
0x2884   :  { %v2239_v43 = vsel %vm1792_vm3, %v2238_v45, 2147483647 }
0x2885   :  { %v2241_v48 = vshra.s32 %v2239_v43, 16  ;;  %v2240_v50 = vand.u32 65535, %v2239_v43 }
0x2887   :  { %v2243_v49 = vcvt.s32.f32 %v2241_v48  ;;  %v2242_v52 = vcvt.s32.f32 %v2240_v50 }
0x2889   :  { %2244 = vmin.xlane.f32.xlu1 %v2243_v49 }
0x2916   :  { %v2245_v51 = vpop.xlane.xlu1 %2244 }
0x2917   :  { %vm2246_vm9 = vcmp.eq.f32.partialorder %v2243_v49, %v2245_v51  ;;  %v2251_v46 = vcvt.f32.s32 %v2245_v51 }
0x2918   :  { %v2247_v54 = vsel %vm2246_vm9, %v2242_v52, inf }
0x2919   :  { %2248 = vmin.xlane.f32.xlu1 %v2247_v54  ;;  %v2252_v60 = vshll.u32 %v2251_v46, 16 }
0x29a6   :  { %v2249_v57 = vpop.xlane.xlu1 %2248 }
0x29a7   :  { %v2250_v62 = vcvt.f32.s32 %v2249_v57 }
0x29a9   :  { %v2253_v3 = vadd.s32 %v2252_v60, %v2250_v62 }
0x29ab   :  { %v6866_v6 = vsel %vm1319_vm11, %v2253_v3, %v1822_v5  ;;  %vm2258_vm12 = vcmp.eq.s32.totalorder %v6429_v53, %v2253_v3 }
0x29ac   :  { %vm4975_vm13 = vmpackc.low %vm2258_vm12, %vm2258_vm12  ;;  %vm3125_vm12 = vcmp.eq.s32.totalorder %v6429_v53, 3 }
0x29ad   :  { %5560 = vmatmul.mubr.msk.bf16.vlgmr.msra.gmra.mrb[60].mxu0 %vm4975_vm13, %v6235_v0 }
0x29ae   :  { %5598 = vmatpush3.bf16.msra.mxu0 %v6608_v55  ;;  %5601 = vmatprep.mubr.msk.bf16.mxu0 %vm6234_vm1, %v6233_v14 }
0x29af   :  { %5599 = vmatprep.subr.bf16.mxu0 %v6233_v14 }
0x29b2   :  { %5600 = vmatpush3.bf16.msra.mxu0 %v6619_v56 }
0x29b3   :  { %5625 = vmatprep.subr.mxu0 %v6233_v14 }
0x2a80   :  { %v2335_v1 = vpop.f32.mrb[60].mxu0 }
0x2a81   :  { %v2336_v7 = vadd.f32 %v2335_v1, %v6813_v58  ;;  %v5561_v9 = vpop.f32.mrb[61].mxu0 }
0x2a82   :  { %v2338_v11 = vpop.f32.mrb[62].mxu0 }
0x2a83   :  { %v2341_v18 = vadd.f32 %v2336_v7, %v6642_v41  ;;  %v5562_v19 = vpop.f32.mrb[63].mxu0 }
0x2a85   :  { %6032 = vtanh.f32 %v2341_v18  ;;  %v4977_v21 = vmul.f32 -1.442695, %v2341_v18 }
0x2a87   :  { %6034 = vpow2.f32 %v4977_v21 }
0x2a8f   :  { %v6033_v20 = vpop.eup %6032 }
0x2a90   :  { %2351 = vrot.lane.b32.xlu1 %v6033_v20, %s6236_s25 }
0x2a91   :  { %v6035_v23 = vpop.eup %6034 }
0x2a92   :  { %v2345_v24 = vadd.f32 1.0, %v6035_v23 }
0x2a94   :  { %6036 = vrcp.f32 %v2345_v24 }
0x2a9e   :  { %v6037_v25 = vpop.eup %6036 }
0x2a9f   :  { %v2349_v58 = vmul.f32 %v6037_v25, %v6786_v27 }
0x2b02   :  { %v2352_v15 = vpop.permute.xlu1 %2351 }
0x2b03   :  { %v2354_v26 = vmul.f32 %v6037_v25, %v2352_v15 }
0x2b05   :  { %2356 = vrot.lane.b32.xlu0 %v2354_v26, %s6237_s5 }
0x2b77   :  { %v2357_v28 = vpop.permute.xlu0 %2356 }
0x2b78   :  { %v6881_v29 = vadd.f32 %v2357_v28, %v2349_v58 }
0x2b7a   :  { %6038 = vtanh.f32 %v6881_v29 }
0x2b84   :  { %v6039_v36 = vpop.eup %6038 }
0x2b85   :  { %2362 = vrot.lane.b32.xlu0 %v6039_v36, %s6236_s25 }
0x2bf7   :  { %v2363_v33 = vpop.permute.xlu0 %2362 }
0x2bf8   :  { %v2365_v38 = vmul.f32 %v6037_v25, %v2363_v33 }
0x2bfa   :  { %2367 = vrot.lane.b32.xlu0 %v2365_v38, %s6237_s5  ;;  %v2525_v49 = vpack.c.bf16 %v2365_v38, %v2365_v38 }
0x2c6c   :  { %v2368_v39 = vpop.permute.xlu0 %2367 }
0x2c6d   :  { %5566 = vmatmul.mubr.msk.f32.vlgmr.msra.gmra.mrb[60].mxu1 %vm166_vm0, %v2368_v39 }
0x2c6e   :  { %5569 = vmatpush3.msra.mxu1 %v6651_v35  ;;  %5570 = vmatprep.mubr.msk.f32.mxu1 %vm6234_vm1, %v6233_v14 }
0x2c6f   :  { %5573 = vmatprep.subr.bf16.mxu1 %v6233_v14 }
0x2d40   :  { %v2437_v27 = vpop.f32.mrb[60].mxu1 }
0x2d41   :  { %v2438_v45 = vadd.f32 %v2437_v27, %v6667_v40  ;;  %v5567_v43 = vpop.f32.mrb[61].mxu1 }
0x2d43   :  { %v2441_v48 = vsel %vm1532_vm15, %v2438_v45, -inf }
0x2d44   :  { %2442 = vmax.xlane.f32.xlu0 %v2441_v48 }
0x2d5a   :  { %2571 = vrot.lane.b32.xlu0 %v2525_v49, %s6237_s5 }
0x2dd1   :  { %v2443_v50 = vpop.xlane.xlu0 %2442 }
0x2dd2   :  { %v2444_v51 = vsub.f32 %v2438_v45, %v2443_v50 }
0x2dd4   :  { %v2445_v52 = vmul.f32 1.442695, %v2444_v51 }
0x2dd5   :  { %v2572_v54 = vpop.permute.xlu0 %2571 }
0x2dd6   :  { %6040 = vpow2.f32 %v2445_v52  ;;  %5602 = vmatmul.mubr.msk.bf16.vlgmr.msra.gmra.mrb[64].mxu0 %vm166_vm0, %v2572_v54 }
0x2dd7   :  { %5626 = vmatpush3.xpose.msk.msra.mxu0 %vm166_vm0, %v6651_v35  ;;  %5627 = vmatprep.mubr.msk.f32.mxu0 %vm6234_vm1, %v6233_v14 }
0x2dd8   :  { %5630 = vmatprep.subr.mxu0 %v6233_v14 }
0x2de0   :  { %v6041_v46 = vpop.eup %6040 }
0x2de1   :  { %v2447_v57 = vsel %vm1532_vm15, %v6041_v46, 0.0 }
0x2de2   :  { %2448 = vadd.xlane.f32.xlu1 %v2447_v57 }
0x2e6f   :  { %v2449_v60 = vpop.xlane.xlu1 %2448 }
0x2e70   :  { %6042 = vrcp.f32 %v2449_v60 }
0x2e7a   :  { %v6043_v62 = vpop.eup %6042 }
0x2e7b   :  { %v2451_v3 = vmul.f32 %v6043_v62, %v6041_v46 }
0x2e7d   :  { %5571 = vmatmul.mubr.msk.f32.vlgmr.msra.gmra.mrb[62].mxu1 %vm1545_vm2, %v2451_v3 }
0x2e7e   :  { %5574 = vmatpush3.bf16.msra.mxu1 %v6682_v63  ;;  %5577 = vmatprep.mubr.msk.bf16.mxu1 %vm6234_vm1, %v6233_v14 }
0x2e7f   :  { %5575 = vmatprep.subr.bf16.mxu1 %v6233_v14 }
0x2e82   :  { %5576 = vmatpush3.bf16.msra.mxu1 %v6694_v16 }
0x2e83   :  { %5581 = vmatprep.subr.bf16.mxu1 %v6233_v14 }
0x2ea9   :  { %v6908_v5 = vpop.f32.mrb[64].mxu0 }
0x2eaa   :  { %v5603_v1 = vpop.f32.mrb[65].mxu0 }
0x2eab   :  { %v2733_v7 = vpop.f32.mrb[66].mxu0 }
0x2eac   :  { %v5604_v9 = vpop.f32.mrb[67].mxu0 }
0x2f50   :  { %v2521_v11 = vpop.f32.mrb[62].mxu1 }
0x2f51   :  { %v2526_v18 = vpack.c.bf16 %v2521_v11, %v2521_v11  ;;  %v5572_v19 = vpop.f32.mrb[63].mxu1 }
0x2f53   :  { %5578 = vmatmul.mubr.msk.bf16.vlgmr.msra.gmra.mrb[64].mxu1 %vm166_vm0, %v2526_v18 }
0x2f54   :  { %5582 = vmatpush3.bf16.msra.mxu1 %v6701_v8  ;;  %5585 = vmatprep.mubr.msk.bf16.mxu1 %vm6234_vm1, %v6233_v14 }
0x2f55   :  { %5583 = vmatprep.subr.bf16.mxu1 %v6233_v14 }
0x2f58   :  { %5584 = vmatpush3.bf16.msra.mxu1 %v6708_v12 }
0x2f59   :  { %5589 = vmatprep.subr.bf16.mxu1 %v6233_v14 }
0x2f5b   :  { %5586 = vmatmul.mubr.msk.bf16.vlgmr.msra.gmra.mrb[68].mxu1 %vm166_vm0, %v2572_v54 }
0x2f5c   :  { %5590 = vmatpush3.bf16.msra.mxu1 %v6721_v13  ;;  %5593 = vmatprep.mubr.msk.bf16.mxu1 %vm6234_vm1, %v6233_v14 }
0x2f5d   :  { %5591 = vmatprep.subr.bf16.mxu1 %v6233_v14 }
0x2f60   :  { %5592 = vmatpush3.bf16.msra.mxu1 %v6728_v17 }
0x2f61   :  { %5605 = vmatprep.subr.bf16.mxu1 %v6233_v14 }
0x3026   :  { %v2564_v20 = vpop.f32.mrb[64].mxu1 }
0x3027   :  { %v5579_v21 = vpop.f32.mrb[65].mxu1 }
0x3028   :  { %v2567_v23 = vpop.f32.mrb[66].mxu1 }
0x3029   :  { %v5580_v24 = vpop.f32.mrb[67].mxu1 }
0x302e   :  { %v2610_v25 = vpop.f32.mrb[68].mxu1 }
0x302f   :  { %v2611_v15 = vadd.f32 %v2610_v25, %v2564_v20  ;;  %v5587_v26 = vpop.f32.mrb[69].mxu1 }
0x3030   :  { %v2613_v58 = vpop.f32.mrb[70].mxu1 }
0x3031   :  { %v2616_v28 = vadd.f32 %v2611_v15, %v6732_v22  ;;  %v5588_v36 = vpop.f32.mrb[71].mxu1 }
0x3033   :  { %6044 = vtanh.f32 %v2616_v28 }
0x303d   :  { %v6045_v33 = vpop.eup %6044 }
0x303e   :  { %v2618_v38 = vpack.c.bf16 %v6045_v33, %v6045_v33 }
0x3040   :  { %5594 = vmatmul.mubr.msk.bf16.vlgmr.msra.gmra.mrb[72].mxu1 %vm166_vm0, %v2618_v38 }
0x3041   :  { %5606 = vmatpush3.bf16.msra.mxu1 %v6419_v34  ;;  %5621 = vmatprep.mubr.msk.bf16.mxu1 %vm6234_vm1, %v6233_v14 }
0x3042   :  { %5607 = vmatprep.subr.bf16.mxu1 %v6233_v14 }
0x3045   :  { %5608 = vmatpush3.bf16.msra.mxu1 %v6416_v32 }
0x3046   :  { %5609 = vmatprep.subr.bf16.mxu1 %v6233_v14 }
0x3049   :  { %5610 = vmatpush3.bf16.msra.mxu1 %v6425_v47 }
0x304a   :  { %5611 = vmatprep.subr.bf16.mxu1 %v6233_v14 }
0x304d   :  { %5612 = vmatpush3.bf16.msra.mxu1 %v6422_v44 }
0x304e   :  { %5613 = vmatprep.subr.bf16.mxu1 %v6233_v14 }
0x3051   :  { %5614 = vmatpush3.bf16.msra.mxu1 %v6435_v61 }
0x3052   :  { %5615 = vmatprep.subr.bf16.mxu1 %v6233_v14 }
0x3055   :  { %5616 = vmatpush3.bf16.msra.mxu1 %v6431_v59 }
0x3056   :  { %5617 = vmatprep.subr.bf16.mxu1 %v6233_v14 }
0x3059   :  { %5618 = vmatpush3.bf16.msra.mxu1 %v6444_v4 }
0x305a   :  { %5619 = vmatprep.subr.bf16.mxu1 %v6233_v14 }
0x305d   :  { %5620 = vmatpush3.bf16.msra.mxu1 %v6439_v2 }
0x305e   :  { %5659 = vmatprep.subr.bf16.mxu1 %v6233_v14 }
0x3113   :  { %v2656_v39 = vpop.f32.mrb[72].mxu1 }
0x3114   :  { %v6945_v27 = vadd.f32 %v2656_v39, %v6757_v31  ;;  %v5595_v45 = vpop.f32.mrb[73].mxu1 }
0x3115   :  { %v2659_v43 = vpop.f32.mrb[74].mxu1 }
0x3116   :  { %v5596_v48 = vpop.f32.mrb[75].mxu1  ;;  %v2662_v49 = vsel %vm1792_vm3, %v6945_v27, -inf }
0x3117   :  { %2663 = vmax.xlane.f32.xlu1 %v2662_v49 }
0x31a4   :  { %v6949_v50 = vpop.xlane.xlu1 %2663 }
0x31a5   :  { %vm2671_vm14 = vcmp.eq.f32.partialorder %v6945_v27, %v6949_v50 }
0x31a6   :  { %v2672_v51 = vsel %vm2671_vm14, %v6429_v53, 128 }
0x31a7   :  { %v2673_v52 = vsel %vm1792_vm3, %v2672_v51, 2147483647 }
0x31a8   :  { %v2675_v54 = vshra.s32 %v2673_v52, 16  ;;  %v2674_v57 = vand.u32 65535, %v2673_v52 }
0x31aa   :  { %v2677_v46 = vcvt.s32.f32 %v2675_v54  ;;  %v2676_v62 = vcvt.s32.f32 %v2674_v57 }
0x31ac   :  { %2678 = vmin.xlane.f32.xlu1 %v2677_v46 }
0x3239   :  { %v2679_v60 = vpop.xlane.xlu1 %2678 }
0x323a   :  { %vm2680_vm4 = vcmp.eq.f32.partialorder %v2677_v46, %v2679_v60  ;;  %v2685_v1 = vcvt.f32.s32 %v2679_v60 }
0x323b   :  { %v2681_v3 = vsel %vm2680_vm4, %v2676_v62, inf }
0x323c   :  { %2682 = vmin.xlane.f32.xlu1 %v2681_v3  ;;  %v2686_v9 = vshll.u32 %v2685_v1, 16 }
0x32c9   :  { %v2683_v7 = vpop.xlane.xlu1 %2682 }
0x32ca   :  { %v2684_v11 = vcvt.f32.s32 %v2683_v7 }
0x32cc   :  { %v2687_v18 = vadd.s32 %v2686_v9, %v2684_v11 }
0x32ce   :  { %v6959_v19 = vsel %vm2690_vm5, %v2687_v18, %v6866_v6  ;;  %vm2693_vm6 = vcmp.eq.s32.totalorder %v6429_v53, %v2687_v18 }
0x32cf   :  { %vm4985_vm7 = vmpackc.low %vm2693_vm6, %vm2693_vm6 }
0x32d0   :  { %5622 = vmatmul.mubr.msk.bf16.vlgmr.msra.gmra.mrb[76].mxu1 %vm4985_vm7, %v6235_v0  ;;  %vm3560_vm7 = vcmp.eq.s32.totalorder %v6429_v53, 4 }
0x32d1   :  { %5660 = vmatpush3.bf16.msra.mxu1 %v6608_v55  ;;  %5663 = vmatprep.mubr.msk.bf16.mxu1 %vm6234_vm1, %v6233_v14 }
0x32d2   :  { %5661 = vmatprep.subr.bf16.mxu1 %v6233_v14 }
0x32d5   :  { %5662 = vmatpush3.bf16.msra.mxu1 %v6619_v56 }
0x32d6   :  { %5687 = vmatprep.subr.mxu1 %v6233_v14 }
0x33a3   :  { %v2770_v20 = vpop.f32.mrb[76].mxu1 }
0x33a4   :  { %v2771_v6 = vadd.f32 %v2770_v20, %v6908_v5  ;;  %v5623_v21 = vpop.f32.mrb[77].mxu1 }
0x33a5   :  { %v2773_v23 = vpop.f32.mrb[78].mxu1 }
0x33a6   :  { %v2776_v24 = vadd.f32 %v2771_v6, %v6642_v41  ;;  %v5624_v25 = vpop.f32.mrb[79].mxu1 }
0x33a8   :  { %6046 = vtanh.f32 %v2776_v24  ;;  %v4987_v55 = vmul.f32 -1.442695, %v2776_v24 }
0x33aa   :  { %6048 = vpow2.f32 %v4987_v55 }
0x33b2   :  { %v6047_v15 = vpop.eup %6046 }
0x33b3   :  { %2786 = vrot.lane.b32.xlu1 %v6047_v15, %s6236_s25 }
0x33b4   :  { %v6049_v26 = vpop.eup %6048 }
0x33b5   :  { %v2780_v58 = vadd.f32 1.0, %v6049_v26 }
0x33b7   :  { %6050 = vrcp.f32 %v2780_v58 }
0x33c1   :  { %v6051_v56 = vpop.eup %6050 }
0x33c2   :  { %v2784_v5 = vmul.f32 %v6051_v56, %v6881_v29 }
0x3425   :  { %v2787_v28 = vpop.permute.xlu1 %2786 }
0x3426   :  { %v2789_v36 = vmul.f32 %v6051_v56, %v2787_v28 }
0x3428   :  { %2791 = vrot.lane.b32.xlu0 %v2789_v36, %s6237_s5 }
0x349a   :  { %v2792_v33 = vpop.permute.xlu0 %2791 }
0x349b   :  { %v6974_v38 = vadd.f32 %v2792_v33, %v2784_v5 }
0x349d   :  { %6052 = vtanh.f32 %v6974_v38 }
0x34a7   :  { %v6053_v41 = vpop.eup %6052 }
0x34a8   :  { %2797 = vrot.lane.b32.xlu0 %v6053_v41, %s6236_s25 }
0x351a   :  { %v2798_v39 = vpop.permute.xlu0 %2797 }
0x351b   :  { %v2800_v45 = vmul.f32 %v6051_v56, %v2798_v39 }
0x351d   :  { %2802 = vrot.lane.b32.xlu0 %v2800_v45, %s6237_s5  ;;  %v2960_v52 = vpack.c.bf16 %v2800_v45, %v2800_v45 }
0x358f   :  { %v2803_v43 = vpop.permute.xlu0 %2802 }
0x3590   :  { %5628 = vmatmul.mubr.msk.f32.vlgmr.msra.gmra.mrb[68].mxu0 %vm166_vm0, %v2803_v43 }
0x3591   :  { %5631 = vmatpush3.msra.mxu0 %v6651_v35  ;;  %5632 = vmatprep.mubr.msk.f32.mxu0 %vm6234_vm1, %v6233_v14 }
0x3592   :  { %5635 = vmatprep.subr.bf16.mxu0 %v6233_v14 }
0x3663   :  { %v2872_v29 = vpop.f32.mrb[68].mxu0 }
0x3664   :  { %v2873_v48 = vadd.f32 %v2872_v29, %v6667_v40  ;;  %v5629_v49 = vpop.f32.mrb[69].mxu0 }
0x3666   :  { %v2876_v51 = vsel %vm1532_vm15, %v2873_v48, -inf }
0x3667   :  { %2877 = vmax.xlane.f32.xlu0 %v2876_v51 }
0x367d   :  { %3006 = vrot.lane.b32.xlu0 %v2960_v52, %s6237_s5 }
0x36f4   :  { %v2878_v54 = vpop.xlane.xlu0 %2877 }
0x36f5   :  { %v2879_v46 = vsub.f32 %v2873_v48, %v2878_v54 }
0x36f7   :  { %v2880_v57 = vmul.f32 1.442695, %v2879_v46 }
0x36f8   :  { %v3007_v60 = vpop.permute.xlu0 %3006 }
0x36f9   :  { %6054 = vpow2.f32 %v2880_v57  ;;  %5664 = vmatmul.mubr.msk.bf16.vlgmr.msra.gmra.mrb[80].mxu1 %vm166_vm0, %v3007_v60 }
0x36fa   :  { %5688 = vmatpush3.xpose.msk.msra.mxu1 %vm166_vm0, %v6651_v35  ;;  %5689 = vmatprep.mubr.msk.f32.mxu1 %vm6234_vm1, %v6233_v14 }
0x36fb   :  { %5692 = vmatprep.subr.mxu1 %v6233_v14 }
0x3703   :  { %v6055_v62 = vpop.eup %6054 }
0x3704   :  { %v2882_v3 = vsel %vm1532_vm15, %v6055_v62, 0.0 }
0x3705   :  { %2883 = vadd.xlane.f32.xlu1 %v2882_v3 }
0x3792   :  { %v2884_v1 = vpop.xlane.xlu1 %2883 }
0x3793   :  { %6056 = vrcp.f32 %v2884_v1  ;;  %v7059_v1 = vld [vmem:[%s7503_s7] sm:$0xff]  }
0x379d   :  { %v6057_v7 = vpop.eup %6056 }
0x379e   :  { %v2886_v9 = vmul.f32 %v6057_v7, %v6055_v62 }
0x37a0   :  { %5633 = vmatmul.mubr.msk.f32.vlgmr.msra.gmra.mrb[70].mxu0 %vm1545_vm2, %v2886_v9 }
0x37a1   :  { %5636 = vmatpush3.bf16.msra.mxu0 %v6682_v63  ;;  %5639 = vmatprep.mubr.msk.bf16.mxu0 %vm6234_vm1, %v6233_v14 }
0x37a2   :  { %5637 = vmatprep.subr.bf16.mxu0 %v6233_v14 }
0x37a5   :  { %5638 = vmatpush3.bf16.msra.mxu0 %v6694_v16 }
0x37a6   :  { %5643 = vmatprep.subr.bf16.mxu0 %v6233_v14 }
0x37cc   :  { %v7001_v11 = vpop.f32.mrb[80].mxu1 }
0x37cd   :  { %v5665_v18 = vpop.f32.mrb[81].mxu1 }
0x37ce   :  { %v3168_v20 = vpop.f32.mrb[82].mxu1 }
0x37cf   :  { %v5666_v6 = vpop.f32.mrb[83].mxu1 }
0x37d0   :  { %v7076_v6 = vld [vmem:[%s7504_s8] sm:$0x1] }
0x3873   :  { %v2956_v21 = vpop.f32.mrb[70].mxu0 }
0x3874   :  { %v2961_v23 = vpack.c.bf16 %v2956_v21, %v2956_v21  ;;  %v5634_v24 = vpop.f32.mrb[71].mxu0 }
0x3876   :  { %5640 = vmatmul.mubr.msk.bf16.vlgmr.msra.gmra.mrb[72].mxu0 %vm166_vm0, %v2961_v23 }
0x3877   :  { %5644 = vmatpush3.bf16.msra.mxu0 %v6701_v8  ;;  %5647 = vmatprep.mubr.msk.bf16.mxu0 %vm6234_vm1, %v6233_v14 }
0x3878   :  { %5645 = vmatprep.subr.bf16.mxu0 %v6233_v14 }
0x387b   :  { %5646 = vmatpush3.bf16.msra.mxu0 %v6708_v12 }
0x387c   :  { %5651 = vmatprep.subr.bf16.mxu0 %v6233_v14 }
0x387e   :  { %5648 = vmatmul.mubr.msk.bf16.vlgmr.msra.gmra.mrb[76].mxu0 %vm166_vm0, %v3007_v60 }
0x387f   :  { %5652 = vmatpush3.bf16.msra.mxu0 %v6721_v13  ;;  %5655 = vmatprep.mubr.msk.bf16.mxu0 %vm6234_vm1, %v6233_v14 }
0x3880   :  { %5653 = vmatprep.subr.bf16.mxu0 %v6233_v14 }
0x3883   :  { %5654 = vmatpush3.bf16.msra.mxu0 %v6728_v17 }
0x3884   :  { %5667 = vmatprep.subr.bf16.mxu0 %v6233_v14 }
0x3949   :  { %v2999_v63 = vpop.f32.mrb[72].mxu0 }
0x394a   :  { %v5641_v16 = vpop.f32.mrb[73].mxu0 }
0x394b   :  { %v3002_v8 = vpop.f32.mrb[74].mxu0 }
0x394c   :  { %v5642_v25 = vpop.f32.mrb[75].mxu0 }
0x3951   :  { %v3045_v12 = vpop.f32.mrb[76].mxu0 }
0x3952   :  { %v3046_v15 = vadd.f32 %v3045_v12, %v2999_v63  ;;  %v5649_v55 = vpop.f32.mrb[77].mxu0 }
0x3953   :  { %v3048_v26 = vpop.f32.mrb[78].mxu0 }
0x3954   :  { %v3051_v58 = vadd.f32 %v3046_v15, %v6732_v22  ;;  %v5650_v13 = vpop.f32.mrb[79].mxu0 }
0x3956   :  { %6058 = vtanh.f32 %v3051_v58 }
0x3960   :  { %v6059_v56 = vpop.eup %6058 }
0x3961   :  { %v3053_v28 = vpack.c.bf16 %v6059_v56, %v6059_v56 }
0x3963   :  { %5656 = vmatmul.mubr.msk.bf16.vlgmr.msra.gmra.mrb[80].mxu0 %vm166_vm0, %v3053_v28 }
0x3964   :  { %5668 = vmatpush3.bf16.msra.mxu0 %v6419_v34  ;;  %5683 = vmatprep.mubr.msk.bf16.mxu0 %vm6234_vm1, %v6233_v14 }
0x3965   :  { %5669 = vmatprep.subr.bf16.mxu0 %v6233_v14 }
0x3968   :  { %5670 = vmatpush3.bf16.msra.mxu0 %v6416_v32 }
0x3969   :  { %5671 = vmatprep.subr.bf16.mxu0 %v6233_v14 }
0x396c   :  { %5672 = vmatpush3.bf16.msra.mxu0 %v6425_v47 }
0x396d   :  { %5673 = vmatprep.subr.bf16.mxu0 %v6233_v14 }
0x3970   :  { %5674 = vmatpush3.bf16.msra.mxu0 %v6422_v44 }
0x3971   :  { %5675 = vmatprep.subr.bf16.mxu0 %v6233_v14 }
0x3974   :  { %5676 = vmatpush3.bf16.msra.mxu0 %v6435_v61 }
0x3975   :  { %5677 = vmatprep.subr.bf16.mxu0 %v6233_v14 }
0x3978   :  { %5678 = vmatpush3.bf16.msra.mxu0 %v6431_v59 }
0x3979   :  { %5679 = vmatprep.subr.bf16.mxu0 %v6233_v14 }
0x397c   :  { %5680 = vmatpush3.bf16.msra.mxu0 %v6444_v4 }
0x397d   :  { %5681 = vmatprep.subr.bf16.mxu0 %v6233_v14 }
0x3980   :  { %5682 = vmatpush3.bf16.msra.mxu0 %v6439_v2 }
0x3981   :  { %5721 = vmatprep.subr.bf16.mxu0 %v6233_v14 }
0x3a36   :  { %v3091_v17 = vpop.f32.mrb[80].mxu0 }
0x3a37   :  { %v7038_v22 = vadd.f32 %v3091_v17, %v6757_v31  ;;  %v5657_v36 = vpop.f32.mrb[81].mxu0 }
0x3a38   :  { %v3094_v5 = vpop.f32.mrb[82].mxu0 }
0x3a39   :  { %v5658_v33 = vpop.f32.mrb[83].mxu0  ;;  %v3097_v41 = vsel %vm1792_vm3, %v7038_v22, -inf }
0x3a3a   :  { %3098 = vmax.xlane.f32.xlu1 %v3097_v41 }
0x3ac7   :  { %v7042_v39 = vpop.xlane.xlu1 %3098 }
0x3ac8   :  { %vm3106_vm8 = vcmp.eq.f32.partialorder %v7038_v22, %v7042_v39 }
0x3ac9   :  { %v3107_v45 = vsel %vm3106_vm8, %v6429_v53, 128 }
0x3aca   :  { %v3108_v43 = vsel %vm1792_vm3, %v3107_v45, 2147483647 }
0x3acb   :  { %v3110_v29 = vshra.s32 %v3108_v43, 16  ;;  %v3109_v31 = vand.u32 65535, %v3108_v43 }
0x3acd   :  { %v3112_v48 = vcvt.s32.f32 %v3110_v29  ;;  %v3111_v51 = vcvt.s32.f32 %v3109_v31 }
0x3acf   :  { %3113 = vmin.xlane.f32.xlu1 %v3112_v48 }
0x3b5c   :  { %v3114_v49 = vpop.xlane.xlu1 %3113 }
0x3b5d   :  { %vm3115_vm9 = vcmp.eq.f32.partialorder %v3112_v48, %v3114_v49  ;;  %v3120_v54 = vcvt.f32.s32 %v3114_v49 }
0x3b5e   :  { %v3116_v52 = vsel %vm3115_vm9, %v3111_v51, inf }
0x3b5f   :  { %3117 = vmin.xlane.f32.xlu1 %v3116_v52  ;;  %v3121_v57 = vshll.u32 %v3120_v54, 16  ;;  %v7106_v54 = vld [vmem:[%s7506_s10] sm:$0xff]  }
0x3bec   :  { %v3118_v46 = vpop.xlane.xlu1 %3117 }
0x3bed   :  { %v3119_v60 = vcvt.f32.s32 %v3118_v46  ;;  %v7115_v46 = vld [vmem:[%s7506_s10 + $0x8] sm:$0xff]  }
0x3bef   :  { %v3122_v62 = vadd.s32 %v3121_v57, %v3119_v60 }
0x3bf1   :  { %v7052_v3 = vsel %vm3125_vm12, %v3122_v62, %v6959_v19  ;;  %vm3128_vm13 = vcmp.eq.s32.totalorder %v6429_v53, %v3122_v62  ;;  %v7068_v19 = vld [vmem:[%s7503_s7 + $0x8] sm:$0xff]  }
0x3bf2   :  { %vm4995_vm14 = vmpackc.low %vm3128_vm13, %vm3128_vm13 }
0x3bf3   :  { %5684 = vmatmul.mubr.msk.bf16.vlgmr.msra.gmra.mrb[84].mxu0 %vm4995_vm14, %v6235_v0 }
0x3bf4   :  { %5722 = vmatpush3.bf16.msra.mxu0 %v7059_v1  ;;  %5725 = vmatprep.mubr.msk.bf16.mxu0 %vm6234_vm1, %v6233_v14 }
0x3bf5   :  { %5723 = vmatprep.subr.bf16.mxu0 %v6233_v14 }
0x3bf8   :  { %5724 = vmatpush3.bf16.msra.mxu0 %v7068_v19 }
0x3bf9   :  { %5749 = vmatprep.subr.mxu0 %v6233_v14 }
0x3cc6   :  { %v3205_v7 = vpop.f32.mrb[84].mxu0 }
0x3cc7   :  { %v3206_v9 = vadd.f32 %v3205_v7, %v7001_v11  ;;  %v5685_v18 = vpop.f32.mrb[85].mxu0 }
0x3cc8   :  { %v3208_v20 = vpop.f32.mrb[86].mxu0 }
0x3cc9   :  { %v3211_v21 = vadd.f32 %v7076_v6, %v3206_v9  ;;  %v5686_v23 = vpop.f32.mrb[87].mxu0 }
0x3cca   :  { %v7134_v23 = vld [vmem:[%s7505_s9 + $0x8] sm:$0xff]  }
0x3ccb   :  { %6060 = vtanh.f32 %v3211_v21  ;;  %v4997_v63 = vmul.f32 -1.442695, %v3211_v21  ;;  %v7125_v21 = vld [vmem:[%s7505_s9] sm:$0xff]  }
0x3ccd   :  { %6062 = vpow2.f32 %v4997_v63  ;;  %v7151_v63 = vld [vmem:[%s7508_s12 + $0x8] sm:$0xff]  }
0x3cd5   :  { %v6061_v24 = vpop.eup %6060 }
0x3cd6   :  { %3221 = vrot.lane.b32.xlu1 %v6061_v24, %s6236_s25  ;;  %v7142_v24 = vld [vmem:[%s7508_s12] sm:$0xff]  }
0x3cd7   :  { %v6063_v16 = vpop.eup %6062 }
0x3cd8   :  { %v3215_v8 = vadd.f32 1.0, %v6063_v16 }
0x3cda   :  { %6064 = vrcp.f32 %v3215_v8 }
0x3ce4   :  { %v6065_v11 = vpop.eup %6064 }
0x3ce5   :  { %v3219_v15 = vmul.f32 %v6065_v11, %v6974_v38 }
0x3d48   :  { %v3222_v25 = vpop.permute.xlu1 %3221 }
0x3d49   :  { %v3224_v12 = vmul.f32 %v6065_v11, %v3222_v25 }
0x3d4b   :  { %3226 = vrot.lane.b32.xlu0 %v3224_v12, %s6237_s5 }
0x3dbd   :  { %v3227_v55 = vpop.permute.xlu0 %3226 }
0x3dbe   :  { %v7082_v26 = vadd.f32 %v3227_v55, %v3219_v15 }
0x3dc0   :  { %6066 = vtanh.f32 %v7082_v26 }
0x3dca   :  { %v6067_v58 = vpop.eup %6066 }
0x3dcb   :  { %3232 = vrot.lane.b32.xlu0 %v6067_v58, %s6236_s25 }
0x3e3d   :  { %v3233_v13 = vpop.permute.xlu0 %3232 }
0x3e3e   :  { %v3235_v56 = vmul.f32 %v6065_v11, %v3233_v13  ;;  %v7155_v13 = vld [vmem:[#allocation3] sm:$0x1] }
0x3e40   :  { %3237 = vrot.lane.b32.xlu0 %v3235_v56, %s6237_s5  ;;  %v3395_v33 = vpack.c.bf16 %v3235_v56, %v3235_v56 }
0x3eb2   :  { %v3238_v28 = vpop.permute.xlu0 %3237 }
0x3eb3   :  { %5690 = vmatmul.mubr.msk.f32.vlgmr.msra.gmra.mrb[84].mxu1 %vm166_vm0, %v3238_v28 }
0x3eb4   :  { %5693 = vmatpush3.msra.mxu1 %v6651_v35  ;;  %5694 = vmatprep.mubr.msk.f32.mxu1 %vm6234_vm1, %v6233_v14 }
0x3eb5   :  { %5697 = vmatprep.subr.bf16.mxu1 %v6233_v14 }
0x3f86   :  { %v3307_v38 = vpop.f32.mrb[84].mxu1 }
0x3f87   :  { %v3308_v17 = vadd.f32 %v3307_v38, %v6667_v40  ;;  %v5691_v36 = vpop.f32.mrb[85].mxu1 }
0x3f89   :  { %v3311_v5 = vsel %vm1532_vm15, %v3308_v17, -inf }
0x3f8a   :  { %3312 = vmax.xlane.f32.xlu0 %v3311_v5  ;;  %v7180_v5 = vld [vmem:[%s7509_s13] sm:$0x1]  ;;  %s6239_s13 = smov [#allocation7]  }
0x3fa0   :  { %3441 = vrot.lane.b32.xlu0 %v3395_v33, %s6237_s5 }
0x4017   :  { %v3313_v41 = vpop.xlane.xlu0 %3312 }
0x4018   :  { %v3314_v45 = vsub.f32 %v3308_v17, %v3313_v41 }
0x401a   :  { %v3315_v43 = vmul.f32 1.442695, %v3314_v45 }
0x401b   :  { %v3442_v29 = vpop.permute.xlu0 %3441 }
0x401c   :  { %6068 = vpow2.f32 %v3315_v43  ;;  %5726 = vmatmul.mubr.msk.bf16.vlgmr.msra.gmra.mrb[88].mxu0 %vm166_vm0, %v3442_v29 }
0x401d   :  { %5750 = vmatpush3.xpose.msk.msra.mxu0 %vm166_vm0, %v6651_v35  ;;  %5751 = vmatprep.mubr.msk.f32.mxu0 %vm6234_vm1, %v6233_v14 }
0x401e   :  { %5754 = vmatprep.subr.mxu0 %v6233_v14 }
0x4026   :  { %v6069_v48 = vpop.eup %6068 }
0x4027   :  { %v3317_v31 = vsel %vm1532_vm15, %v6069_v48, 0.0 }
0x4028   :  { %3318 = vadd.xlane.f32.xlu1 %v3317_v31 }
0x40b5   :  { %v3319_v49 = vpop.xlane.xlu1 %3318 }
0x40b6   :  { %6070 = vrcp.f32 %v3319_v49 }
0x40c0   :  { %v6071_v51 = vpop.eup %6070 }
0x40c1   :  { %v3321_v52 = vmul.f32 %v6071_v51, %v6069_v48 }
0x40c3   :  { %5695 = vmatmul.mubr.msk.f32.vlgmr.msra.gmra.mrb[86].mxu1 %vm1545_vm2, %v3321_v52 }
0x40c4   :  { %5698 = vmatpush3.bf16.msra.mxu1 %v7106_v54  ;;  %5701 = vmatprep.mubr.msk.bf16.mxu1 %vm6234_vm1, %v6233_v14 }
0x40c5   :  { %5699 = vmatprep.subr.bf16.mxu1 %v6233_v14 }
0x40c8   :  { %5700 = vmatpush3.bf16.msra.mxu1 %v7115_v46 }
0x40c9   :  { %5705 = vmatprep.subr.bf16.mxu1 %v6233_v14 }
0x40ef   :  { %v7119_v57 = vpop.f32.mrb[88].mxu0 }
0x40f0   :  { %v5727_v60 = vpop.f32.mrb[89].mxu0 }
0x40f1   :  { %v3603_v62 = vpop.f32.mrb[90].mxu0 }
0x40f2   :  { %v5728_v7 = vpop.f32.mrb[91].mxu0 }
0x4196   :  { %v3391_v9 = vpop.f32.mrb[86].mxu1 }
0x4197   :  { %v3396_v18 = vpack.c.bf16 %v3391_v9, %v3391_v9  ;;  %v5696_v20 = vpop.f32.mrb[87].mxu1 }
0x4199   :  { %5702 = vmatmul.mubr.msk.bf16.vlgmr.msra.gmra.mrb[88].mxu1 %vm166_vm0, %v3396_v18 }
0x419a   :  { %5706 = vmatpush3.bf16.msra.mxu1 %v7125_v21  ;;  %5709 = vmatprep.mubr.msk.bf16.mxu1 %vm6234_vm1, %v6233_v14 }
0x419b   :  { %5707 = vmatprep.subr.bf16.mxu1 %v6233_v14 }
0x419e   :  { %5708 = vmatpush3.bf16.msra.mxu1 %v7134_v23 }
0x419f   :  { %5713 = vmatprep.subr.bf16.mxu1 %v6233_v14 }
0x41a1   :  { %5710 = vmatmul.mubr.msk.bf16.vlgmr.msra.gmra.mrb[92].mxu1 %vm166_vm0, %v3442_v29 }
0x41a2   :  { %5714 = vmatpush3.bf16.msra.mxu1 %v7142_v24  ;;  %5717 = vmatprep.mubr.msk.bf16.mxu1 %vm6234_vm1, %v6233_v14 }
0x41a3   :  { %5715 = vmatprep.subr.bf16.mxu1 %v6233_v14 }
0x41a6   :  { %5716 = vmatpush3.bf16.msra.mxu1 %v7151_v63 }
0x41a7   :  { %5729 = vmatprep.subr.bf16.mxu1 %v6233_v14 }
0x426c   :  { %v3434_v16 = vpop.f32.mrb[88].mxu1 }
0x426d   :  { %v5703_v8 = vpop.f32.mrb[89].mxu1 }
0x426e   :  { %v3437_v11 = vpop.f32.mrb[90].mxu1 }
0x426f   :  { %v5704_v25 = vpop.f32.mrb[91].mxu1 }
0x4274   :  { %v3480_v12 = vpop.f32.mrb[92].mxu1 }
0x4275   :  { %v3481_v15 = vadd.f32 %v3480_v12, %v3434_v16  ;;  %v5711_v55 = vpop.f32.mrb[93].mxu1 }
0x4276   :  { %v3483_v58 = vpop.f32.mrb[94].mxu1 }
0x4277   :  { %v3486_v56 = vadd.f32 %v7155_v13, %v3481_v15  ;;  %v5712_v28 = vpop.f32.mrb[95].mxu1 }
0x4279   :  { %6072 = vtanh.f32 %v3486_v56 }
0x4283   :  { %v6073_v38 = vpop.eup %6072 }
0x4284   :  { %v3488_v17 = vpack.c.bf16 %v6073_v38, %v6073_v38 }
0x4286   :  { %5718 = vmatmul.mubr.msk.bf16.vlgmr.msra.gmra.mrb[96].mxu1 %vm166_vm0, %v3488_v17 }
0x4287   :  { %5730 = vmatpush3.bf16.msra.mxu1 %v6419_v34  ;;  %5745 = vmatprep.mubr.msk.bf16.mxu1 %vm6234_vm1, %v6233_v14 }
0x4288   :  { %5731 = vmatprep.subr.bf16.mxu1 %v6233_v14 }
0x428b   :  { %5732 = vmatpush3.bf16.msra.mxu1 %v6416_v32 }
0x428c   :  { %5733 = vmatprep.subr.bf16.mxu1 %v6233_v14 }
0x428f   :  { %5734 = vmatpush3.bf16.msra.mxu1 %v6425_v47 }
0x4290   :  { %5735 = vmatprep.subr.bf16.mxu1 %v6233_v14 }
0x4293   :  { %5736 = vmatpush3.bf16.msra.mxu1 %v6422_v44 }
0x4294   :  { %5737 = vmatprep.subr.bf16.mxu1 %v6233_v14 }
0x4297   :  { %5738 = vmatpush3.bf16.msra.mxu1 %v6435_v61 }
0x4298   :  { %5739 = vmatprep.subr.bf16.mxu1 %v6233_v14 }
0x429b   :  { %5740 = vmatpush3.bf16.msra.mxu1 %v6431_v59 }
0x429c   :  { %5741 = vmatprep.subr.bf16.mxu1 %v6233_v14 }
0x429f   :  { %5742 = vmatpush3.bf16.msra.mxu1 %v6444_v4 }
0x42a0   :  { %5743 = vmatprep.subr.bf16.mxu1 %v6233_v14 }
0x42a3   :  { %5744 = vmatpush3.bf16.msra.mxu1 %v6439_v2 }
0x42a4   :  { %5783 = vmatprep.subr.bf16.mxu1 %v6233_v14 }
0x4359   :  { %v3526_v36 = vpop.f32.mrb[96].mxu1 }
0x435a   :  { %v7183_v33 = vadd.f32 %v7180_v5, %v3526_v36  ;;  %v5719_v41 = vpop.f32.mrb[97].mxu1 }
0x435b   :  { %v3529_v45 = vpop.f32.mrb[98].mxu1 }
0x435c   :  { %v5720_v43 = vpop.f32.mrb[99].mxu1  ;;  %v3532_v29 = vsel %vm1792_vm3, %v7183_v33, -inf }
0x435d   :  { %3533 = vmax.xlane.f32.xlu1 %v3532_v29 }
0x43ea   :  { %v7187_v48 = vpop.xlane.xlu1 %3533 }
0x43eb   :  { %vm3541_vm4 = vcmp.eq.f32.partialorder %v7183_v33, %v7187_v48 }
0x43ec   :  { %v3542_v31 = vsel %vm3541_vm4, %v6429_v53, 128  ;;  %vm3995_vm4 = vcmp.eq.s32.totalorder %v6429_v53, 5 }
0x43ed   :  { %v3543_v49 = vsel %vm1792_vm3, %v3542_v31, 2147483647 }
0x43ee   :  { %v3545_v51 = vshra.s32 %v3543_v49, 16  ;;  %v3544_v60 = vand.u32 65535, %v3543_v49 }
0x43f0   :  { %v3547_v52 = vcvt.s32.f32 %v3545_v51  ;;  %v3546_v7 = vcvt.s32.f32 %v3544_v60 }
0x43f2   :  { %3548 = vmin.xlane.f32.xlu1 %v3547_v52 }
0x447f   :  { %v3549_v62 = vpop.xlane.xlu1 %3548 }
0x4480   :  { %vm3550_vm6 = vcmp.eq.f32.partialorder %v3547_v52, %v3549_v62  ;;  %v3555_v18 = vcvt.f32.s32 %v3549_v62 }
0x4481   :  { %v3551_v9 = vsel %vm3550_vm6, %v3546_v7, inf }
0x4482   :  { %3552 = vmin.xlane.f32.xlu1 %v3551_v9  ;;  %v3556_v16 = vshll.u32 %v3555_v18, 16 }
0x450f   :  { %v3553_v20 = vpop.xlane.xlu1 %3552 }
0x4510   :  { %v3554_v8 = vcvt.f32.s32 %v3553_v20 }
0x4512   :  { %v3557_v11 = vadd.s32 %v3556_v16, %v3554_v8 }
0x4514   :  { %v7197_v25 = vsel %vm3560_vm7, %v3557_v11, %v7052_v3  ;;  %vm3563_vm8 = vcmp.eq.s32.totalorder %v6429_v53, %v3557_v11 }
0x4515   :  { %vm5005_vm9 = vmpackc.low %vm3563_vm8, %vm3563_vm8 }
0x4516   :  { %5746 = vmatmul.mubr.msk.bf16.vlgmr.msra.gmra.mrb[100].mxu1 %vm5005_vm9, %v6235_v0 }
0x4517   :  { %5784 = vmatpush3.bf16.msra.mxu1 %v7059_v1  ;;  %5787 = vmatprep.mubr.msk.bf16.mxu1 %vm6234_vm1, %v6233_v14 }
0x4518   :  { %5785 = vmatprep.subr.bf16.mxu1 %v6233_v14 }
0x451b   :  { %5786 = vmatpush3.bf16.msra.mxu1 %v7068_v19 }
0x451c   :  { %5811 = vmatprep.subr.mxu1 %v6233_v14 }
0x45e9   :  { %v3640_v12 = vpop.f32.mrb[100].mxu1 }
0x45ea   :  { %v3641_v3 = vadd.f32 %v3640_v12, %v7119_v57  ;;  %v5747_v15 = vpop.f32.mrb[101].mxu1 }
0x45eb   :  { %v3643_v55 = vpop.f32.mrb[102].mxu1 }
0x45ec   :  { %v3646_v58 = vadd.f32 %v7076_v6, %v3641_v3  ;;  %v5748_v56 = vpop.f32.mrb[103].mxu1 }
0x45ee   :  { %6074 = vtanh.f32 %v3646_v58  ;;  %v5007_v38 = vmul.f32 -1.442695, %v3646_v58 }
0x45f0   :  { %6076 = vpow2.f32 %v5007_v38 }
0x45f8   :  { %v6075_v28 = vpop.eup %6074 }
0x45f9   :  { %3656 = vrot.lane.b32.xlu1 %v6075_v28, %s6236_s25 }
0x45fa   :  { %v6077_v17 = vpop.eup %6076 }
0x45fb   :  { %v3650_v36 = vadd.f32 1.0, %v6077_v17 }
0x45fd   :  { %6078 = vrcp.f32 %v3650_v36 }
0x4607   :  { %v6079_v41 = vpop.eup %6078 }
0x4608   :  { %v3654_v57 = vmul.f32 %v6079_v41, %v7082_v26 }
0x466b   :  { %v3657_v45 = vpop.permute.xlu1 %3656 }
0x466c   :  { %v3659_v43 = vmul.f32 %v6079_v41, %v3657_v45 }
0x466e   :  { %3661 = vrot.lane.b32.xlu0 %v3659_v43, %s6237_s5 }
0x46e0   :  { %v3662_v29 = vpop.permute.xlu0 %3661 }
0x46e1   :  { %v7212_v31 = vadd.f32 %v3662_v29, %v3654_v57 }
0x46e3   :  { %6080 = vtanh.f32 %v7212_v31 }
0x46ed   :  { %v6081_v49 = vpop.eup %6080 }
0x46ee   :  { %3667 = vrot.lane.b32.xlu0 %v6081_v49, %s6236_s25 }
0x4760   :  { %v3668_v51 = vpop.permute.xlu0 %3667 }
0x4761   :  { %v3670_v52 = vmul.f32 %v6079_v41, %v3668_v51 }
0x4763   :  { %3672 = vrot.lane.b32.xlu0 %v3670_v52, %s6237_s5  ;;  %v3830_v18 = vpack.c.bf16 %v3670_v52, %v3670_v52 }
0x47d5   :  { %v3673_v60 = vpop.permute.xlu0 %3672 }
0x47d6   :  { %5752 = vmatmul.mubr.msk.f32.vlgmr.msra.gmra.mrb[92].mxu0 %vm166_vm0, %v3673_v60 }
0x47d7   :  { %5755 = vmatpush3.msra.mxu0 %v6651_v35  ;;  %5756 = vmatprep.mubr.msk.f32.mxu0 %vm6234_vm1, %v6233_v14 }
0x47d8   :  { %5759 = vmatprep.subr.bf16.mxu0 %v6233_v14 }
0x48a9   :  { %v3742_v26 = vpop.f32.mrb[92].mxu0 }
0x48aa   :  { %v3743_v62 = vadd.f32 %v3742_v26, %v6667_v40  ;;  %v5753_v7 = vpop.f32.mrb[93].mxu0 }
0x48ac   :  { %v3746_v9 = vsel %vm1532_vm15, %v3743_v62, -inf }
0x48ad   :  { %3747 = vmax.xlane.f32.xlu0 %v3746_v9 }
0x48c3   :  { %3876 = vrot.lane.b32.xlu0 %v3830_v18, %s6237_s5 }
0x493a   :  { %v3748_v20 = vpop.xlane.xlu0 %3747 }
0x493b   :  { %v3749_v16 = vsub.f32 %v3743_v62, %v3748_v20 }
0x493d   :  { %v3750_v8 = vmul.f32 1.442695, %v3749_v16 }
0x493e   :  { %v3877_v11 = vpop.permute.xlu0 %3876 }
0x493f   :  { %6082 = vpow2.f32 %v3750_v8  ;;  %5788 = vmatmul.mubr.msk.bf16.vlgmr.msra.gmra.mrb[104].mxu1 %vm166_vm0, %v3877_v11 }
0x4940   :  { %5812 = vmatpush3.xpose.msk.msra.mxu1 %vm166_vm0, %v6651_v35  ;;  %5813 = vmatprep.mubr.msk.f32.mxu1 %vm6234_vm1, %v6233_v14 }
0x4941   :  { %5816 = vmatprep.subr.mxu1 %v6233_v14 }
0x4949   :  { %v6083_v12 = vpop.eup %6082 }
0x494a   :  { %v3752_v3 = vsel %vm1532_vm15, %v6083_v12, 0.0 }
0x494b   :  { %3753 = vadd.xlane.f32.xlu1 %v3752_v3 }
0x49d8   :  { %v3754_v15 = vpop.xlane.xlu1 %3753 }
0x49d9   :  { %6084 = vrcp.f32 %v3754_v15 }
0x49e3   :  { %v6085_v55 = vpop.eup %6084 }
0x49e4   :  { %v3756_v58 = vmul.f32 %v6085_v55, %v6083_v12 }
0x49e6   :  { %5757 = vmatmul.mubr.msk.f32.vlgmr.msra.gmra.mrb[94].mxu0 %vm1545_vm2, %v3756_v58 }
0x49e7   :  { %5760 = vmatpush3.bf16.msra.mxu0 %v7106_v54  ;;  %5763 = vmatprep.mubr.msk.bf16.mxu0 %vm6234_vm1, %v6233_v14 }
0x49e8   :  { %5761 = vmatprep.subr.bf16.mxu0 %v6233_v14 }
0x49eb   :  { %5762 = vmatpush3.bf16.msra.mxu0 %v7115_v46 }
0x49ec   :  { %5767 = vmatprep.subr.bf16.mxu0 %v6233_v14 }
0x4a12   :  { %v7239_v56 = vpop.f32.mrb[104].mxu1 }
0x4a13   :  { %v5789_v28 = vpop.f32.mrb[105].mxu1 }
0x4a14   :  { %v4038_v38 = vpop.f32.mrb[106].mxu1 }
0x4a15   :  { %v5790_v17 = vpop.f32.mrb[107].mxu1 }
0x4ab9   :  { %v3826_v36 = vpop.f32.mrb[94].mxu0 }
0x4aba   :  { %v3831_v41 = vpack.c.bf16 %v3826_v36, %v3826_v36  ;;  %v5758_v45 = vpop.f32.mrb[95].mxu0 }
0x4abc   :  { %5764 = vmatmul.mubr.msk.bf16.vlgmr.msra.gmra.mrb[96].mxu0 %vm166_vm0, %v3831_v41 }
0x4abd   :  { %5768 = vmatpush3.bf16.msra.mxu0 %v7125_v21  ;;  %5771 = vmatprep.mubr.msk.bf16.mxu0 %vm6234_vm1, %v6233_v14 }
0x4abe   :  { %5769 = vmatprep.subr.bf16.mxu0 %v6233_v14 }
0x4ac1   :  { %5770 = vmatpush3.bf16.msra.mxu0 %v7134_v23 }
0x4ac2   :  { %5775 = vmatprep.subr.bf16.mxu0 %v6233_v14 }
0x4ac4   :  { %5772 = vmatmul.mubr.msk.bf16.vlgmr.msra.gmra.mrb[100].mxu0 %vm166_vm0, %v3877_v11 }
0x4ac5   :  { %5776 = vmatpush3.bf16.msra.mxu0 %v7142_v24  ;;  %5779 = vmatprep.mubr.msk.bf16.mxu0 %vm6234_vm1, %v6233_v14 }
0x4ac6   :  { %5777 = vmatprep.subr.bf16.mxu0 %v6233_v14 }
0x4ac9   :  { %5778 = vmatpush3.bf16.msra.mxu0 %v7151_v63 }
0x4aca   :  { %5791 = vmatprep.subr.bf16.mxu0 %v6233_v14 }
0x4b8f   :  { %v3869_v43 = vpop.f32.mrb[96].mxu0 }
0x4b90   :  { %v5765_v57 = vpop.f32.mrb[97].mxu0 }
0x4b91   :  { %v3872_v29 = vpop.f32.mrb[98].mxu0 }
0x4b92   :  { %v5766_v49 = vpop.f32.mrb[99].mxu0 }
0x4b97   :  { %v3915_v51 = vpop.f32.mrb[100].mxu0 }
0x4b98   :  { %v3916_v52 = vadd.f32 %v3915_v51, %v3869_v43  ;;  %v5773_v60 = vpop.f32.mrb[101].mxu0 }
0x4b99   :  { %v3918_v26 = vpop.f32.mrb[102].mxu0 }
0x4b9a   :  { %v3921_v62 = vadd.f32 %v7155_v13, %v3916_v52  ;;  %v5774_v7 = vpop.f32.mrb[103].mxu0 }
0x4b9c   :  { %6086 = vtanh.f32 %v3921_v62 }
0x4ba6   :  { %v6087_v9 = vpop.eup %6086 }
0x4ba7   :  { %v3923_v18 = vpack.c.bf16 %v6087_v9, %v6087_v9 }
0x4ba9   :  { %5780 = vmatmul.mubr.msk.bf16.vlgmr.msra.gmra.mrb[104].mxu0 %vm166_vm0, %v3923_v18 }
0x4baa   :  { %5792 = vmatpush3.bf16.msra.mxu0 %v6419_v34  ;;  %5807 = vmatprep.mubr.msk.bf16.mxu0 %vm6234_vm1, %v6233_v14 }
0x4bab   :  { %5793 = vmatprep.subr.bf16.mxu0 %v6233_v14 }
0x4bae   :  { %5794 = vmatpush3.bf16.msra.mxu0 %v6416_v32 }
0x4baf   :  { %5795 = vmatprep.subr.bf16.mxu0 %v6233_v14 }
0x4bb2   :  { %5796 = vmatpush3.bf16.msra.mxu0 %v6425_v47 }
0x4bb3   :  { %5797 = vmatprep.subr.bf16.mxu0 %v6233_v14 }
0x4bb6   :  { %5798 = vmatpush3.bf16.msra.mxu0 %v6422_v44 }
0x4bb7   :  { %5799 = vmatprep.subr.bf16.mxu0 %v6233_v14 }
0x4bba   :  { %5800 = vmatpush3.bf16.msra.mxu0 %v6435_v61 }
0x4bbb   :  { %5801 = vmatprep.subr.bf16.mxu0 %v6233_v14 }
0x4bbe   :  { %5802 = vmatpush3.bf16.msra.mxu0 %v6431_v59 }
0x4bbf   :  { %5803 = vmatprep.subr.bf16.mxu0 %v6233_v14 }
0x4bc2   :  { %5804 = vmatpush3.bf16.msra.mxu0 %v6444_v4 }
0x4bc3   :  { %5805 = vmatprep.subr.bf16.mxu0 %v6233_v14 }
0x4bc6   :  { %5806 = vmatpush3.bf16.msra.mxu0 %v6439_v2 }
0x4bc7   :  { %5845 = vmatprep.subr.bf16.mxu0 %v6233_v14 }
0x4c7c   :  { %v3961_v20 = vpop.f32.mrb[104].mxu0 }
0x4c7d   :  { %v7276_v16 = vadd.f32 %v7180_v5, %v3961_v20  ;;  %v5781_v8 = vpop.f32.mrb[105].mxu0 }
0x4c7e   :  { %v3964_v11 = vpop.f32.mrb[106].mxu0 }
0x4c7f   :  { %v5782_v12 = vpop.f32.mrb[107].mxu0  ;;  %v3967_v3 = vsel %vm1792_vm3, %v7276_v16, -inf }
0x4c80   :  { %3968 = vmax.xlane.f32.xlu1 %v3967_v3 }
0x4d0d   :  { %v7280_v15 = vpop.xlane.xlu1 %3968 }
0x4d0e   :  { %vm3976_vm13 = vcmp.eq.f32.partialorder %v7276_v16, %v7280_v15 }
0x4d0f   :  { %v3977_v55 = vsel %vm3976_vm13, %v6429_v53, 128 }
0x4d10   :  { %v3978_v58 = vsel %vm1792_vm3, %v3977_v55, 2147483647 }
0x4d11   :  { %v3980_v28 = vshra.s32 %v3978_v58, 16  ;;  %v3979_v17 = vand.u32 65535, %v3978_v58 }
0x4d13   :  { %v3982_v38 = vcvt.s32.f32 %v3980_v28  ;;  %v3981_v41 = vcvt.s32.f32 %v3979_v17 }
0x4d15   :  { %3983 = vmin.xlane.f32.xlu1 %v3982_v38 }
0x4da2   :  { %v3984_v36 = vpop.xlane.xlu1 %3983 }
0x4da3   :  { %vm3985_vm14 = vcmp.eq.f32.partialorder %v3982_v38, %v3984_v36  ;;  %v3990_v43 = vcvt.f32.s32 %v3984_v36 }
0x4da4   :  { %v3986_v45 = vsel %vm3985_vm14, %v3981_v41, inf  ;;  %vm4430_vm14 = vcmp.eq.s32.totalorder %v6429_v53, 6 }
0x4da5   :  { %3987 = vmin.xlane.f32.xlu1 %v3986_v45  ;;  %v3991_v29 = vshll.u32 %v3990_v43, 16 }
0x4e32   :  { %v3988_v57 = vpop.xlane.xlu1 %3987 }
0x4e33   :  { %v3989_v49 = vcvt.f32.s32 %v3988_v57 }
0x4e35   :  { %v3992_v51 = vadd.s32 %v3991_v29, %v3989_v49 }
0x4e37   :  { %v7290_v52 = vsel %vm3995_vm4, %v3992_v51, %v7197_v25  ;;  %vm3998_vm6 = vcmp.eq.s32.totalorder %v6429_v53, %v3992_v51 }
0x4e38   :  { %vm5015_vm8 = vmpackc.low %vm3998_vm6, %vm3998_vm6 }
0x4e39   :  { %5808 = vmatmul.mubr.msk.bf16.vlgmr.msra.gmra.mrb[108].mxu0 %vm5015_vm8, %v6235_v0 }
0x4e3a   :  { %5846 = vmatpush3.bf16.msra.mxu0 %v7059_v1  ;;  %5849 = vmatprep.mubr.msk.bf16.mxu0 %vm6234_vm1, %v6233_v14 }
0x4e3b   :  { %5847 = vmatprep.subr.bf16.mxu0 %v6233_v14 }
0x4e3e   :  { %5848 = vmatpush3.bf16.msra.mxu0 %v7068_v19 }
0x4e3f   :  { %5878 = vmatprep.subr.mxu0 %v6233_v14 }
0x4f0c   :  { %v4075_v60 = vpop.f32.mrb[108].mxu0 }
0x4f0d   :  { %v4076_v25 = vadd.f32 %v4075_v60, %v7239_v56  ;;  %v5809_v26 = vpop.f32.mrb[109].mxu0 }
0x4f0e   :  { %v4078_v62 = vpop.f32.mrb[110].mxu0 }
0x4f0f   :  { %v4081_v7 = vadd.f32 %v7076_v6, %v4076_v25  ;;  %v5810_v9 = vpop.f32.mrb[111].mxu0 }
0x4f11   :  { %6088 = vtanh.f32 %v4081_v7  ;;  %v5017_v1 = vmul.f32 -1.442695, %v4081_v7 }
0x4f13   :  { %6090 = vpow2.f32 %v5017_v1 }
0x4f1b   :  { %v6089_v18 = vpop.eup %6088 }
0x4f1c   :  { %4091 = vrot.lane.b32.xlu1 %v6089_v18, %s6236_s25 }
0x4f1d   :  { %v6091_v20 = vpop.eup %6090 }
0x4f1e   :  { %v4085_v8 = vadd.f32 1.0, %v6091_v20 }
0x4f20   :  { %6092 = vrcp.f32 %v4085_v8 }
0x4f2a   :  { %v6093_v19 = vpop.eup %6092 }
0x4f2b   :  { %v4089_v56 = vmul.f32 %v6093_v19, %v7212_v31 }
0x4f8e   :  { %v4092_v11 = vpop.permute.xlu1 %4091 }
0x4f8f   :  { %v4094_v12 = vmul.f32 %v6093_v19, %v4092_v11 }
0x4f91   :  { %4096 = vrot.lane.b32.xlu0 %v4094_v12, %s6237_s5 }
0x5003   :  { %v4097_v3 = vpop.permute.xlu0 %4096 }
0x5004   :  { %v7305_v55 = vadd.f32 %v4097_v3, %v4089_v56 }
0x5006   :  { %6094 = vtanh.f32 %v7305_v55 }
0x5010   :  { %v6095_v58 = vpop.eup %6094 }
0x5011   :  { %4102 = vrot.lane.b32.xlu0 %v6095_v58, %s6236_s25 }
0x5083   :  { %v4103_v28 = vpop.permute.xlu0 %4102 }
0x5084   :  { %v4105_v38 = vmul.f32 %v6093_v19, %v4103_v28 }
0x5086   :  { %4107 = vrot.lane.b32.xlu0 %v4105_v38, %s6237_s5  ;;  %v4265_v43 = vpack.c.bf16 %v4105_v38, %v4105_v38 }
0x50f8   :  { %v4108_v17 = vpop.permute.xlu0 %4107 }
0x50f9   :  { %5814 = vmatmul.mubr.msk.f32.vlgmr.msra.gmra.mrb[108].mxu1 %vm166_vm0, %v4108_v17 }
0x50fa   :  { %5817 = vmatpush3.msra.mxu1 %v6651_v35  ;;  %5818 = vmatprep.mubr.msk.f32.mxu1 %vm6234_vm1, %v6233_v14 }
0x50fb   :  { %5821 = vmatprep.subr.bf16.mxu1 %v6233_v14 }
0x51cc   :  { %v4177_v31 = vpop.f32.mrb[108].mxu1 }
0x51cd   :  { %v4178_v36 = vadd.f32 %v4177_v31, %v6667_v40  ;;  %v5815_v41 = vpop.f32.mrb[109].mxu1 }
0x51cf   :  { %v4181_v45 = vsel %vm1532_vm15, %v4178_v36, -inf }
0x51d0   :  { %4182 = vmax.xlane.f32.xlu0 %v4181_v45 }
0x51e6   :  { %4311 = vrot.lane.b32.xlu0 %v4265_v43, %s6237_s5 }
0x525d   :  { %v4183_v57 = vpop.xlane.xlu0 %4182 }
0x525e   :  { %v4184_v29 = vsub.f32 %v4178_v36, %v4183_v57 }
0x5260   :  { %v4185_v49 = vmul.f32 1.442695, %v4184_v29 }
0x5261   :  { %v4312_v51 = vpop.permute.xlu0 %4311 }
0x5262   :  { %6096 = vpow2.f32 %v4185_v49  ;;  %5850 = vmatmul.mubr.msk.bf16.vlgmr.msra.gmra.mrb[112].mxu0 %vm166_vm0, %v4312_v51 }
0x5263   :  { %5879 = vmatpush3.msra.mxu0 %v6651_v35  ;;  %5880 = vmatprep.mubr.msk.f32.mxu0 %vm6234_vm1, %v6233_v14 }
0x5264   :  { %5883 = vmatprep.subr.bf16.mxu0 %v6233_v14 }
0x526c   :  { %v6097_v60 = vpop.eup %6096 }
0x526d   :  { %v4187_v25 = vsel %vm1532_vm15, %v6097_v60, 0.0 }
0x526e   :  { %4188 = vadd.xlane.f32.xlu1 %v4187_v25 }
0x52fb   :  { %v4189_v26 = vpop.xlane.xlu1 %4188 }
0x52fc   :  { %6098 = vrcp.f32 %v4189_v26 }
0x5306   :  { %v6099_v62 = vpop.eup %6098 }
0x5307   :  { %v4191_v7 = vmul.f32 %v6099_v62, %v6097_v60 }
0x5309   :  { %5819 = vmatmul.mubr.msk.f32.vlgmr.msra.gmra.mrb[110].mxu1 %vm1545_vm2, %v4191_v7 }
0x530a   :  { %5822 = vmatpush3.bf16.msra.mxu1 %v7106_v54  ;;  %5825 = vmatprep.mubr.msk.bf16.mxu1 %vm6234_vm1, %v6233_v14 }
0x530b   :  { %5823 = vmatprep.subr.bf16.mxu1 %v6233_v14 }
0x530e   :  { %5824 = vmatpush3.bf16.msra.mxu1 %v7115_v46 }
0x530f   :  { %5829 = vmatprep.subr.bf16.mxu1 %v6233_v14 }
0x5335   :  { %v7331_v9 = vpop.f32.mrb[112].mxu0 }
0x5336   :  { %v5851_v18 = vpop.f32.mrb[113].mxu0 }
0x5337   :  { %v4473_v1 = vpop.f32.mrb[114].mxu0 }
0x5338   :  { %v5852_v20 = vpop.f32.mrb[115].mxu0 }
0x53dc   :  { %v4261_v8 = vpop.f32.mrb[110].mxu1 }
0x53dd   :  { %v4266_v19 = vpack.c.bf16 %v4261_v8, %v4261_v8  ;;  %v5820_v11 = vpop.f32.mrb[111].mxu1 }
0x53df   :  { %5826 = vmatmul.mubr.msk.bf16.vlgmr.msra.gmra.mrb[112].mxu1 %vm166_vm0, %v4266_v19 }
0x53e0   :  { %5830 = vmatpush3.bf16.msra.mxu1 %v7125_v21  ;;  %5833 = vmatprep.mubr.msk.bf16.mxu1 %vm6234_vm1, %v6233_v14 }
0x53e1   :  { %5831 = vmatprep.subr.bf16.mxu1 %v6233_v14 }
0x53e4   :  { %5832 = vmatpush3.bf16.msra.mxu1 %v7134_v23 }
0x53e5   :  { %5837 = vmatprep.subr.bf16.mxu1 %v6233_v14 }
0x53e7   :  { %5834 = vmatmul.mubr.msk.bf16.vlgmr.msra.gmra.mrb[116].mxu1 %vm166_vm0, %v4312_v51 }
0x53e8   :  { %5838 = vmatpush3.bf16.msra.mxu1 %v7142_v24  ;;  %5841 = vmatprep.mubr.msk.bf16.mxu1 %vm6234_vm1, %v6233_v14 }
0x53e9   :  { %5839 = vmatprep.subr.bf16.mxu1 %v6233_v14 }
0x53ec   :  { %5840 = vmatpush3.bf16.msra.mxu1 %v7151_v63 }
0x53ed   :  { %5853 = vmatprep.subr.bf16.mxu1 %v6233_v14 }
0x54b2   :  { %v4304_v12 = vpop.f32.mrb[112].mxu1 }
0x54b3   :  { %v5827_v56 = vpop.f32.mrb[113].mxu1 }
0x54b4   :  { %v4307_v3 = vpop.f32.mrb[114].mxu1 }
0x54b5   :  { %v5828_v58 = vpop.f32.mrb[115].mxu1 }
0x54ba   :  { %v4350_v28 = vpop.f32.mrb[116].mxu1 }
0x54bb   :  { %v4351_v38 = vadd.f32 %v4350_v28, %v4304_v12  ;;  %v5835_v17 = vpop.f32.mrb[117].mxu1 }
0x54bc   :  { %v4353_v31 = vpop.f32.mrb[118].mxu1 }
0x54bd   :  { %v4356_v36 = vadd.f32 %v7155_v13, %v4351_v38  ;;  %v5836_v41 = vpop.f32.mrb[119].mxu1 }
0x54bf   :  { %6100 = vtanh.f32 %v4356_v36 }
0x54c9   :  { %v6101_v45 = vpop.eup %6100 }
0x54ca   :  { %v4358_v43 = vpack.c.bf16 %v6101_v45, %v6101_v45 }
0x54cc   :  { %5842 = vmatmul.mubr.msk.bf16.vlgmr.msra.gmra.mrb[120].mxu1 %vm166_vm0, %v4358_v43 }
0x54cd   :  { %5854 = vmatpush3.bf16.msra.mxu1 %v6419_v34  ;;  %5869 = vmatprep.mubr.msk.bf16.mxu1 %vm6234_vm1, %v6233_v14 }
0x54ce   :  { %5855 = vmatprep.subr.bf16.mxu1 %v6233_v14 }
0x54d1   :  { %5856 = vmatpush3.bf16.msra.mxu1 %v6416_v32 }
0x54d2   :  { %5857 = vmatprep.subr.bf16.mxu1 %v6233_v14 }
0x54d5   :  { %5858 = vmatpush3.bf16.msra.mxu1 %v6425_v47 }
0x54d6   :  { %5859 = vmatprep.subr.bf16.mxu1 %v6233_v14 }
0x54d9   :  { %5860 = vmatpush3.bf16.msra.mxu1 %v6422_v44 }
0x54da   :  { %5861 = vmatprep.subr.bf16.mxu1 %v6233_v14 }
0x54dd   :  { %5862 = vmatpush3.bf16.msra.mxu1 %v6435_v61 }
0x54de   :  { %5863 = vmatprep.subr.bf16.mxu1 %v6233_v14 }
0x54e1   :  { %5864 = vmatpush3.bf16.msra.mxu1 %v6431_v59 }
0x54e2   :  { %5865 = vmatprep.subr.bf16.mxu1 %v6233_v14 }
0x54e5   :  { %5866 = vmatpush3.bf16.msra.mxu1 %v6444_v4 }
0x54e6   :  { %5867 = vmatprep.subr.bf16.mxu1 %v6233_v14 }
0x54e9   :  { %5868 = vmatpush3.bf16.msra.mxu1 %v6439_v2 }
0x54ea   :  { %5873 = vmatprep.subr.mxu1 %v6233_v14 }
0x559f   :  { %v4396_v32 = vpop.f32.mrb[120].mxu1 }
0x55a0   :  { %v7368_v34 = vadd.f32 %v7180_v5, %v4396_v32  ;;  %v5843_v44 = vpop.f32.mrb[121].mxu1 }
0x55a1   :  { %v4399_v47 = vpop.f32.mrb[122].mxu1 }
0x55a2   :  { %v5844_v61 = vpop.f32.mrb[123].mxu1  ;;  %v4402_v59 = vsel %vm1792_vm3, %v7368_v34, -inf }
0x55a3   :  { %4403 = vmax.xlane.f32.xlu1 %v4402_v59 }
0x5630   :  { %v7372_v57 = vpop.xlane.xlu1 %4403 }
0x5631   :  { %vm4411_vm9 = vcmp.eq.f32.partialorder %v7368_v34, %v7372_v57 }
0x5632   :  { %v4412_v2 = vsel %vm4411_vm9, %v6429_v53, 128 }
0x5633   :  { %v4413_v4 = vsel %vm1792_vm3, %v4412_v2, 2147483647  ;;  %v3100_v2 = vsub.f32 %v7038_v22, %v7042_v39 }
0x5634   :  { %v4415_v29 = vshra.s32 %v4413_v4, 16  ;;  %v4414_v51 = vand.u32 65535, %v4413_v4 }
0x5635   :  { %v3101_v4 = vmul.f32 1.442695, %v3100_v2 }
0x5636   :  { %v4417_v49 = vcvt.s32.f32 %v4415_v29  ;;  %v4416_v25 = vcvt.s32.f32 %v4414_v51 }
0x5638   :  { %4418 = vmin.xlane.f32.xlu1 %v4417_v49 }
0x56c5   :  { %v4419_v60 = vpop.xlane.xlu1 %4418 }
0x56c6   :  { %vm4420_vm13 = vcmp.eq.f32.partialorder %v4417_v49, %v4419_v60  ;;  %v4425_v62 = vcvt.f32.s32 %v4419_v60 }
0x56c7   :  { %v4421_v26 = vsel %vm4420_vm13, %v4416_v25, inf }
0x56c8   :  { %4422 = vmin.xlane.f32.xlu1 %v4421_v26  ;;  %v4426_v18 = vshll.u32 %v4425_v62, 16 }
0x5755   :  { %v4423_v7 = vpop.xlane.xlu1 %4422 }
0x5756   :  { %v4424_v1 = vcvt.f32.s32 %v4423_v7 }
0x5758   :  { %v4427_v20 = vadd.s32 %v4426_v18, %v4424_v1 }
0x575a   :  { %vm4433_vm6 = vcmp.eq.s32.totalorder %v6429_v53, %v4427_v20  ;;  %v7383_v8 = vsel %vm4430_vm14, %v4427_v20, %v7290_v52 }
0x575b   :  { %vm5025_vm8 = vmpackc.low %vm4433_vm6, %vm4433_vm6 }
0x575c   :  { %5870 = vmatmul.mubr.msk.bf16.vlgmr.msra.gmra.mrb[124].mxu1 %vm5025_vm8, %v6235_v0 }
0x575d   :  { %5874 = vmatpush3.xpose.msk.msra.mxu1 %vm166_vm0, %v6651_v35  ;;  %5875 = vmatprep.mubr.msk.f32.mxu1 %vm6234_vm1, %v6233_v14 }
0x582f   :  { %v4510_v19 = vpop.f32.mrb[124].mxu1 }
0x5830   :  { %v4511_v11 = vadd.f32 %v4510_v19, %v7331_v9  ;;  %v5871_v12 = vpop.f32.mrb[125].mxu1 }
0x5831   :  { %v4513_v56 = vpop.f32.mrb[126].mxu1 }
0x5832   :  { %v4516_v3 = vadd.f32 %v7076_v6, %v4511_v11  ;;  %v5872_v58 = vpop.f32.mrb[127].mxu1 }
0x5834   :  { %6102 = vtanh.f32 %v4516_v3  ;;  %v5027_v28 = vmul.f32 -1.442695, %v4516_v3 }
0x5836   :  { %6104 = vpow2.f32 %v5027_v28 }
0x583e   :  { %v6103_v52 = vpop.eup %6102 }
0x583f   :  { %4526 = vrot.lane.b32.xlu1 %v6103_v52, %s6236_s25 }
0x5840   :  { %v6105_v0 = vpop.eup %6104 }
0x5841   :  { %v4520_v38 = vadd.f32 1.0, %v6105_v0 }
0x5843   :  { %6106 = vrcp.f32 %v4520_v38 }
0x584d   :  { %v6107_v35 = vpop.eup %6106 }
0x584e   :  { %v4524_v9 = vmul.f32 %v6107_v35, %v7305_v55 }
0x58b1   :  { %v4527_v17 = vpop.permute.xlu1 %4526 }
0x58b2   :  { %v4529_v31 = vmul.f32 %v6107_v35, %v4527_v17  ;;  %v1796_v17 = vsub.f32 %v6760_v37, %v6764_v42 }
0x58b4   :  { %4531 = vrot.lane.b32.xlu0 %v4529_v31, %s6237_s5  ;;  %v1797_v31 = vmul.f32 1.442695, %v1796_v17 }
0x5926   :  { %v4532_v36 = vpop.permute.xlu0 %4531 }
0x5927   :  { %v4534_v41 = vadd.f32 %v4532_v36, %v4524_v9  ;;  %v2665_v36 = vsub.f32 %v6945_v27, %v6949_v50  ;;  %v4405_v50 = vsub.f32 %v7368_v34, %v7372_v57 }
0x5929   :  { %6108 = vtanh.f32 %v4534_v41 }
0x592a   :  { %6110 = vpow2.f32 %v3101_v4 }
0x5933   :  { %v6109_v6 = vpop.eup %6108 }
0x5934   :  { %4537 = vrot.lane.b32.xlu0 %v6109_v6, %s6236_s25  ;;  %v6111_v29 = vpop.eup %6110  ;;  %v3535_v6 = vsub.f32 %v7183_v33, %v7187_v48  ;;  %s4886_s25 = sshll.u32 %s6239_s13, 4  ;;  %s4887_s25 = int_to_ptr.vmem [resolvable:$true] %s4886_s25 }
0x5935   :  { %v3103_v49 = vsel %vm1792_vm3, %v6111_v29, 0.0  ;;  %s6185_s23 = scalar_lea.vmem %s4887_s25, 32  ;;  %p6186_p3 = scmp.lt.s32.totalorder %s4887_s25, %s4887_s25 }
0x59a6   :  { %v4538_v45 = vpop.permute.xlu0 %4537 }
0x59a7   :  { %v4540_v43 = vmul.f32 %v6107_v35, %v4538_v45 }
0x59a9   :  { %4542 = vrot.lane.b32.xlu0 %v4540_v43, %s6237_s5  ;;  %v4700_v55 = vpack.c.bf16 %v4540_v43, %v4540_v43  ;;  %v3536_v43 = vmul.f32 1.442695, %v3535_v6 }
0x5a1b   :  { %v4543_v32 = vpop.permute.xlu0 %4542 }
0x5a1c   :  { %5876 = vmatmul.mubr.msk.f32.vlgmr.msra.gmra.mrb[128].mxu1 %vm166_vm0, %v4543_v32 }
0x5aef   :  { %v4612_v44 = vpop.f32.mrb[128].mxu1 }
0x5af0   :  { %v4613_v47 = vadd.f32 %v4612_v44, %v6667_v40  ;;  %v5877_v61 = vpop.f32.mrb[129].mxu1  ;;  %v4406_v44 = vmul.f32 1.442695, %v4405_v50 }
0x5af2   :  { %v4616_v59 = vsel %vm1532_vm15, %v4613_v47, -inf }
0x5af3   :  { %4617 = vmax.xlane.f32.xlu0 %v4616_v59 }
0x5b09   :  { %4746 = vrot.lane.b32.xlu0 %v4700_v55, %s6237_s5  ;;  %s6181_s5 = scalar_lea.vmem %s4887_s25, 16 }
0x5b0a   :  { %p6182_p2 = scmp.ne.s32.totalorder %s4887_s25, %s6181_s5  ;;  %p6187_p4 = scmp.lt.s32.totalorder %s6185_s23, %s6181_s5 }
0x5b0c   :  { %p6188_p5 = por %p6187_p4, %p6186_p3 }
0x5b0e   :  { %p6189_p6 = pnand %p6188_p5, %p6182_p2 }
0x5b28   :  { %3104 = vadd.xlane.f32.xlu0 %v3103_v49 }
0x5b80   :  { %v4618_v51 = vpop.xlane.xlu0 %4617 }
0x5b81   :  { %v4619_v60 = vsub.f32 %v4613_v47, %v4618_v51 }
0x5b83   :  { %v4620_v25 = vmul.f32 1.442695, %v4619_v60 }
0x5b85   :  { %6112 = vpow2.f32 %v4620_v25 }
0x5b8f   :  { %v6113_v40 = vpop.eup %6112 }
0x5b90   :  { %v4622_v26 = vsel %vm1532_vm15, %v6113_v40, 0.0 }
0x5b91   :  { %4623 = vadd.xlane.f32.xlu1 %v4622_v26 }
0x5c1e   :  { %v4624_v62 = vpop.xlane.xlu1 %4623 }
0x5c1f   :  { %6114 = vrcp.f32 %v4624_v62 }
0x5c29   :  { %v6115_v7 = vpop.eup %6114 }
0x5c2a   :  { %v4626_v18 = vmul.f32 %v6115_v7, %v6113_v40 }
0x5c2c   :  { %5881 = vmatmul.mubr.msk.f32.vlgmr.msra.gmra.mrb[116].mxu0 %vm1545_vm2, %v4626_v18  ;;  %vm4865_vm2 = vcmp.eq.s32.totalorder %v6429_v53, 7 }
0x5c2d   :  { %5884 = vmatpush3.bf16.msra.mxu0 %v7106_v54  ;;  %5887 = vmatprep.mubr.msk.bf16.mxu0 %vm6234_vm1, %v6233_v14  ;;  %v4747_v54 = vpop.permute.xlu0 %4746 }
0x5c2e   :  { %5885 = vmatprep.subr.bf16.mxu0 %v6233_v14 }
0x5c31   :  { %5886 = vmatpush3.bf16.msra.mxu0 %v7115_v46 }
0x5c32   :  { %5891 = vmatprep.subr.bf16.mxu0 %v6233_v14 }
0x5cff   :  { %v4696_v22 = vpop.f32.mrb[116].mxu0 }
0x5d00   :  { %v4701_v39 = vpack.c.bf16 %v4696_v22, %v4696_v22  ;;  %v5882_v1 = vpop.f32.mrb[117].mxu0 }
0x5d02   :  { %5888 = vmatmul.mubr.msk.bf16.vlgmr.msra.gmra.mrb[120].mxu0 %vm166_vm0, %v4701_v39  ;;  %v3105_v39 = vpop.xlane.xlu0 %3104 }
0x5d03   :  { %5892 = vmatpush3.bf16.msra.mxu0 %v7125_v21  ;;  %5895 = vmatprep.mubr.msk.bf16.mxu0 %vm6234_vm1, %v6233_v14 }
0x5d04   :  { %5893 = vmatprep.subr.bf16.mxu0 %v6233_v14 }
0x5d07   :  { %5894 = vmatpush3.bf16.msra.mxu0 %v7134_v23 }
0x5d08   :  { %5899 = vmatprep.subr.bf16.mxu0 %v6233_v14 }
0x5d0a   :  { %5896 = vmatmul.mubr.msk.bf16.vlgmr.msra.gmra.mrb[124].mxu0 %vm166_vm0, %v4747_v54 }
0x5d0b   :  { %5900 = vmatpush3.bf16.msra.mxu0 %v7142_v24  ;;  %5903 = vmatprep.mubr.msk.bf16.mxu0 %vm6234_vm1, %v6233_v14 }
0x5d0c   :  { %5901 = vmatprep.subr.bf16.mxu0 %v6233_v14 }
0x5d0f   :  { %5902 = vmatpush3.bf16.msra.mxu0 %v7151_v63 }
0x5dd5   :  { %v4739_v46 = vpop.f32.mrb[120].mxu0 }
0x5dd6   :  { %v5889_v21 = vpop.f32.mrb[121].mxu0 }
0x5dd7   :  { %v4742_v20 = vpop.f32.mrb[122].mxu0 }
0x5dd8   :  { %v5890_v19 = vpop.f32.mrb[123].mxu0 }
0x5ddd   :  { %v4785_v11 = vpop.f32.mrb[124].mxu0 }
0x5dde   :  { %v4786_v23 = vadd.f32 %v4785_v11, %v4739_v46  ;;  %v5897_v12 = vpop.f32.mrb[125].mxu0 }
0x5ddf   :  { %v4788_v56 = vpop.f32.mrb[126].mxu0 }
0x5de0   :  { %v4791_v3 = vadd.f32 %v7155_v13, %v4786_v23  ;;  %v5898_v58 = vpop.f32.mrb[127].mxu0  ;;  %v2231_v13 = vsub.f32 %v6850_v30, %v6854_v10  ;;  %v3970_v30 = vsub.f32 %v7276_v16, %v7280_v15 }
0x5de2   :  { %6116 = vtanh.f32 %v4791_v3  ;;  %v2232_v9 = vmul.f32 1.442695, %v2231_v13  ;;  %v3971_v27 = vmul.f32 1.442695, %v3970_v30 }
0x5de3   :  { %6118 = vpow2.f32 %v1797_v31 }
0x5de4   :  { %6120 = vpow2.f32 %v2232_v9 }
0x5dec   :  { %v6117_v24 = vpop.eup %6116 }
0x5ded   :  { %v4793_v52 = vpack.c.bf16 %v6117_v24, %v6117_v24  ;;  %v6119_v32 = vpop.eup %6118 }
0x5dee   :  { %v1799_v33 = vsel %vm1792_vm3, %v6119_v32, 0.0  ;;  %v6121_v48 = vpop.eup %6120 }
0x5def   :  { %5904 = vmatmul.mubr.msk.bf16.vlgmr.msra.gmra.mrb[128].mxu0 %vm166_vm0, %v4793_v52  ;;  %v2234_v61 = vsel %vm1792_vm3, %v6121_v48, 0.0 }
0x5ec2   :  { %v4831_v28 = vpop.f32.mrb[128].mxu0 }
0x5ec3   :  { %v4832_v14 = vadd.f32 %v7180_v5, %v4831_v28  ;;  %v5905_v63 = vpop.f32.mrb[129].mxu0  ;;  %v2666_v5 = vmul.f32 1.442695, %v2665_v36 }
0x5ec4   :  { %v4834_v0 = vpop.f32.mrb[130].mxu0 }
0x5ec5   :  { %v5906_v38 = vpop.f32.mrb[131].mxu0  ;;  %v4837_v35 = vsel %vm1792_vm3, %v4832_v14, -inf  ;;  %6122 = vpow2.f32 %v2666_v5 }
0x5ec6   :  { %4838 = vmax.xlane.f32.xlu1 %v4837_v35  ;;  %6124 = vpow2.f32 %v3536_v43 }
0x5ec7   :  { %6126 = vpow2.f32 %v3971_v27 }
0x5ec8   :  { %6128 = vpow2.f32 %v4406_v44 }
0x5ecf   :  { %v6123_v59 = vpop.eup %6122 }
0x5ed0   :  { %v2668_v15 = vsel %vm1792_vm3, %v6123_v59, 0.0  ;;  %v6125_v55 = vpop.eup %6124 }
0x5ed1   :  { %v3538_v34 = vsel %vm1792_vm3, %v6125_v55, 0.0  ;;  %v6127_v57 = vpop.eup %6126 }
0x5ed2   :  { %v3973_v2 = vsel %vm1792_vm3, %v6127_v57, 0.0  ;;  %v6129_v4 = vpop.eup %6128 }
0x5ed3   :  { %v4408_v29 = vsel %vm1792_vm3, %v6129_v4, 0.0 }
0x5f53   :  { %v4839_v41 = vpop.xlane.xlu1 %4838 }
0x5f54   :  { %vm4846_vm0 = vcmp.eq.f32.partialorder %v4832_v14, %v4839_v41  ;;  %v4840_v47 = vsub.f32 %v4832_v14, %v4839_v41 }
0x5f55   :  { %v4847_v45 = vsel %vm4846_vm0, %v6429_v53, 128 }
0x5f56   :  { %v4848_v37 = vsel %vm1792_vm3, %v4847_v45, 2147483647  ;;  %v4841_v16 = vmul.f32 1.442695, %v4840_v47 }
0x5f57   :  { %v4850_v42 = vshra.s32 %v4848_v37, 16  ;;  %v4849_v60 = vand.u32 65535, %v4848_v37 }
0x5f58   :  { %6130 = vpow2.f32 %v4841_v16 }
0x5f59   :  { %v4852_v10 = vcvt.s32.f32 %v4850_v42  ;;  %v4851_v40 = vcvt.s32.f32 %v4849_v60 }
0x5f5b   :  { %4853 = vmin.xlane.f32.xlu1 %v4852_v10 }
0x5f5f   :  { %1800 = vadd.xlane.f32.xlu1 %v1799_v33 }
0x5f62   :  { %v6131_v49 = vpop.eup %6130 }
0x5f63   :  { %2235 = vadd.xlane.f32.xlu1 %v2234_v61  ;;  %v4843_v51 = vsel %vm1792_vm3, %v6131_v49, 0.0 }
0x5f67   :  { %2669 = vadd.xlane.f32.xlu1 %v2668_v15 }
0x5f6b   :  { %3539 = vadd.xlane.f32.xlu1 %v3538_v34 }
0x5f6f   :  { %3974 = vadd.xlane.f32.xlu1 %v3973_v2 }
0x5f73   :  { %4409 = vadd.xlane.f32.xlu1 %v4408_v29 }
0x5f77   :  { %4844 = vadd.xlane.f32.xlu1 %v4843_v51 }
0x5fe8   :  { %v4854_v25 = vpop.xlane.xlu1 %4853 }
0x5fe9   :  { %vm4855_vm1 = vcmp.eq.f32.partialorder %v4852_v10, %v4854_v25 }
0x5fea   :  { %v4856_v26 = vsel %vm4855_vm1, %v4851_v40, inf }
0x5feb   :  { %4857 = vmin.xlane.f32.xlu1 %v4856_v26 }
0x5fec   :  { %v1801_v62 = vpop.xlane.xlu1 %1800 }
0x5fed   :  { %6132 = vrcp.f32 %v1801_v62 }
0x5ff0   :  { %v2236_v7 = vpop.xlane.xlu1 %2235 }
0x5ff1   :  { %6134 = vrcp.f32 %v2236_v7 }
0x5ff4   :  { %v2670_v18 = vpop.xlane.xlu1 %2669 }
0x5ff5   :  { %6136 = vrcp.f32 %v2670_v18 }
0x5ff6   :  { %6138 = vrcp.f32 %v3105_v39 }
0x5ff7   :  { %v6133_v46 = vpop.eup %6132 }
0x5ff8   :  { %v3540_v22 = vpop.xlane.xlu1 %3539  ;;  %v1823_v11 = vsel %vm1821_vm10, %v6133_v46, 0.0 }
0x5ff9   :  { %6140 = vrcp.f32 %v3540_v22 }
0x5ffb   :  { %v6135_v20 = vpop.eup %6134 }
0x5ffc   :  { %v3975_v1 = vpop.xlane.xlu1 %3974  ;;  %v2257_v23 = vsel %vm1319_vm11, %v6135_v20, %v1823_v11 }
0x5ffd   :  { %6142 = vrcp.f32 %v3975_v1 }
0x5fff   :  { %v6137_v19 = vpop.eup %6136 }
0x6000   :  { %v4410_v54 = vpop.xlane.xlu1 %4409  ;;  %v6139_v12 = vpop.eup %6138  ;;  %v2692_v56 = vsel %vm2690_vm5, %v6137_v19, %v2257_v23 }
0x6001   :  { %6144 = vrcp.f32 %v4410_v54  ;;  %v3127_v52 = vsel %vm3125_vm12, %v6139_v12, %v2692_v56 }
0x6003   :  { %v6141_v3 = vpop.eup %6140 }
0x6004   :  { %v4845_v21 = vpop.xlane.xlu1 %4844  ;;  %v3562_v28 = vsel %vm3560_vm7, %v6141_v3, %v3127_v52 }
0x6005   :  { %6146 = vrcp.f32 %v4845_v21 }
0x6007   :  { %v6143_v58 = vpop.eup %6142 }
0x6008   :  { %v3997_v14 = vsel %vm3995_vm4, %v6143_v58, %v3562_v28 }
0x600b   :  { %v6145_v24 = vpop.eup %6144 }
0x600c   :  { %v4432_v0 = vsel %vm4430_vm14, %v6145_v24, %v3997_v14 }
0x600f   :  { %v6147_v63 = vpop.eup %6146 }
0x6010   :  { %v4867_v38 = vsel %vm4865_vm2, %v6147_v63, %v4432_v0 }
0x6011   :  { %4869 = vst.msk [vmem:[#allocation7] sm:$0x1] %vm1532_vm15, %v4867_v38 }
0x6012   :  { %6192 = shalt.err (!%p6189_p6)
}
0x6013   :  { %s6193_s4 = scalar_lea.hbm %s7511_s15, 16 }
0x6014   :  { %p6194_p7 = scmp.ne.s32.totalorder %s7511_s15, %s6193_s4  ;;  %p6197_p8 = scmp.lt.u32.totalorder %s6193_s4, %s7511_s15 }
0x6016   :  { %p6199_p9 = pnand %p6197_p8, %p6194_p7 }
0x6018   :  { %6202 = shalt.err (!%p6199_p9)
}
0x6019   :  { %4889 = dma.vmem_to_hbm [thread:$0]  %s4887_s25, 16, %s7511_s15, [#allocation8]   ;;  %v4860_v35 = vcvt.f32.s32 %v4854_v25 }
0x601a   :  { %s6240_s16 = smov [#allocation6]  }
0x601b   :  { %v4861_v31 = vshll.u32 %v4860_v35, 16  ;;  %s4876_s17 = sshll.u32 %s6240_s16, 4  ;;  %s4877_s17 = int_to_ptr.vmem [resolvable:$true] %s4876_s17 }
0x601c   :  { %s6203_s7 = scalar_lea.vmem %s4877_s17, 16  ;;  %s6207_s8 = scalar_lea.vmem %s4877_s17, 32 }
0x601d   :  { %p6204_p10 = scmp.ne.s32.totalorder %s4877_s17, %s6203_s7  ;;  %p6208_p11 = scmp.lt.s32.totalorder %s4877_s17, %s4877_s17 }
0x601e   :  { %p6209_p12 = scmp.lt.s32.totalorder %s6207_s8, %s6203_s7 }
0x6020   :  { %p6210_p13 = por %p6209_p12, %p6208_p11 }
0x6022   :  { %p6211_p0 = pnand %p6210_p13, %p6204_p10 }
0x6078   :  { %v4858_v17 = vpop.xlane.xlu1 %4857 }
0x6079   :  { %v4859_v13 = vcvt.f32.s32 %v4858_v17 }
0x607b   :  { %v4862_v9 = vadd.s32 %v4861_v31, %v4859_v13 }
0x607d   :  { %v4866_v36 = vsel %vm4865_vm2, %v4862_v9, %v7383_v8 }
0x607e   :  { %4868 = vst.msk [vmem:[#allocation6] sm:$0x1] %vm1532_vm15, %v4866_v36 }
0x607f   :  { %6214 = shalt.err (!%p6211_p0)
}
0x6080   :  { %s6215_s1 = scalar_lea.hbm %s7510_s14, 16 }
0x6081   :  { %p6216_p1 = scmp.ne.s32.totalorder %s7510_s14, %s6215_s1  ;;  %p6219_p2 = scmp.lt.u32.totalorder %s6215_s1, %s7510_s14 }
0x6083   :  { %p6221_p3 = pnand %p6219_p2, %p6216_p1 }
0x6085   :  { %6224 = shalt.err (!%p6221_p3)
}
0x6086   :  { %4879 = dma.vmem_to_hbm [thread:$0]  %s4877_s17, 16, %s7510_s14, [#allocation5]  }
0x6087   :  { %6227 = dma.done.wait [#allocation5], 16  }
0x6088   :  { %6228 = vsyncadd [#allocation5], 4294967280 }
0x6089   :  { %6229 = dma.done.wait [#allocation8], 16  }
0x608a   :  { %6230 = vsyncadd [#allocation8], 4294967280 }
0x608b   :  { %4896 = vsyncpa [#allocation4], 1 }
0x608c   :  { %4897 = vsyncpa [#allocation5], 1 }
0x608d   :  { %4898 = vsyncpa [#allocation8], 1 }

</bundles_post_ra>
